<compile_context>
chip_gen: v7x
topology: tpu7x:2x2x1
jax: 0.10.0
libtpu: 0.0.40
codegen_flags: <defaults>
</compile_context>

<pallas_src>
import jax
import jax.numpy as jnp
import numpy as np
from jax.experimental import pallas as pl
from jax.experimental.pallas import tpu as pltpu


def _fused_conv_block_kernel(x_ref, w1_ref, s1_ref, w2_ref, s2_ref, o_ref,
                             xp1_ref, xp2_ref):
    """Fused [conv3x3(pad=1) + folded-BN + ReLU] x 2 for one image.

    x_ref   : (1, H, W, Cin)        unpadded input image
    w1_ref  : (9, Cin, Cout)        layer-1 weights (BN1 scale folded in)
    s1_ref  : (1, Cout)             layer-1 shift  (conv bias / BN folded)
    w2_ref  : (9, Cout, Cout)       layer-2 weights (BN2 scale folded in)
    s2_ref  : (1, Cout)             layer-2 shift
    o_ref   : (1, H, W, Cout)       output image
    xp1_ref : (H+2, W+2, Cin)  VMEM  zero-padded layer-1 input
    xp2_ref : (H+2, W+2, Cout) VMEM  zero-padded layer-1 output (layer-2 input)
    """
    H = o_ref.shape[1]
    W = o_ref.shape[2]
    Cin = x_ref.shape[3]
    Cout = o_ref.shape[3]

    def conv3x3_bn_relu(xp_ref, w_ref, s_ref, cin):
        # 3x3 conv (stride 1) as 9 shifted (H*W, cin) x (cin, Cout) MXU matmuls
        # accumulated in f32.  The (H, W, cin) -> (H*W, cin) reshape only merges
        # leading (non-lane) dims, so it does not move data across lanes.
        acc = jnp.zeros((H * W, Cout), jnp.float32)
        for dy in range(3):
            for dx in range(3):
                patch = xp_ref[dy:dy + H, dx:dx + W, :].reshape(H * W, cin)
                acc = acc + jnp.dot(patch, w_ref[dy * 3 + dx],
                                    preferred_element_type=jnp.float32)
        # BN scale already folded into the weights -> epilogue is add + ReLU.
        return jnp.maximum(acc + s_ref[...], 0.0)

    # ---- layer 1: zero the halo once, copy the interior, convolve ----------
    xp1_ref[...] = jnp.zeros_like(xp1_ref)
    xp1_ref[1:H + 1, 1:W + 1, :] = x_ref[0].astype(jnp.float32)
    y1 = conv3x3_bn_relu(xp1_ref, w1_ref, s1_ref, Cin)        # (H*W, Cout) f32

    # ---- layer 2: intermediate stays resident in VMEM (fused) --------------
    xp2_ref[...] = jnp.zeros_like(xp2_ref)
    xp2_ref[1:H + 1, 1:W + 1, :] = y1.reshape(H, W, Cout)
    y2 = conv3x3_bn_relu(xp2_ref, w2_ref, s2_ref, Cout)       # (H*W, Cout) f32

    o_ref[...] = y2.reshape(1, H, W, Cout).astype(o_ref.dtype)


def conv_block_forward(x_nchw, params, eps=1e-5):
    """PyTorch conv_block: [Conv2d(3x3, pad=1) -> BatchNorm2d -> ReLU] x 2.

    BatchNorm is applied in inference mode (running statistics folded into an
    affine transform whose scale is folded into the conv weights).
    """
    # TODO(synk): training-mode BatchNorm (batch statistics + running-stat
    # updates) is not reproduced; inference-mode affine BN is used instead.
    x = jnp.transpose(x_nchw, (0, 2, 3, 1))            # NCHW -> NHWC
    N, H, W, Cin = x.shape
    p1, p2 = params
    Cout = p1["w"].shape[-1]

    def fold(p, cin):
        # scale = gamma / sqrt(var + eps); fold it into the weights so the
        # kernel epilogue is only `+ shift` (weight-side constant fold).
        scale = p["gamma"] / jnp.sqrt(p["var"] + eps)                  # (Cout,)
        w9 = p["w"].reshape(9, cin, Cout) * scale[None, None, :]       # (9,cin,Cout)
        shift = p["beta"] + scale * (p["b"] - p["mean"])               # (Cout,)
        return w9.astype(jnp.float32), shift.reshape(1, Cout).astype(jnp.float32)

    w1, s1 = fold(p1, Cin)
    w2, s2 = fold(p2, Cout)

    out_nhwc = pl.pallas_call(
        _fused_conv_block_kernel,
        out_shape=jax.ShapeDtypeStruct((N, H, W, Cout), x.dtype),
        grid=(N,),
        in_specs=[
            pl.BlockSpec((1, H, W, Cin), lambda n: (n, 0, 0, 0)),
            pl.BlockSpec((9, Cin, Cout), lambda n: (0, 0, 0)),
            pl.BlockSpec((1, Cout), lambda n: (0, 0)),
            pl.BlockSpec((9, Cout, Cout), lambda n: (0, 0, 0)),
            pl.BlockSpec((1, Cout), lambda n: (0, 0)),
        ],
        out_specs=pl.BlockSpec((1, H, W, Cout), lambda n: (n, 0, 0, 0)),
        scratch_shapes=[
            pltpu.VMEM((H + 2, W + 2, Cin), jnp.float32),
            pltpu.VMEM((H + 2, W + 2, Cout), jnp.float32),
        ],
        compiler_params=pltpu.CompilerParams(
            dimension_semantics=("parallel",)),
    )(x, w1, s1, w2, s2)

    return jnp.transpose(out_nhwc, (0, 3, 1, 2))        # NHWC -> NCHW


def _reference_forward(x_nchw, params, eps=1e-5):
    """Pure-JAX reference (lax conv) for correctness checking."""
    x = jnp.transpose(x_nchw, (0, 2, 3, 1))
    for p in params:
        y = jax.lax.conv_general_dilated(
            x, p["w"], window_strides=(1, 1), padding="SAME",
            dimension_numbers=("NHWC", "HWIO", "NHWC"),
            precision=jax.lax.Precision.HIGHEST)
        y = y + p["b"]
        y = (y - p["mean"]) / jnp.sqrt(p["var"] + eps) * p["gamma"] + p["beta"]
        x = jnp.maximum(y, 0.0)
    return jnp.transpose(x, (0, 3, 1, 2))


def _make_params(key, in_ch, out_ch):
    """Deterministic parameters for the two conv+BN layers."""
    params = []
    cin = in_ch
    for _ in range(2):
        key, kw, kb, kg, kbeta, km, kv = jax.random.split(key, 7)
        fan_in = cin * 9
        params.append(dict(
            w=jax.random.normal(kw, (3, 3, cin, out_ch), jnp.float32)
              / np.sqrt(fan_in),
            b=0.1 * jax.random.normal(kb, (out_ch,), jnp.float32),
            gamma=1.0 + 0.1 * jax.random.normal(kg, (out_ch,), jnp.float32),
            beta=0.1 * jax.random.normal(kbeta, (out_ch,), jnp.float32),
            mean=0.1 * jax.random.normal(km, (out_ch,), jnp.float32),
            var=jax.random.uniform(kv, (out_ch,), jnp.float32,
                                   minval=0.5, maxval=1.5),
        ))
        cin = out_ch
    return params


if __name__ == "__main__":
    key = jax.random.PRNGKey(0)
    key, kx = jax.random.split(key)

    N, IN_CH, OUT_CH, H, W = 2, 4, 8, 16, 16
    x = jax.random.normal(kx, (N, IN_CH, H, W), jnp.float32)   # NCHW, as PyTorch
    params = _make_params(key, IN_CH, OUT_CH)

    out = conv_block_forward(x, params)
    out = jax.block_until_ready(out)

    ref = jax.block_until_ready(_reference_forward(x, params))
    assert out.shape == (N, OUT_CH, H, W)
    np.testing.assert_allclose(np.asarray(out), np.asarray(ref),
                               rtol=1e-4, atol=1e-4)
    print("KERNEL_OK")
</pallas_src>

<mosaic_0001>
module attributes {stable_mosaic.version = 11 : i64} {
  func.func @_fused_conv_block_kernel(%arg0: i32, %arg1: memref<1x16x16x4xf32, #tpu.memory_space<vmem>>, %arg2: memref<9x4x8xf32, #tpu.memory_space<vmem>>, %arg3: memref<1x8xf32, #tpu.memory_space<vmem>>, %arg4: memref<9x8x8xf32, #tpu.memory_space<vmem>>, %arg5: memref<1x8xf32, #tpu.memory_space<vmem>>, %arg6: memref<1x16x16x8xf32, #tpu.memory_space<vmem>>, %arg7: memref<18x18x4xf32, #tpu.memory_space<vmem>>, %arg8: memref<18x18x8xf32, #tpu.memory_space<vmem>>) attributes {dimension_semantics = [#tpu.dimension_semantics<parallel>], iteration_bounds = array<i64: 2>, scalar_prefetch = 0 : i64, scratch_operands = 2 : i64, tpu.core_type = #tpu.core_type<tc>, window_params = [{transform_indices = @transform_0, window_bounds = array<i64: 1, 16, 16, 4>}, {pipeline_mode = #tpu.pipeline_mode<synchronous>, transform_indices = @transform_1, window_bounds = array<i64: 9, 4, 8>}, {pipeline_mode = #tpu.pipeline_mode<synchronous>, transform_indices = @transform_2, window_bounds = array<i64: 1, 8>}, {pipeline_mode = #tpu.pipeline_mode<synchronous>, transform_indices = @transform_3, window_bounds = array<i64: 9, 8, 8>}, {pipeline_mode = #tpu.pipeline_mode<synchronous>, transform_indices = @transform_4, window_bounds = array<i64: 1, 8>}, {transform_indices = @transform_5, window_bounds = array<i64: 1, 16, 16, 8>}]} {
    %cst = arith.constant 0.000000e+00 : f32
    %0 = vector.broadcast %cst : f32 to vector<18x18x4xf32>
    %c0 = arith.constant 0 : index
    %c0_0 = arith.constant 0 : index
    %c0_1 = arith.constant 0 : index
    %1 = vector.load %arg7[%c0, %c0_0, %c0_1] : memref<18x18x4xf32, #tpu.memory_space<vmem>>, vector<18x18x4xf32>
    tpu.vector_store %arg7[%c0, %c0_0, %c0_1], %0 {strides = array<i32>} : memref<18x18x4xf32, #tpu.memory_space<vmem>>, vector<18x18x4xf32>,
    %c0_2 = arith.constant 0 : index
    %c0_3 = arith.constant 0 : index
    %c0_4 = arith.constant 0 : index
    %c0_5 = arith.constant 0 : index
    %2 = vector.load %arg1[%c0_2, %c0_3, %c0_4, %c0_5] : memref<1x16x16x4xf32, #tpu.memory_space<vmem>>, vector<1x16x16x4xf32>
    %3 = vector.shape_cast %2 : vector<1x16x16x4xf32> to vector<16x16x4xf32>
    %c1 = arith.constant 1 : index
    %c1_6 = arith.constant 1 : index
    %c0_7 = arith.constant 0 : index
    %4 = vector.load %arg7[%c1, %c1_6, %c0_7] : memref<18x18x4xf32, #tpu.memory_space<vmem>>, vector<16x16x4xf32>
    tpu.vector_store %arg7[%c1, %c1_6, %c0_7], %3 {strides = array<i32>} : memref<18x18x4xf32, #tpu.memory_space<vmem>>, vector<16x16x4xf32>,
    %cst_8 = arith.constant 0.000000e+00 : f32
    %5 = vector.broadcast %cst_8 : f32 to vector<256x8xf32>
    %c0_9 = arith.constant 0 : index
    %c0_10 = arith.constant 0 : index
    %c0_11 = arith.constant 0 : index
    %6 = vector.load %arg7[%c0_9, %c0_10, %c0_11] : memref<18x18x4xf32, #tpu.memory_space<vmem>>, vector<16x16x4xf32>
    %7 = vector.shape_cast %6 : vector<16x16x4xf32> to vector<256x4xf32>
    %c0_12 = arith.constant 0 : index
    %c0_13 = arith.constant 0 : index
    %c0_14 = arith.constant 0 : index
    %8 = vector.load %arg2[%c0_12, %c0_13, %c0_14] : memref<9x4x8xf32, #tpu.memory_space<vmem>>, vector<1x4x8xf32>
    %9 = vector.shape_cast %8 : vector<1x4x8xf32> to vector<4x8xf32>
    %cst_15 = arith.constant dense<0.000000e+00> : vector<256x8xf32>
    %10 = tpu.matmul %7, %9, %cst_15 {dimension_numbers = #tpu.dot_dimension_numbers<[1], [0], [0], [1], [0, 0, 1, 1], [], []>} : vector<256x4xf32>, vector<4x8xf32>, vector<256x8xf32> -> vector<256x8xf32>
    %11 = arith.addf %5, %10 : vector<256x8xf32>
    %c0_16 = arith.constant 0 : index
    %c1_17 = arith.constant 1 : index
    %c0_18 = arith.constant 0 : index
    %12 = vector.load %arg7[%c0_16, %c1_17, %c0_18] : memref<18x18x4xf32, #tpu.memory_space<vmem>>, vector<16x16x4xf32>
    %13 = vector.shape_cast %12 : vector<16x16x4xf32> to vector<256x4xf32>
    %c1_19 = arith.constant 1 : index
    %c0_20 = arith.constant 0 : index
    %c0_21 = arith.constant 0 : index
    %14 = vector.load %arg2[%c1_19, %c0_20, %c0_21] : memref<9x4x8xf32, #tpu.memory_space<vmem>>, vector<1x4x8xf32>
    %15 = vector.shape_cast %14 : vector<1x4x8xf32> to vector<4x8xf32>
    %cst_22 = arith.constant dense<0.000000e+00> : vector<256x8xf32>
    %16 = tpu.matmul %13, %15, %cst_22 {dimension_numbers = #tpu.dot_dimension_numbers<[1], [0], [0], [1], [0, 0, 1, 1], [], []>} : vector<256x4xf32>, vector<4x8xf32>, vector<256x8xf32> -> vector<256x8xf32>
    %17 = arith.addf %11, %16 : vector<256x8xf32>
    %c0_23 = arith.constant 0 : index
    %c2 = arith.constant 2 : index
    %c0_24 = arith.constant 0 : index
    %18 = vector.load %arg7[%c0_23, %c2, %c0_24] : memref<18x18x4xf32, #tpu.memory_space<vmem>>, vector<16x16x4xf32>
    %19 = vector.shape_cast %18 : vector<16x16x4xf32> to vector<256x4xf32>
    %c2_25 = arith.constant 2 : index
    %c0_26 = arith.constant 0 : index
    %c0_27 = arith.constant 0 : index
    %20 = vector.load %arg2[%c2_25, %c0_26, %c0_27] : memref<9x4x8xf32, #tpu.memory_space<vmem>>, vector<1x4x8xf32>
    %21 = vector.shape_cast %20 : vector<1x4x8xf32> to vector<4x8xf32>
    %cst_28 = arith.constant dense<0.000000e+00> : vector<256x8xf32>
    %22 = tpu.matmul %19, %21, %cst_28 {dimension_numbers = #tpu.dot_dimension_numbers<[1], [0], [0], [1], [0, 0, 1, 1], [], []>} : vector<256x4xf32>, vector<4x8xf32>, vector<256x8xf32> -> vector<256x8xf32>
    %23 = arith.addf %17, %22 : vector<256x8xf32>
    %c1_29 = arith.constant 1 : index
    %c0_30 = arith.constant 0 : index
    %c0_31 = arith.constant 0 : index
    %24 = vector.load %arg7[%c1_29, %c0_30, %c0_31] : memref<18x18x4xf32, #tpu.memory_space<vmem>>, vector<16x16x4xf32>
    %25 = vector.shape_cast %24 : vector<16x16x4xf32> to vector<256x4xf32>
    %c3 = arith.constant 3 : index
    %c0_32 = arith.constant 0 : index
    %c0_33 = arith.constant 0 : index
    %26 = vector.load %arg2[%c3, %c0_32, %c0_33] : memref<9x4x8xf32, #tpu.memory_space<vmem>>, vector<1x4x8xf32>
    %27 = vector.shape_cast %26 : vector<1x4x8xf32> to vector<4x8xf32>
    %cst_34 = arith.constant dense<0.000000e+00> : vector<256x8xf32>
    %28 = tpu.matmul %25, %27, %cst_34 {dimension_numbers = #tpu.dot_dimension_numbers<[1], [0], [0], [1], [0, 0, 1, 1], [], []>} : vector<256x4xf32>, vector<4x8xf32>, vector<256x8xf32> -> vector<256x8xf32>
    %29 = arith.addf %23, %28 : vector<256x8xf32>
    %c1_35 = arith.constant 1 : index
    %c1_36 = arith.constant 1 : index
    %c0_37 = arith.constant 0 : index
    %30 = vector.load %arg7[%c1_35, %c1_36, %c0_37] : memref<18x18x4xf32, #tpu.memory_space<vmem>>, vector<16x16x4xf32>
    %31 = vector.shape_cast %30 : vector<16x16x4xf32> to vector<256x4xf32>
    %c4 = arith.constant 4 : index
    %c0_38 = arith.constant 0 : index
    %c0_39 = arith.constant 0 : index
    %32 = vector.load %arg2[%c4, %c0_38, %c0_39] : memref<9x4x8xf32, #tpu.memory_space<vmem>>, vector<1x4x8xf32>
    %33 = vector.shape_cast %32 : vector<1x4x8xf32> to vector<4x8xf32>
    %cst_40 = arith.constant dense<0.000000e+00> : vector<256x8xf32>
    %34 = tpu.matmul %31, %33, %cst_40 {dimension_numbers = #tpu.dot_dimension_numbers<[1], [0], [0], [1], [0, 0, 1, 1], [], []>} : vector<256x4xf32>, vector<4x8xf32>, vector<256x8xf32> -> vector<256x8xf32>
    %35 = arith.addf %29, %34 : vector<256x8xf32>
    %c1_41 = arith.constant 1 : index
    %c2_42 = arith.constant 2 : index
    %c0_43 = arith.constant 0 : index
    %36 = vector.load %arg7[%c1_41, %c2_42, %c0_43] : memref<18x18x4xf32, #tpu.memory_space<vmem>>, vector<16x16x4xf32>
    %37 = vector.shape_cast %36 : vector<16x16x4xf32> to vector<256x4xf32>
    %c5 = arith.constant 5 : index
    %c0_44 = arith.constant 0 : index
    %c0_45 = arith.constant 0 : index
    %38 = vector.load %arg2[%c5, %c0_44, %c0_45] : memref<9x4x8xf32, #tpu.memory_space<vmem>>, vector<1x4x8xf32>
    %39 = vector.shape_cast %38 : vector<1x4x8xf32> to vector<4x8xf32>
    %cst_46 = arith.constant dense<0.000000e+00> : vector<256x8xf32>
    %40 = tpu.matmul %37, %39, %cst_46 {dimension_numbers = #tpu.dot_dimension_numbers<[1], [0], [0], [1], [0, 0, 1, 1], [], []>} : vector<256x4xf32>, vector<4x8xf32>, vector<256x8xf32> -> vector<256x8xf32>
    %41 = arith.addf %35, %40 : vector<256x8xf32>
    %c2_47 = arith.constant 2 : index
    %c0_48 = arith.constant 0 : index
    %c0_49 = arith.constant 0 : index
    %42 = vector.load %arg7[%c2_47, %c0_48, %c0_49] : memref<18x18x4xf32, #tpu.memory_space<vmem>>, vector<16x16x4xf32>
    %43 = vector.shape_cast %42 : vector<16x16x4xf32> to vector<256x4xf32>
    %c6 = arith.constant 6 : index
    %c0_50 = arith.constant 0 : index
    %c0_51 = arith.constant 0 : index
    %44 = vector.load %arg2[%c6, %c0_50, %c0_51] : memref<9x4x8xf32, #tpu.memory_space<vmem>>, vector<1x4x8xf32>
    %45 = vector.shape_cast %44 : vector<1x4x8xf32> to vector<4x8xf32>
    %cst_52 = arith.constant dense<0.000000e+00> : vector<256x8xf32>
    %46 = tpu.matmul %43, %45, %cst_52 {dimension_numbers = #tpu.dot_dimension_numbers<[1], [0], [0], [1], [0, 0, 1, 1], [], []>} : vector<256x4xf32>, vector<4x8xf32>, vector<256x8xf32> -> vector<256x8xf32>
    %47 = arith.addf %41, %46 : vector<256x8xf32>
    %c2_53 = arith.constant 2 : index
    %c1_54 = arith.constant 1 : index
    %c0_55 = arith.constant 0 : index
    %48 = vector.load %arg7[%c2_53, %c1_54, %c0_55] : memref<18x18x4xf32, #tpu.memory_space<vmem>>, vector<16x16x4xf32>
    %49 = vector.shape_cast %48 : vector<16x16x4xf32> to vector<256x4xf32>
    %c7 = arith.constant 7 : index
    %c0_56 = arith.constant 0 : index
    %c0_57 = arith.constant 0 : index
    %50 = vector.load %arg2[%c7, %c0_56, %c0_57] : memref<9x4x8xf32, #tpu.memory_space<vmem>>, vector<1x4x8xf32>
    %51 = vector.shape_cast %50 : vector<1x4x8xf32> to vector<4x8xf32>
    %cst_58 = arith.constant dense<0.000000e+00> : vector<256x8xf32>
    %52 = tpu.matmul %49, %51, %cst_58 {dimension_numbers = #tpu.dot_dimension_numbers<[1], [0], [0], [1], [0, 0, 1, 1], [], []>} : vector<256x4xf32>, vector<4x8xf32>, vector<256x8xf32> -> vector<256x8xf32>
    %53 = arith.addf %47, %52 : vector<256x8xf32>
    %c2_59 = arith.constant 2 : index
    %c2_60 = arith.constant 2 : index
    %c0_61 = arith.constant 0 : index
    %54 = vector.load %arg7[%c2_59, %c2_60, %c0_61] : memref<18x18x4xf32, #tpu.memory_space<vmem>>, vector<16x16x4xf32>
    %55 = vector.shape_cast %54 : vector<16x16x4xf32> to vector<256x4xf32>
    %c8 = arith.constant 8 : index
    %c0_62 = arith.constant 0 : index
    %c0_63 = arith.constant 0 : index
    %56 = vector.load %arg2[%c8, %c0_62, %c0_63] : memref<9x4x8xf32, #tpu.memory_space<vmem>>, vector<1x4x8xf32>
    %57 = vector.shape_cast %56 : vector<1x4x8xf32> to vector<4x8xf32>
    %cst_64 = arith.constant dense<0.000000e+00> : vector<256x8xf32>
    %58 = tpu.matmul %55, %57, %cst_64 {dimension_numbers = #tpu.dot_dimension_numbers<[1], [0], [0], [1], [0, 0, 1, 1], [], []>} : vector<256x4xf32>, vector<4x8xf32>, vector<256x8xf32> -> vector<256x8xf32>
    %59 = arith.addf %53, %58 : vector<256x8xf32>
    %c0_65 = arith.constant 0 : index
    %c0_66 = arith.constant 0 : index
    %60 = vector.load %arg3[%c0_65, %c0_66] : memref<1x8xf32, #tpu.memory_space<vmem>>, vector<1x8xf32>
    %61 = vector.broadcast %60 : vector<1x8xf32> to vector<256x8xf32>
    %62 = arith.addf %59, %61 : vector<256x8xf32>
    %cst_67 = arith.constant 0.000000e+00 : f32
    %63 = vector.broadcast %cst_67 : f32 to vector<256x8xf32>
    %64 = arith.maximumf %62, %63 : vector<256x8xf32>
    %cst_68 = arith.constant 0.000000e+00 : f32
    %65 = vector.broadcast %cst_68 : f32 to vector<18x18x8xf32>
    %c0_69 = arith.constant 0 : index
    %c0_70 = arith.constant 0 : index
    %c0_71 = arith.constant 0 : index
    %66 = vector.load %arg8[%c0_69, %c0_70, %c0_71] : memref<18x18x8xf32, #tpu.memory_space<vmem>>, vector<18x18x8xf32>
    tpu.vector_store %arg8[%c0_69, %c0_70, %c0_71], %65 {strides = array<i32>} : memref<18x18x8xf32, #tpu.memory_space<vmem>>, vector<18x18x8xf32>,
    %67 = vector.shape_cast %64 : vector<256x8xf32> to vector<16x16x8xf32>
    %c1_72 = arith.constant 1 : index
    %c1_73 = arith.constant 1 : index
    %c0_74 = arith.constant 0 : index
    %68 = vector.load %arg8[%c1_72, %c1_73, %c0_74] : memref<18x18x8xf32, #tpu.memory_space<vmem>>, vector<16x16x8xf32>
    tpu.vector_store %arg8[%c1_72, %c1_73, %c0_74], %67 {strides = array<i32>} : memref<18x18x8xf32, #tpu.memory_space<vmem>>, vector<16x16x8xf32>,
    %cst_75 = arith.constant 0.000000e+00 : f32
    %69 = vector.broadcast %cst_75 : f32 to vector<256x8xf32>
    %c0_76 = arith.constant 0 : index
    %c0_77 = arith.constant 0 : index
    %c0_78 = arith.constant 0 : index
    %70 = vector.load %arg8[%c0_76, %c0_77, %c0_78] : memref<18x18x8xf32, #tpu.memory_space<vmem>>, vector<16x16x8xf32>
    %71 = vector.shape_cast %70 : vector<16x16x8xf32> to vector<256x8xf32>
    %c0_79 = arith.constant 0 : index
    %c0_80 = arith.constant 0 : index
    %c0_81 = arith.constant 0 : index
    %72 = vector.load %arg4[%c0_79, %c0_80, %c0_81] : memref<9x8x8xf32, #tpu.memory_space<vmem>>, vector<1x8x8xf32>
    %73 = vector.shape_cast %72 : vector<1x8x8xf32> to vector<8x8xf32>
    %cst_82 = arith.constant dense<0.000000e+00> : vector<256x8xf32>
    %74 = tpu.matmul %71, %73, %cst_82 {dimension_numbers = #tpu.dot_dimension_numbers<[1], [0], [0], [1], [0, 0, 1, 1], [], []>} : vector<256x8xf32>, vector<8x8xf32>, vector<256x8xf32> -> vector<256x8xf32>
    %75 = arith.addf %69, %74 : vector<256x8xf32>
    %c0_83 = arith.constant 0 : index
    %c1_84 = arith.constant 1 : index
    %c0_85 = arith.constant 0 : index
    %76 = vector.load %arg8[%c0_83, %c1_84, %c0_85] : memref<18x18x8xf32, #tpu.memory_space<vmem>>, vector<16x16x8xf32>
    %77 = vector.shape_cast %76 : vector<16x16x8xf32> to vector<256x8xf32>
    %c1_86 = arith.constant 1 : index
    %c0_87 = arith.constant 0 : index
    %c0_88 = arith.constant 0 : index
    %78 = vector.load %arg4[%c1_86, %c0_87, %c0_88] : memref<9x8x8xf32, #tpu.memory_space<vmem>>, vector<1x8x8xf32>
    %79 = vector.shape_cast %78 : vector<1x8x8xf32> to vector<8x8xf32>
    %cst_89 = arith.constant dense<0.000000e+00> : vector<256x8xf32>
    %80 = tpu.matmul %77, %79, %cst_89 {dimension_numbers = #tpu.dot_dimension_numbers<[1], [0], [0], [1], [0, 0, 1, 1], [], []>} : vector<256x8xf32>, vector<8x8xf32>, vector<256x8xf32> -> vector<256x8xf32>
    %81 = arith.addf %75, %80 : vector<256x8xf32>
    %c0_90 = arith.constant 0 : index
    %c2_91 = arith.constant 2 : index
    %c0_92 = arith.constant 0 : index
    %82 = vector.load %arg8[%c0_90, %c2_91, %c0_92] : memref<18x18x8xf32, #tpu.memory_space<vmem>>, vector<16x16x8xf32>
    %83 = vector.shape_cast %82 : vector<16x16x8xf32> to vector<256x8xf32>
    %c2_93 = arith.constant 2 : index
    %c0_94 = arith.constant 0 : index
    %c0_95 = arith.constant 0 : index
    %84 = vector.load %arg4[%c2_93, %c0_94, %c0_95] : memref<9x8x8xf32, #tpu.memory_space<vmem>>, vector<1x8x8xf32>
    %85 = vector.shape_cast %84 : vector<1x8x8xf32> to vector<8x8xf32>
    %cst_96 = arith.constant dense<0.000000e+00> : vector<256x8xf32>
    %86 = tpu.matmul %83, %85, %cst_96 {dimension_numbers = #tpu.dot_dimension_numbers<[1], [0], [0], [1], [0, 0, 1, 1], [], []>} : vector<256x8xf32>, vector<8x8xf32>, vector<256x8xf32> -> vector<256x8xf32>
    %87 = arith.addf %81, %86 : vector<256x8xf32>
    %c1_97 = arith.constant 1 : index
    %c0_98 = arith.constant 0 : index
    %c0_99 = arith.constant 0 : index
    %88 = vector.load %arg8[%c1_97, %c0_98, %c0_99] : memref<18x18x8xf32, #tpu.memory_space<vmem>>, vector<16x16x8xf32>
    %89 = vector.shape_cast %88 : vector<16x16x8xf32> to vector<256x8xf32>
    %c3_100 = arith.constant 3 : index
    %c0_101 = arith.constant 0 : index
    %c0_102 = arith.constant 0 : index
    %90 = vector.load %arg4[%c3_100, %c0_101, %c0_102] : memref<9x8x8xf32, #tpu.memory_space<vmem>>, vector<1x8x8xf32>
    %91 = vector.shape_cast %90 : vector<1x8x8xf32> to vector<8x8xf32>
    %cst_103 = arith.constant dense<0.000000e+00> : vector<256x8xf32>
    %92 = tpu.matmul %89, %91, %cst_103 {dimension_numbers = #tpu.dot_dimension_numbers<[1], [0], [0], [1], [0, 0, 1, 1], [], []>} : vector<256x8xf32>, vector<8x8xf32>, vector<256x8xf32> -> vector<256x8xf32>
    %93 = arith.addf %87, %92 : vector<256x8xf32>
    %c1_104 = arith.constant 1 : index
    %c1_105 = arith.constant 1 : index
    %c0_106 = arith.constant 0 : index
    %94 = vector.load %arg8[%c1_104, %c1_105, %c0_106] : memref<18x18x8xf32, #tpu.memory_space<vmem>>, vector<16x16x8xf32>
    %95 = vector.shape_cast %94 : vector<16x16x8xf32> to vector<256x8xf32>
    %c4_107 = arith.constant 4 : index
    %c0_108 = arith.constant 0 : index
    %c0_109 = arith.constant 0 : index
    %96 = vector.load %arg4[%c4_107, %c0_108, %c0_109] : memref<9x8x8xf32, #tpu.memory_space<vmem>>, vector<1x8x8xf32>
    %97 = vector.shape_cast %96 : vector<1x8x8xf32> to vector<8x8xf32>
    %cst_110 = arith.constant dense<0.000000e+00> : vector<256x8xf32>
    %98 = tpu.matmul %95, %97, %cst_110 {dimension_numbers = #tpu.dot_dimension_numbers<[1], [0], [0], [1], [0, 0, 1, 1], [], []>} : vector<256x8xf32>, vector<8x8xf32>, vector<256x8xf32> -> vector<256x8xf32>
    %99 = arith.addf %93, %98 : vector<256x8xf32>
    %c1_111 = arith.constant 1 : index
    %c2_112 = arith.constant 2 : index
    %c0_113 = arith.constant 0 : index
    %100 = vector.load %arg8[%c1_111, %c2_112, %c0_113] : memref<18x18x8xf32, #tpu.memory_space<vmem>>, vector<16x16x8xf32>
    %101 = vector.shape_cast %100 : vector<16x16x8xf32> to vector<256x8xf32>
    %c5_114 = arith.constant 5 : index
    %c0_115 = arith.constant 0 : index
    %c0_116 = arith.constant 0 : index
    %102 = vector.load %arg4[%c5_114, %c0_115, %c0_116] : memref<9x8x8xf32, #tpu.memory_space<vmem>>, vector<1x8x8xf32>
    %103 = vector.shape_cast %102 : vector<1x8x8xf32> to vector<8x8xf32>
    %cst_117 = arith.constant dense<0.000000e+00> : vector<256x8xf32>
    %104 = tpu.matmul %101, %103, %cst_117 {dimension_numbers = #tpu.dot_dimension_numbers<[1], [0], [0], [1], [0, 0, 1, 1], [], []>} : vector<256x8xf32>, vector<8x8xf32>, vector<256x8xf32> -> vector<256x8xf32>
    %105 = arith.addf %99, %104 : vector<256x8xf32>
    %c2_118 = arith.constant 2 : index
    %c0_119 = arith.constant 0 : index
    %c0_120 = arith.constant 0 : index
    %106 = vector.load %arg8[%c2_118, %c0_119, %c0_120] : memref<18x18x8xf32, #tpu.memory_space<vmem>>, vector<16x16x8xf32>
    %107 = vector.shape_cast %106 : vector<16x16x8xf32> to vector<256x8xf32>
    %c6_121 = arith.constant 6 : index
    %c0_122 = arith.constant 0 : index
    %c0_123 = arith.constant 0 : index
    %108 = vector.load %arg4[%c6_121, %c0_122, %c0_123] : memref<9x8x8xf32, #tpu.memory_space<vmem>>, vector<1x8x8xf32>
    %109 = vector.shape_cast %108 : vector<1x8x8xf32> to vector<8x8xf32>
    %cst_124 = arith.constant dense<0.000000e+00> : vector<256x8xf32>
    %110 = tpu.matmul %107, %109, %cst_124 {dimension_numbers = #tpu.dot_dimension_numbers<[1], [0], [0], [1], [0, 0, 1, 1], [], []>} : vector<256x8xf32>, vector<8x8xf32>, vector<256x8xf32> -> vector<256x8xf32>
    %111 = arith.addf %105, %110 : vector<256x8xf32>
    %c2_125 = arith.constant 2 : index
    %c1_126 = arith.constant 1 : index
    %c0_127 = arith.constant 0 : index
    %112 = vector.load %arg8[%c2_125, %c1_126, %c0_127] : memref<18x18x8xf32, #tpu.memory_space<vmem>>, vector<16x16x8xf32>
    %113 = vector.shape_cast %112 : vector<16x16x8xf32> to vector<256x8xf32>
    %c7_128 = arith.constant 7 : index
    %c0_129 = arith.constant 0 : index
    %c0_130 = arith.constant 0 : index
    %114 = vector.load %arg4[%c7_128, %c0_129, %c0_130] : memref<9x8x8xf32, #tpu.memory_space<vmem>>, vector<1x8x8xf32>
    %115 = vector.shape_cast %114 : vector<1x8x8xf32> to vector<8x8xf32>
    %cst_131 = arith.constant dense<0.000000e+00> : vector<256x8xf32>
    %116 = tpu.matmul %113, %115, %cst_131 {dimension_numbers = #tpu.dot_dimension_numbers<[1], [0], [0], [1], [0, 0, 1, 1], [], []>} : vector<256x8xf32>, vector<8x8xf32>, vector<256x8xf32> -> vector<256x8xf32>
    %117 = arith.addf %111, %116 : vector<256x8xf32>
    %c2_132 = arith.constant 2 : index
    %c2_133 = arith.constant 2 : index
    %c0_134 = arith.constant 0 : index
    %118 = vector.load %arg8[%c2_132, %c2_133, %c0_134] : memref<18x18x8xf32, #tpu.memory_space<vmem>>, vector<16x16x8xf32>
    %119 = vector.shape_cast %118 : vector<16x16x8xf32> to vector<256x8xf32>
    %c8_135 = arith.constant 8 : index
    %c0_136 = arith.constant 0 : index
    %c0_137 = arith.constant 0 : index
    %120 = vector.load %arg4[%c8_135, %c0_136, %c0_137] : memref<9x8x8xf32, #tpu.memory_space<vmem>>, vector<1x8x8xf32>
    %121 = vector.shape_cast %120 : vector<1x8x8xf32> to vector<8x8xf32>
    %cst_138 = arith.constant dense<0.000000e+00> : vector<256x8xf32>
    %122 = tpu.matmul %119, %121, %cst_138 {dimension_numbers = #tpu.dot_dimension_numbers<[1], [0], [0], [1], [0, 0, 1, 1], [], []>} : vector<256x8xf32>, vector<8x8xf32>, vector<256x8xf32> -> vector<256x8xf32>
    %123 = arith.addf %117, %122 : vector<256x8xf32>
    %c0_139 = arith.constant 0 : index
    %c0_140 = arith.constant 0 : index
    %124 = vector.load %arg5[%c0_139, %c0_140] : memref<1x8xf32, #tpu.memory_space<vmem>>, vector<1x8xf32>
    %125 = vector.broadcast %124 : vector<1x8xf32> to vector<256x8xf32>
    %126 = arith.addf %123, %125 : vector<256x8xf32>
    %cst_141 = arith.constant 0.000000e+00 : f32
    %127 = vector.broadcast %cst_141 : f32 to vector<256x8xf32>
    %128 = arith.maximumf %126, %127 : vector<256x8xf32>
    %129 = vector.shape_cast %128 : vector<256x8xf32> to vector<1x16x16x8xf32>
    %c0_142 = arith.constant 0 : index
    %c0_143 = arith.constant 0 : index
    %c0_144 = arith.constant 0 : index
    %c0_145 = arith.constant 0 : index
    %130 = vector.load %arg6[%c0_142, %c0_143, %c0_144, %c0_145] : memref<1x16x16x8xf32, #tpu.memory_space<vmem>>, vector<1x16x16x8xf32>
    tpu.vector_store %arg6[%c0_142, %c0_143, %c0_144, %c0_145], %129 {strides = array<i32>} : memref<1x16x16x8xf32, #tpu.memory_space<vmem>>, vector<1x16x16x8xf32>,
    return
  }
  func.func @transform_0(%arg0: i32) -> (i32, i32, i32, i32) {
    %c0_i32 = arith.constant 0 : i32
    %c0_i32_0 = arith.constant 0 : i32
    %c0_i32_1 = arith.constant 0 : i32
    %c0_i32_2 = arith.constant 0 : i32
    return %arg0, %c0_i32, %c0_i32_0, %c0_i32_1 : i32, i32, i32, i32
  }
  func.func @transform_1(%arg0: i32) -> (i32, i32, i32) {
    %c0_i32 = arith.constant 0 : i32
    %c0_i32_0 = arith.constant 0 : i32
    %c0_i32_1 = arith.constant 0 : i32
    %c0_i32_2 = arith.constant 0 : i32
    return %c0_i32, %c0_i32_0, %c0_i32_1 : i32, i32, i32
  }
  func.func @transform_2(%arg0: i32) -> (i32, i32) {
    %c0_i32 = arith.constant 0 : i32
    %c0_i32_0 = arith.constant 0 : i32
    %c0_i32_1 = arith.constant 0 : i32
    return %c0_i32, %c0_i32_0 : i32, i32
  }
  func.func @transform_3(%arg0: i32) -> (i32, i32, i32) {
    %c0_i32 = arith.constant 0 : i32
    %c0_i32_0 = arith.constant 0 : i32
    %c0_i32_1 = arith.constant 0 : i32
    %c0_i32_2 = arith.constant 0 : i32
    return %c0_i32, %c0_i32_0, %c0_i32_1 : i32, i32, i32
  }
  func.func @transform_4(%arg0: i32) -> (i32, i32) {
    %c0_i32 = arith.constant 0 : i32
    %c0_i32_0 = arith.constant 0 : i32
    %c0_i32_1 = arith.constant 0 : i32
    return %c0_i32, %c0_i32_0 : i32, i32
  }
  func.func @transform_5(%arg0: i32) -> (i32, i32, i32, i32) {
    %c0_i32 = arith.constant 0 : i32
    %c0_i32_0 = arith.constant 0 : i32
    %c0_i32_1 = arith.constant 0 : i32
    %c0_i32_2 = arith.constant 0 : i32
    return %arg0, %c0_i32, %c0_i32_0, %c0_i32_1 : i32, i32, i32, i32
  }
}

</mosaic_0001>

<bundles_post_ra>
// kernel: tpu_custom_call.1
= control target key start
LH: loop header
LB: loop body
LE: loop exit
PB: predicated region body
PF: predicated region fallthrough
CT: control target
= control target key end

     0   :  { %s10200_s18 = smov 0   ;;  %s12276_s0 = inlined_call_operand.vmem [shape: f32[2,16,16,4], index: 0, kind: input, shape index: {}]   ;;  %s12277_s1 = inlined_call_operand.vmem [shape: f32[9,4,8], index: 1, kind: input, shape index: {}]   ;;  %s12278_s2 = inlined_call_operand.vmem [shape: f32[1,8], index: 2, kind: input, shape index: {}]   ;;  %s12279_s3 = inlined_call_operand.vmem [shape: f32[9,8,8], index: 3, kind: input, shape index: {}]   ;;  %s12280_s4 = inlined_call_operand.vmem [shape: f32[1,8], index: 4, kind: input, shape index: {}]   ;;  %s12281_s5 = inlined_call_operand.vmem [shape: f32[2,16,16,8], index: 5, kind: output, shape index: {}]  }
   0x1 LB: > { %s7530_s19 = sadd.s32 4294967295, %s10167_s18   ;;  %p7534_p0 = scmp.ge.s32.totalorder %s10167_s18, 1  ;;  %s10167_s18 = sphi %s10200_s18, %s15_s18  }
   0x2   : > { %p187_p1 = scmp.lt.s32.totalorder %s10167_s18, 3 }
   0x4   : > { %p188_p2 = pnand %p7534_p0, %p187_p1 }
   0x6   : > { %191 = sbr.rel (%p188_p2) target bundleno = 1570 (0x622), region = 40 }
   0xd   : > { %v7539_v0 = vld [vmem:[%s12277_s1 + $0x4] sm:$0xf]  ;;  %vm509_vm0 = vcmask 1043456   ;;  %vm225_vm1 = vcmask 31744   ;;  %vm228_vm2 = vcmask 25600   ;;  %v12282_v1 = vmov 0.0  }
   0xe   : > { %8740 = vmatprep.subr.msk.mxu0 %vm509_vm0, %v7539_v0  ;;  %226 = vst.msk [vmem:[#allocation2] sm:$0xff] %vm225_vm1, %v12282_v1  ;;  %227 = vst.msk [vmem:[#allocation2 + $0x8] sm:$0xff] %vm225_vm1, %v12282_v1  ;;  %v378_v2 = vld [vmem:[%s12277_s1] sm:$0xf]  ;;  %p215_p3 = scmp.lt.s32.totalorder %s7530_s19, 1  ;;  %vm3864_vm3 = vcmask 64512  }
   0xf   : > { %230 = vst.msk [vmem:[#allocation2 + $0x18] sm:$0xff] %vm225_vm1, %v12282_v1  ;;  %231 = vst.msk [vmem:[#allocation2 + $0x20] sm:$0xff] %vm225_vm1, %v12282_v1  ;;  %8741 = vmatpush3.msk.msra.mxu0 %vm509_vm0, %v7539_v0  ;;  %v10345_v6 = vld [vmem:[%s12277_s1 + $0x8] sm:$0xf]  ;;  %vm3867_vm4 = vcmask 58368  }
  0x10   : > { %233 = vst.msk [vmem:[#allocation2 + $0x30] sm:$0xff] %vm225_vm1, %v12282_v1  ;;  %234 = vst.msk [vmem:[#allocation2 + $0x38] sm:$0xff] %vm225_vm1, %v12282_v1  ;;  %8790 = vmatprep.subr.msk.mxu0 %vm509_vm0, %v378_v2  ;;  %s12558_s19 = smov (!%p215_p3, %s7530_s19), 1 }
  0x11   : > { %236 = vst.msk [vmem:[#allocation2 + $0x48] sm:$0xff] %vm225_vm1, %v12282_v1  ;;  %237 = vst.msk [vmem:[#allocation2 + $0x50] sm:$0xff] %vm225_vm1, %v12282_v1  ;;  %s8144_s24 = sshll.u32 %s12558_s19, 8 }
  0x12   : > { %239 = vst.msk [vmem:[#allocation2 + $0x60] sm:$0xff] %vm225_vm1, %v12282_v1  ;;  %240 = vst.msk [vmem:[#allocation2 + $0x68] sm:$0xff] %vm225_vm1, %v12282_v1  ;;  %s10337_s27 = scalar_lea.vmem %s12276_s0, %s8144_s24  ;;  %s12176_s21 = scalar_lea.vmem %s12281_s5, %s8144_s24 }
  0x13   : > { %242 = vst.msk [vmem:[#allocation2 + $0x78] sm:$0xff] %vm225_vm1, %v12282_v1  ;;  %243 = vst.msk [vmem:[#allocation2 + $0x80] sm:$0xff] %vm225_vm1, %v12282_v1  ;;  %v281_v3 = vld [vmem:[%s10337_s27] sm:$0xff]  ;;  %v282_v4 = vld [vmem:[%s10337_s27 + $0x8] sm:$0xff] }
  0x14   : > { %245 = vst.msk [vmem:[#allocation2 + $0x90] sm:$0xff] %vm225_vm1, %v12282_v1  ;;  %246 = vst.msk [vmem:[#allocation2 + $0x98] sm:$0xff] %vm225_vm1, %v12282_v1  ;;  %v283_v5 = vld [vmem:[%s10337_s27 + $0x10] sm:$0xff]  ;;  %v284_v9 = vld [vmem:[%s10337_s27 + $0x18] sm:$0xff] }
  0x15   : > { %248 = vst.msk [vmem:[#allocation2 + $0xa8] sm:$0xff] %vm225_vm1, %v12282_v1  ;;  %249 = vst.msk [vmem:[#allocation2 + $0xb0] sm:$0xff] %vm225_vm1, %v12282_v1  ;;  %v379_v7 = vld [vmem:[#allocation2 + $0x1] sm:$0xff]  ;;  %v287_v12 = vld [vmem:[%s10337_s27 + $0x30] sm:$0xff] }
  0x16   : > { %251 = vst.msk [vmem:[#allocation2 + $0xc0] sm:$0xff] %vm225_vm1, %v12282_v1  ;;  %252 = vst.msk [vmem:[#allocation2 + $0xc8] sm:$0xff] %vm225_vm1, %v12282_v1  ;;  %8742 = vmatprep.mubr.msk.f32.mxu0 %vm225_vm1, %v379_v7  ;;  %v285_v10 = vld [vmem:[%s10337_s27 + $0x20] sm:$0xff]  ;;  %v286_v11 = vld [vmem:[%s10337_s27 + $0x28] sm:$0xff] }
  0x17   : > { %254 = vst.msk [vmem:[#allocation2 + $0xd8] sm:$0xff] %vm225_vm1, %v12282_v1  ;;  %255 = vst.msk [vmem:[#allocation2 + $0xe0] sm:$0xff] %vm225_vm1, %v12282_v1  ;;  %v288_v13 = vld [vmem:[%s10337_s27 + $0x38] sm:$0xff]  ;;  %v289_v14 = vld [vmem:[%s10337_s27 + $0x40] sm:$0xff] }
  0x18   : > { %257 = vst.msk [vmem:[#allocation2 + $0xf0] sm:$0xff] %vm225_vm1, %v12282_v1  ;;  %258 = vst.msk [vmem:[#allocation2 + $0xf8] sm:$0xff] %vm225_vm1, %v12282_v1  ;;  %v290_v15 = vld [vmem:[%s10337_s27 + $0x48] sm:$0xff]  ;;  %v291_v16 = vld [vmem:[%s10337_s27 + $0x50] sm:$0xff] }
  0x19   : > { %260 = vst.msk [vmem:[#allocation2 + $0x108] sm:$0xff] %vm225_vm1, %v12282_v1  ;;  %261 = vst.msk [vmem:[#allocation2 + $0x110] sm:$0xff] %vm225_vm1, %v12282_v1  ;;  %v292_v17 = vld [vmem:[%s10337_s27 + $0x58] sm:$0xff]  ;;  %v293_v18 = vld [vmem:[%s10337_s27 + $0x60] sm:$0xff] }
  0x1a   : > { %263 = vst.msk [vmem:[#allocation2 + $0x120] sm:$0xff] %vm225_vm1, %v12282_v1  ;;  %264 = vst.msk [vmem:[#allocation2 + $0x128] sm:$0xff] %vm225_vm1, %v12282_v1  ;;  %v294_v19 = vld [vmem:[%s10337_s27 + $0x68] sm:$0xff]  ;;  %v295_v20 = vld [vmem:[%s10337_s27 + $0x70] sm:$0xff] }
  0x1b   : > { %266 = vst.msk [vmem:[#allocation2 + $0x138] sm:$0xff] %vm225_vm1, %v12282_v1  ;;  %267 = vst.msk [vmem:[#allocation2 + $0x140] sm:$0xff] %vm225_vm1, %v12282_v1  ;;  %v296_v21 = vld [vmem:[%s10337_s27 + $0x78] sm:$0xff]  ;;  %v297_v22 = vld [vmem:[%s10337_s27 + $0x80] sm:$0xff] }
  0x1c   : > { %269 = vst.msk [vmem:[#allocation2 + $0x150] sm:$0xff] %vm225_vm1, %v12282_v1  ;;  %270 = vst.msk [vmem:[#allocation2 + $0x158] sm:$0xff] %vm225_vm1, %v12282_v1  ;;  %v298_v23 = vld [vmem:[%s10337_s27 + $0x88] sm:$0xff]  ;;  %v299_v24 = vld [vmem:[%s10337_s27 + $0x90] sm:$0xff] }
  0x1d   : > { %272 = vst.msk [vmem:[#allocation2 + $0x168] sm:$0xff] %vm225_vm1, %v12282_v1  ;;  %273 = vst.msk [vmem:[#allocation2 + $0x170] sm:$0xff] %vm225_vm1, %v12282_v1  ;;  %v300_v25 = vld [vmem:[%s10337_s27 + $0x98] sm:$0xff]  ;;  %v301_v26 = vld [vmem:[%s10337_s27 + $0xa0] sm:$0xff] }
  0x1e   : > { %275 = vst.msk [vmem:[#allocation2 + $0x180] sm:$0xff] %vm225_vm1, %v12282_v1  ;;  %276 = vst.msk [vmem:[#allocation2 + $0x188] sm:$0xff] %vm225_vm1, %v12282_v1  ;;  %v302_v27 = vld [vmem:[%s10337_s27 + $0xa8] sm:$0xff]  ;;  %v303_v31 = vld [vmem:[%s10337_s27 + $0xb0] sm:$0xff] }
  0x1f   : > { %278 = vst.msk [vmem:[#allocation2 + $0x198] sm:$0xff] %vm225_vm1, %v12282_v1  ;;  %279 = vst.msk [vmem:[#allocation2 + $0x1a0] sm:$0xff] %vm225_vm1, %v12282_v1  ;;  %v304_v32 = vld [vmem:[%s10337_s27 + $0xb8] sm:$0xff]  ;;  %v305_v37 = vld [vmem:[%s10337_s27 + $0xc0] sm:$0xff] }
  0x20   : > { %229 = vst.msk [vmem:[#allocation2 + $0x10] sm:$0x3] %vm228_vm2, %v12282_v1  ;;  %232 = vst.msk [vmem:[#allocation2 + $0x28] sm:$0x3] %vm228_vm2, %v12282_v1  ;;  %v306_v38 = vld [vmem:[%s10337_s27 + $0xc8] sm:$0xff]  ;;  %v307_v39 = vld [vmem:[%s10337_s27 + $0xd0] sm:$0xff] }
  0x21   : > { %235 = vst.msk [vmem:[#allocation2 + $0x40] sm:$0x3] %vm228_vm2, %v12282_v1  ;;  %238 = vst.msk [vmem:[#allocation2 + $0x58] sm:$0x3] %vm228_vm2, %v12282_v1  ;;  %v308_v40 = vld [vmem:[%s10337_s27 + $0xd8] sm:$0xff]  ;;  %v309_v41 = vld [vmem:[%s10337_s27 + $0xe0] sm:$0xff] }
  0x22   : > { %241 = vst.msk [vmem:[#allocation2 + $0x70] sm:$0x3] %vm228_vm2, %v12282_v1  ;;  %244 = vst.msk [vmem:[#allocation2 + $0x88] sm:$0x3] %vm228_vm2, %v12282_v1  ;;  %v310_v42 = vld [vmem:[%s10337_s27 + $0xe8] sm:$0xff] }
  0x23   : > { %247 = vst.msk [vmem:[#allocation2 + $0xa0] sm:$0x3] %vm228_vm2, %v12282_v1  ;;  %250 = vst.msk [vmem:[#allocation2 + $0xb8] sm:$0x3] %vm228_vm2, %v12282_v1  ;;  %v10535_v7 = vld [vmem:[%s12277_s1 + $0xc] sm:$0xf] }
  0x24   : > { %253 = vst.msk [vmem:[#allocation2 + $0xd0] sm:$0x3] %vm228_vm2, %v12282_v1  ;;  %256 = vst.msk [vmem:[#allocation2 + $0xe8] sm:$0x3] %vm228_vm2, %v12282_v1 }
  0x25   : > { %259 = vst.msk [vmem:[#allocation2 + $0x100] sm:$0x3] %vm228_vm2, %v12282_v1  ;;  %262 = vst.msk [vmem:[#allocation2 + $0x118] sm:$0x3] %vm228_vm2, %v12282_v1 }
  0x26   : > { %265 = vst.msk [vmem:[#allocation2 + $0x130] sm:$0x3] %vm228_vm2, %v12282_v1  ;;  %268 = vst.msk [vmem:[#allocation2 + $0x148] sm:$0x3] %vm228_vm2, %v12282_v1 }
  0x27   : > { %271 = vst.msk [vmem:[#allocation2 + $0x160] sm:$0x3] %vm228_vm2, %v12282_v1  ;;  %274 = vst.msk [vmem:[#allocation2 + $0x178] sm:$0x3] %vm228_vm2, %v12282_v1  ;;  %v380_v8 = vld [vmem:[#allocation2 + $0x9] sm:$0xff] }
  0x28   : > { %277 = vst.msk [vmem:[#allocation2 + $0x190] sm:$0x3] %vm228_vm2, %v12282_v1  ;;  %280 = vst.msk [vmem:[#allocation2 + $0x1a8] sm:$0x3] %vm228_vm2, %v12282_v1  ;;  %8743 = vmatmul.mubr.msk.f32.vlgmr.msra.gmra.mrb[0].mxu0 %vm225_vm1, %v380_v8 }
  0x29   : > { %314 = vst.msk [vmem:[#allocation2 + $0x19] sm:$0xff] %vm225_vm1, %v281_v3  ;;  %315 = vst.msk [vmem:[#allocation2 + $0x21] sm:$0xff] %vm225_vm1, %v282_v4  ;;  %8791 = vmatpush3.msk.msra.mxu0 %vm509_vm0, %v378_v2  ;;  %v346_v3 = vld [vmem:[#allocation2] sm:$0xff]  ;;  %v347_v4 = vld [vmem:[#allocation2 + $0x8] sm:$0xff] }
  0x2a   : > { %316 = vst.msk [vmem:[#allocation2 + $0x31] sm:$0xff] %vm225_vm1, %v283_v5  ;;  %317 = vst.msk [vmem:[#allocation2 + $0x39] sm:$0xff] %vm225_vm1, %v284_v9  ;;  %8840 = vmatprep.subr.msk.mxu0 %vm509_vm0, %v10345_v6 }
  0x2b   : > { %318 = vst.msk [vmem:[#allocation2 + $0x49] sm:$0xff] %vm225_vm1, %v285_v10  ;;  %319 = vst.msk [vmem:[#allocation2 + $0x51] sm:$0xff] %vm225_vm1, %v286_v11 }
  0x2c   : > { %320 = vst.msk [vmem:[#allocation2 + $0x61] sm:$0xff] %vm225_vm1, %v287_v12  ;;  %321 = vst.msk [vmem:[#allocation2 + $0x69] sm:$0xff] %vm225_vm1, %v288_v13 }
  0x2d   : > { %322 = vst.msk [vmem:[#allocation2 + $0x79] sm:$0xff] %vm225_vm1, %v289_v14  ;;  %323 = vst.msk [vmem:[#allocation2 + $0x81] sm:$0xff] %vm225_vm1, %v290_v15 }
  0x2e   : > { %324 = vst.msk [vmem:[#allocation2 + $0x91] sm:$0xff] %vm225_vm1, %v291_v16  ;;  %325 = vst.msk [vmem:[#allocation2 + $0x99] sm:$0xff] %vm225_vm1, %v292_v17 }
  0x2f   : > { %326 = vst.msk [vmem:[#allocation2 + $0xa9] sm:$0xff] %vm225_vm1, %v293_v18  ;;  %327 = vst.msk [vmem:[#allocation2 + $0xb1] sm:$0xff] %vm225_vm1, %v294_v19 }
  0x30   : > { %328 = vst.msk [vmem:[#allocation2 + $0xc1] sm:$0xff] %vm225_vm1, %v295_v20  ;;  %329 = vst.msk [vmem:[#allocation2 + $0xc9] sm:$0xff] %vm225_vm1, %v296_v21  ;;  %v10390_v28 = vld [vmem:[#allocation2 + $0x19] sm:$0xff]  ;;  %v10392_v29 = vld [vmem:[#allocation2 + $0x21] sm:$0xff] }
  0x31   : > { %330 = vst.msk [vmem:[#allocation2 + $0xd9] sm:$0xff] %vm225_vm1, %v297_v22  ;;  %331 = vst.msk [vmem:[#allocation2 + $0xe1] sm:$0xff] %vm225_vm1, %v298_v23  ;;  %v10394_v30 = vld [vmem:[#allocation2 + $0x31] sm:$0xff]  ;;  %8745 = vmatprep.mubr.msk.f32.mxu0 %vm225_vm1, %v10390_v28  ;;  %v10409_v33 = vld [vmem:[#allocation2 + $0x39] sm:$0xff] }
  0x32   : > { %332 = vst.msk [vmem:[#allocation2 + $0xf1] sm:$0xff] %vm225_vm1, %v299_v24  ;;  %333 = vst.msk [vmem:[#allocation2 + $0xf9] sm:$0xff] %vm225_vm1, %v300_v25  ;;  %8746 = vmatmul.mubr.msk.f32.gmra.mrb[2].mxu0 %vm225_vm1, %v10392_v29  ;;  %v10411_v34 = vld [vmem:[#allocation2 + $0x49] sm:$0xff]  ;;  %v10417_v35 = vld [vmem:[#allocation2 + $0x51] sm:$0xff] }
  0x33   : > { %334 = vst.msk [vmem:[#allocation2 + $0x109] sm:$0xff] %vm225_vm1, %v301_v26  ;;  %335 = vst.msk [vmem:[#allocation2 + $0x111] sm:$0xff] %vm225_vm1, %v302_v27  ;;  %8748 = vmatprep.mubr.msk.f32.mxu0 %vm225_vm1, %v10394_v30  ;;  %v10419_v36 = vld [vmem:[#allocation2 + $0x61] sm:$0xff]  ;;  %v10435_v43 = vld [vmem:[#allocation2 + $0x69] sm:$0xff] }
  0x34   : > { %336 = vst.msk [vmem:[#allocation2 + $0x121] sm:$0xff] %vm225_vm1, %v303_v31  ;;  %337 = vst.msk [vmem:[#allocation2 + $0x129] sm:$0xff] %vm225_vm1, %v304_v32  ;;  %v10439_v44 = vld [vmem:[#allocation2 + $0x79] sm:$0xff]  ;;  %v10445_v45 = vld [vmem:[#allocation2 + $0x81] sm:$0xff] }
  0x35   : > { %338 = vst.msk [vmem:[#allocation2 + $0x139] sm:$0xff] %vm225_vm1, %v305_v37  ;;  %339 = vst.msk [vmem:[#allocation2 + $0x141] sm:$0xff] %vm225_vm1, %v306_v38  ;;  %v10447_v46 = vld [vmem:[#allocation2 + $0x91] sm:$0xff]  ;;  %v10453_v47 = vld [vmem:[#allocation2 + $0x99] sm:$0xff] }
  0x36   : > { %8749 = vmatmul.mubr.msk.f32.gmra.mrb[4].mxu0 %vm225_vm1, %v10409_v33  ;;  %340 = vst.msk [vmem:[#allocation2 + $0x151] sm:$0xff] %vm225_vm1, %v307_v39  ;;  %341 = vst.msk [vmem:[#allocation2 + $0x159] sm:$0xff] %vm225_vm1, %v308_v40  ;;  %v10455_v48 = vld [vmem:[#allocation2 + $0xa9] sm:$0xff]  ;;  %v10461_v49 = vld [vmem:[#allocation2 + $0xb1] sm:$0xff] }
  0x37   : > { %8751 = vmatprep.mubr.msk.f32.mxu0 %vm225_vm1, %v10411_v34  ;;  %342 = vst.msk [vmem:[#allocation2 + $0x169] sm:$0xff] %vm225_vm1, %v309_v41  ;;  %343 = vst.msk [vmem:[#allocation2 + $0x171] sm:$0xff] %vm225_vm1, %v310_v42  ;;  %v10463_v50 = vld [vmem:[#allocation2 + $0xc1] sm:$0xff]  ;;  %v10469_v51 = vld [vmem:[#allocation2 + $0xc9] sm:$0xff] }
  0x38   : > { %v10471_v52 = vld [vmem:[#allocation2 + $0xd9] sm:$0xff]  ;;  %v10477_v53 = vld [vmem:[#allocation2 + $0xe1] sm:$0xff]  ;;  %v10544_v9 = vld [vmem:[#allocation2 + $0x30] sm:$0xff] }
  0x39   : > { %v10479_v54 = vld [vmem:[#allocation2 + $0xf1] sm:$0xff]  ;;  %v10485_v55 = vld [vmem:[#allocation2 + $0xf9] sm:$0xff]  ;;  %v10554_v11 = vld [vmem:[#allocation2 + $0x48] sm:$0xff] }
  0x3a   : > { %8752 = vmatmul.mubr.msk.f32.gmra.mrb[6].mxu0 %vm225_vm1, %v10417_v35  ;;  %v10487_v56 = vld [vmem:[#allocation2 + $0x109] sm:$0xff]  ;;  %v10493_v57 = vld [vmem:[#allocation2 + $0x111] sm:$0xff]  ;;  %v10542_v8 = vld [vmem:[#allocation2 + $0x20] sm:$0xff] }
  0x3b   : > { %8754 = vmatprep.mubr.msk.f32.mxu0 %vm225_vm1, %v10419_v36  ;;  %v10495_v58 = vld [vmem:[#allocation2 + $0x121] sm:$0xff]  ;;  %v10501_v59 = vld [vmem:[#allocation2 + $0x129] sm:$0xff]  ;;  %v10530_v5 = vld [vmem:[#allocation2 + $0x18] sm:$0xff] }
  0x3c   : > { %v10503_v60 = vld [vmem:[#allocation2 + $0x139] sm:$0xff]  ;;  %v10509_v61 = vld [vmem:[#allocation2 + $0x141] sm:$0xff]  ;;  %v10578_v16 = vld [vmem:[#allocation2 + $0x90] sm:$0xff] }
  0x3d   : > { %v10511_v62 = vld [vmem:[#allocation2 + $0x151] sm:$0xff]  ;;  %v10517_v63 = vld [vmem:[#allocation2 + $0x159] sm:$0xff]  ;;  %v10568_v13 = vld [vmem:[#allocation2 + $0x68] sm:$0xff] }
  0x3e   : > { %8755 = vmatmul.mubr.msk.f32.gmra.mrb[8].mxu0 %vm225_vm1, %v10435_v43  ;;  %12397 = vst [vmem:[#allocation4_spill] sm:$0xff] %v10511_v62  ;;  %12398 = vst [vmem:[#allocation5_spill] sm:$0xff] %v10517_v63  ;;  %v10519_v0 = vld [vmem:[#allocation2 + $0x169] sm:$0xff]  ;;  %v10525_v2 = vld [vmem:[#allocation2 + $0x171] sm:$0xff] }
  0x3f   : > { %8757 = vmatprep.mubr.msk.f32.mxu0 %vm225_vm1, %v10439_v44  ;;  %12399 = vst [vmem:[#allocation6_spill] sm:$0xff] %v10519_v0  ;;  %12400 = vst [vmem:[#allocation7_spill] sm:$0xff] %v10525_v2  ;;  %v10552_v10 = vld [vmem:[#allocation2 + $0x38] sm:$0xff]  ;;  %v10562_v12 = vld [vmem:[#allocation2 + $0x60] sm:$0xff] }
  0x40   : > { %v10570_v14 = vld [vmem:[#allocation2 + $0x78] sm:$0xff]  ;;  %v10576_v15 = vld [vmem:[#allocation2 + $0x80] sm:$0xff]  ;;  %v10586_v18 = vld [vmem:[#allocation2 + $0xa8] sm:$0xff] }
  0x41   : > { %v10584_v17 = vld [vmem:[#allocation2 + $0x98] sm:$0xff]  ;;  %v10592_v19 = vld [vmem:[#allocation2 + $0xb0] sm:$0xff]  ;;  %v10594_v20 = vld [vmem:[#allocation2 + $0xc0] sm:$0xff] }
  0x42   : > { %8758 = vmatmul.mubr.msk.f32.gmra.mrb[10].mxu0 %vm225_vm1, %v10445_v45  ;;  %v10600_v21 = vld [vmem:[#allocation2 + $0xc8] sm:$0xff]  ;;  %v10602_v22 = vld [vmem:[#allocation2 + $0xd8] sm:$0xff]  ;;  %v10608_v23 = vld [vmem:[#allocation2 + $0xe0] sm:$0xff] }
  0x43   : > { %8760 = vmatprep.mubr.msk.f32.mxu0 %vm225_vm1, %v10447_v46  ;;  %v10610_v24 = vld [vmem:[#allocation2 + $0xf0] sm:$0xff]  ;;  %v10616_v25 = vld [vmem:[#allocation2 + $0xf8] sm:$0xff]  ;;  %v10618_v26 = vld [vmem:[#allocation2 + $0x108] sm:$0xff] }
  0x44   : > { %v10624_v27 = vld [vmem:[#allocation2 + $0x110] sm:$0xff]  ;;  %v10626_v31 = vld [vmem:[#allocation2 + $0x120] sm:$0xff]  ;;  %v10632_v32 = vld [vmem:[#allocation2 + $0x128] sm:$0xff] }
  0x45   : > { %v10634_v37 = vld [vmem:[#allocation2 + $0x138] sm:$0xff]  ;;  %v10640_v38 = vld [vmem:[#allocation2 + $0x140] sm:$0xff]  ;;  %v10642_v39 = vld [vmem:[#allocation2 + $0x150] sm:$0xff] }
  0x46   : > { %8761 = vmatmul.mubr.msk.f32.gmra.mrb[12].mxu0 %vm225_vm1, %v10453_v47  ;;  %v311_v40 = vld [vmem:[%s10337_s27 + $0xf0] sm:$0xff]  ;;  %v312_v41 = vld [vmem:[%s10337_s27 + $0xf8] sm:$0xff] }
  0x47   : > { %8763 = vmatprep.mubr.msk.f32.mxu0 %vm225_vm1, %v10455_v48  ;;  %344 = vst.msk [vmem:[#allocation2 + $0x181] sm:$0xff] %vm225_vm1, %v311_v40  ;;  %345 = vst.msk [vmem:[#allocation2 + $0x189] sm:$0xff] %vm225_vm1, %v312_v41  ;;  %v10652_v42 = vld [vmem:[#allocation2 + $0x158] sm:$0xff]  ;;  %v1062_v40 = vld [vmem:[#allocation2 + $0x2] sm:$0xff] }
  0x48   : > { %v1063_v41 = vld [vmem:[#allocation2 + $0xa] sm:$0xff]  ;;  %v10665_v1 = vld [vmem:[#allocation2 + $0x1a] sm:$0xff] }
  0x49   : > { %12401 = vst [vmem:[#allocation8_spill] sm:$0xff] %v10665_v1 }
  0x4a   : > { %8764 = vmatmul.mubr.msk.f32.gmra.mrb[14].mxu0 %vm225_vm1, %v10461_v49 }
  0x4b   : > { %8766 = vmatprep.mubr.msk.f32.mxu0 %vm225_vm1, %v10463_v50 }
  0x4e   : > { %8767 = vmatmul.mubr.msk.f32.gmra.mrb[16].mxu0 %vm225_vm1, %v10469_v51 }
  0x4f   : > { %8769 = vmatprep.mubr.msk.f32.mxu0 %vm225_vm1, %v10471_v52 }
  0x52   : > { %8770 = vmatmul.mubr.msk.f32.gmra.mrb[18].mxu0 %vm225_vm1, %v10477_v53 }
  0x53   : > { %8772 = vmatprep.mubr.msk.f32.mxu0 %vm225_vm1, %v10479_v54 }
  0x56   : > { %8773 = vmatmul.mubr.msk.f32.gmra.mrb[20].mxu0 %vm225_vm1, %v10485_v55 }
  0x57   : > { %8775 = vmatprep.mubr.msk.f32.mxu0 %vm225_vm1, %v10487_v56 }
  0x5a   : > { %8776 = vmatmul.mubr.msk.f32.gmra.mrb[22].mxu0 %vm225_vm1, %v10493_v57 }
  0x5b   : > { %8778 = vmatprep.mubr.msk.f32.mxu0 %vm225_vm1, %v10495_v58 }
  0x5e   : > { %8779 = vmatmul.mubr.msk.f32.gmra.mrb[24].mxu0 %vm225_vm1, %v10501_v59 }
  0x5f   : > { %8781 = vmatprep.mubr.msk.f32.mxu0 %vm225_vm1, %v10503_v60 }
  0x62   : > { %8782 = vmatmul.mubr.msk.f32.gmra.mrb[26].mxu0 %vm225_vm1, %v10509_v61 }
  0x63   : > { %8784 = vmatprep.mubr.msk.f32.mxu0 %vm225_vm1, %v10511_v62 }
  0x66   : > { %8785 = vmatmul.mubr.msk.f32.gmra.mrb[28].mxu0 %vm225_vm1, %v10517_v63  ;;  %v10679_v63 = vld [vmem:[#allocation2 + $0x32] sm:$0xff] }
  0x67   : > { %8787 = vmatprep.mubr.msk.f32.mxu0 %vm225_vm1, %v10519_v0  ;;  %v10677_v0 = vld [vmem:[#allocation2 + $0x22] sm:$0xff]  ;;  %12403 = vst [vmem:[#allocation10_spill] sm:$0xff] %v10679_v63 }
  0x68   : > { %12402 = vst [vmem:[#allocation9_spill] sm:$0xff] %v10677_v0 }
  0x6a   : > { %8788 = vmatmul.mubr.msk.f32.gmra.mrb[30].mxu0 %vm225_vm1, %v10525_v2  ;;  %v10670_v2 = vld [vmem:[%s12277_s1 + $0x10] sm:$0xf] }
  0x6b   : > { %8792 = vmatprep.mubr.msk.f32.mxu0 %vm225_vm1, %v346_v3  ;;  %v10654_v3 = vld [vmem:[#allocation2 + $0x168] sm:$0xff] }
  0x6e   : > { %8793 = vmatmul.mubr.msk.f32.vlgmr.msra.gmra.mrb[0].mxu0 %vm225_vm1, %v347_v4  ;;  %v10660_v4 = vld [vmem:[#allocation2 + $0x170] sm:$0xff] }
  0x6f   : > { %8841 = vmatpush3.msk.msra.mxu0 %vm509_vm0, %v10345_v6  ;;  %8795 = vmatprep.mubr.msk.f32.mxu0 %vm225_vm1, %v10530_v5  ;;  %v10560_v6 = vld [vmem:[#allocation2 + $0x50] sm:$0xff] }
  0x70   : > { %8890 = vmatprep.subr.msk.mxu0 %vm509_vm0, %v10535_v7 }
  0x72   : > { %8796 = vmatmul.mubr.msk.f32.gmra.mrb[2].mxu0 %vm225_vm1, %v10542_v8 }
  0x73   : > { %8798 = vmatprep.mubr.msk.f32.mxu0 %vm225_vm1, %v10544_v9 }
  0x76   : > { %8799 = vmatmul.mubr.msk.f32.gmra.mrb[4].mxu0 %vm225_vm1, %v10552_v10 }
  0x77   : > { %8801 = vmatprep.mubr.msk.f32.mxu0 %vm225_vm1, %v10554_v11 }
  0x7a   : > { %8802 = vmatmul.mubr.msk.f32.gmra.mrb[6].mxu0 %vm225_vm1, %v10560_v6 }
  0x7b   : > { %8804 = vmatprep.mubr.msk.f32.mxu0 %vm225_vm1, %v10562_v12 }
  0x7e   : > { %8805 = vmatmul.mubr.msk.f32.gmra.mrb[8].mxu0 %vm225_vm1, %v10568_v13 }
  0x7f   : > { %8807 = vmatprep.mubr.msk.f32.mxu0 %vm225_vm1, %v10570_v14 }
  0x82   : > { %8808 = vmatmul.mubr.msk.f32.gmra.mrb[10].mxu0 %vm225_vm1, %v10576_v15 }
  0x83   : > { %8810 = vmatprep.mubr.msk.f32.mxu0 %vm225_vm1, %v10578_v16 }
  0x86   : > { %8811 = vmatmul.mubr.msk.f32.gmra.mrb[12].mxu0 %vm225_vm1, %v10584_v17 }
  0x87   : > { %8813 = vmatprep.mubr.msk.f32.mxu0 %vm225_vm1, %v10586_v18 }
  0x8a   : > { %8814 = vmatmul.mubr.msk.f32.gmra.mrb[14].mxu0 %vm225_vm1, %v10592_v19 }
  0x8b   : > { %8816 = vmatprep.mubr.msk.f32.mxu0 %vm225_vm1, %v10594_v20 }
  0x8e   : > { %8817 = vmatmul.mubr.msk.f32.gmra.mrb[16].mxu0 %vm225_vm1, %v10600_v21 }
  0x8f   : > { %8819 = vmatprep.mubr.msk.f32.mxu0 %vm225_vm1, %v10602_v22 }
  0x92   : > { %8820 = vmatmul.mubr.msk.f32.gmra.mrb[18].mxu0 %vm225_vm1, %v10608_v23 }
  0x93   : > { %8822 = vmatprep.mubr.msk.f32.mxu0 %vm225_vm1, %v10610_v24 }
  0x96   : > { %8823 = vmatmul.mubr.msk.f32.gmra.mrb[20].mxu0 %vm225_vm1, %v10616_v25 }
  0x97   : > { %8825 = vmatprep.mubr.msk.f32.mxu0 %vm225_vm1, %v10618_v26 }
  0x9a   : > { %8826 = vmatmul.mubr.msk.f32.gmra.mrb[22].mxu0 %vm225_vm1, %v10624_v27 }
  0x9b   : > { %8828 = vmatprep.mubr.msk.f32.mxu0 %vm225_vm1, %v10626_v31 }
  0x9e   : > { %8829 = vmatmul.mubr.msk.f32.gmra.mrb[24].mxu0 %vm225_vm1, %v10632_v32 }
  0x9f   : > { %8831 = vmatprep.mubr.msk.f32.mxu0 %vm225_vm1, %v10634_v37 }
  0xa2   : > { %8832 = vmatmul.mubr.msk.f32.gmra.mrb[26].mxu0 %vm225_vm1, %v10640_v38 }
  0xa3   : > { %8834 = vmatprep.mubr.msk.f32.mxu0 %vm225_vm1, %v10642_v39 }
  0xa6   : > { %8835 = vmatmul.mubr.msk.f32.gmra.mrb[28].mxu0 %vm225_vm1, %v10652_v42 }
  0xa7   : > { %8837 = vmatprep.mubr.msk.f32.mxu0 %vm225_vm1, %v10654_v3 }
  0xaa   : > { %8838 = vmatmul.mubr.msk.f32.gmra.mrb[30].mxu0 %vm225_vm1, %v10660_v4 }
  0xab   : > { %8842 = vmatprep.mubr.msk.f32.mxu0 %vm225_vm1, %v1062_v40  ;;  %v10687_v40 = vld [vmem:[#allocation2 + $0x3a] sm:$0xff] }
  0xac   : > { %12404 = vst [vmem:[#allocation11_spill] sm:$0xff] %v10687_v40 }
  0xae   : > { %8843 = vmatmul.mubr.msk.f32.vlgmr.msra.gmra.mrb[0].mxu0 %vm225_vm1, %v1063_v41  ;;  %v10689_v41 = vld [vmem:[#allocation2 + $0x4a] sm:$0xff] }
  0xaf   : > { %8891 = vmatpush3.msk.msra.mxu0 %vm509_vm0, %v10535_v7  ;;  %8845 = vmatprep.mubr.msk.f32.mxu0 %vm225_vm1, %v10665_v1  ;;  %12405 = vst [vmem:[#allocation12_spill] sm:$0xff] %v10689_v41  ;;  %v10695_v7 = vld [vmem:[#allocation2 + $0x52] sm:$0xff]  ;;  %v10697_v1 = vld [vmem:[#allocation2 + $0x62] sm:$0xff] }
  0xb0   : > { %8940 = vmatprep.subr.msk.mxu0 %vm509_vm0, %v10670_v2  ;;  %12406 = vst [vmem:[#allocation13_spill] sm:$0xff] %v10695_v7  ;;  %12407 = vst [vmem:[#allocation14_spill] sm:$0xff] %v10697_v1 }
  0xb2   : > { %8846 = vmatmul.mubr.msk.f32.gmra.mrb[2].mxu0 %vm225_vm1, %v10677_v0  ;;  %v10705_v0 = vld [vmem:[#allocation2 + $0x7a] sm:$0xff] }
  0xb3   : > { %8848 = vmatprep.mubr.msk.f32.mxu0 %vm225_vm1, %v10679_v63  ;;  %v10703_v63 = vld [vmem:[#allocation2 + $0x6a] sm:$0xff]  ;;  %12409 = vst [vmem:[#allocation16_spill] sm:$0xff] %v10705_v0 }
  0xb4   : > { %12408 = vst [vmem:[#allocation15_spill] sm:$0xff] %v10703_v63 }
  0xb6   : > { %8849 = vmatmul.mubr.msk.f32.gmra.mrb[4].mxu0 %vm225_vm1, %v10687_v40  ;;  %v10713_v40 = vld [vmem:[#allocation2 + $0x92] sm:$0xff] }
  0xb7   : > { %8851 = vmatprep.mubr.msk.f32.mxu0 %vm225_vm1, %v10689_v41  ;;  %v10711_v41 = vld [vmem:[#allocation2 + $0x82] sm:$0xff]  ;;  %12411 = vst [vmem:[#allocation18_spill] sm:$0xff] %v10713_v40 }
  0xb8   : > { %12410 = vst [vmem:[#allocation17_spill] sm:$0xff] %v10711_v41 }
  0xba   : > { %8852 = vmatmul.mubr.msk.f32.gmra.mrb[6].mxu0 %vm225_vm1, %v10695_v7  ;;  %v10721_v7 = vld [vmem:[#allocation2 + $0xaa] sm:$0xff] }
  0xbb   : > { %8854 = vmatprep.mubr.msk.f32.mxu0 %vm225_vm1, %v10697_v1  ;;  %v10719_v1 = vld [vmem:[#allocation2 + $0x9a] sm:$0xff]  ;;  %12413 = vst [vmem:[#allocation20_spill] sm:$0xff] %v10721_v7 }
  0xbc   : > { %12412 = vst [vmem:[#allocation19_spill] sm:$0xff] %v10719_v1 }
  0xbe   : > { %8855 = vmatmul.mubr.msk.f32.gmra.mrb[8].mxu0 %vm225_vm1, %v10703_v63  ;;  %v10729_v63 = vld [vmem:[#allocation2 + $0xc2] sm:$0xff] }
  0xbf   : > { %8857 = vmatprep.mubr.msk.f32.mxu0 %vm225_vm1, %v10705_v0  ;;  %v10727_v0 = vld [vmem:[#allocation2 + $0xb2] sm:$0xff]  ;;  %12415 = vst [vmem:[#allocation22_spill] sm:$0xff] %v10729_v63 }
  0xc0   : > { %12414 = vst [vmem:[#allocation21_spill] sm:$0xff] %v10727_v0 }
  0xc2   : > { %8858 = vmatmul.mubr.msk.f32.gmra.mrb[10].mxu0 %vm225_vm1, %v10711_v41  ;;  %v10737_v41 = vld [vmem:[#allocation2 + $0xda] sm:$0xff] }
  0xc3   : > { %8860 = vmatprep.mubr.msk.f32.mxu0 %vm225_vm1, %v10713_v40  ;;  %v10735_v40 = vld [vmem:[#allocation2 + $0xca] sm:$0xff]  ;;  %12417 = vst [vmem:[#allocation24_spill] sm:$0xff] %v10737_v41 }
  0xc4   : > { %12416 = vst [vmem:[#allocation23_spill] sm:$0xff] %v10735_v40 }
  0xc6   : > { %8861 = vmatmul.mubr.msk.f32.gmra.mrb[12].mxu0 %vm225_vm1, %v10719_v1  ;;  %v10745_v1 = vld [vmem:[#allocation2 + $0xf2] sm:$0xff] }
  0xc7   : > { %8863 = vmatprep.mubr.msk.f32.mxu0 %vm225_vm1, %v10721_v7  ;;  %v10743_v7 = vld [vmem:[#allocation2 + $0xe2] sm:$0xff]  ;;  %12419 = vst [vmem:[#allocation26_spill] sm:$0xff] %v10745_v1 }
  0xc8   : > { %12418 = vst [vmem:[#allocation25_spill] sm:$0xff] %v10743_v7 }
  0xca   : > { %8864 = vmatmul.mubr.msk.f32.gmra.mrb[14].mxu0 %vm225_vm1, %v10727_v0  ;;  %v10753_v0 = vld [vmem:[#allocation2 + $0x10a] sm:$0xff] }
  0xcb   : > { %8866 = vmatprep.mubr.msk.f32.mxu0 %vm225_vm1, %v10729_v63  ;;  %v10751_v63 = vld [vmem:[#allocation2 + $0xfa] sm:$0xff]  ;;  %12421 = vst [vmem:[#allocation28_spill] sm:$0xff] %v10753_v0 }
  0xcc   : > { %12420 = vst [vmem:[#allocation27_spill] sm:$0xff] %v10751_v63 }
  0xce   : > { %8867 = vmatmul.mubr.msk.f32.gmra.mrb[16].mxu0 %vm225_vm1, %v10735_v40  ;;  %v10761_v40 = vld [vmem:[#allocation2 + $0x122] sm:$0xff] }
  0xcf   : > { %8869 = vmatprep.mubr.msk.f32.mxu0 %vm225_vm1, %v10737_v41  ;;  %v10759_v41 = vld [vmem:[#allocation2 + $0x112] sm:$0xff]  ;;  %12423 = vst [vmem:[#allocation30_spill] sm:$0xff] %v10761_v40 }
  0xd0   : > { %12422 = vst [vmem:[#allocation29_spill] sm:$0xff] %v10759_v41 }
  0xd2   : > { %8870 = vmatmul.mubr.msk.f32.gmra.mrb[18].mxu0 %vm225_vm1, %v10743_v7  ;;  %v10769_v7 = vld [vmem:[#allocation2 + $0x13a] sm:$0xff] }
  0xd3   : > { %8872 = vmatprep.mubr.msk.f32.mxu0 %vm225_vm1, %v10745_v1  ;;  %v10767_v1 = vld [vmem:[#allocation2 + $0x12a] sm:$0xff]  ;;  %12424 = vst [vmem:[#allocation31_spill] sm:$0xff] %v10769_v7 }
  0xd6   : > { %8873 = vmatmul.mubr.msk.f32.gmra.mrb[20].mxu0 %vm225_vm1, %v10751_v63  ;;  %v10777_v63 = vld [vmem:[#allocation2 + $0x152] sm:$0xff] }
  0xd7   : > { %8875 = vmatprep.mubr.msk.f32.mxu0 %vm225_vm1, %v10753_v0  ;;  %v10775_v0 = vld [vmem:[#allocation2 + $0x142] sm:$0xff]  ;;  %12425 = vst [vmem:[#allocation32_spill] sm:$0xff] %v10777_v63 }
  0xda   : > { %8876 = vmatmul.mubr.msk.f32.gmra.mrb[22].mxu0 %vm225_vm1, %v10759_v41  ;;  %v10785_v41 = vld [vmem:[#allocation2 + $0x16a] sm:$0xff] }
  0xdb   : > { %8878 = vmatprep.mubr.msk.f32.mxu0 %vm225_vm1, %v10761_v40  ;;  %v10783_v40 = vld [vmem:[#allocation2 + $0x15a] sm:$0xff]  ;;  %12426 = vst [vmem:[#allocation33_spill] sm:$0xff] %v10785_v41 }
  0xde   : > { %8879 = vmatmul.mubr.msk.f32.gmra.mrb[24].mxu0 %vm225_vm1, %v10767_v1 }
  0xdf   : > { %8881 = vmatprep.mubr.msk.f32.mxu0 %vm225_vm1, %v10769_v7  ;;  %v10791_v7 = vld [vmem:[#allocation2 + $0x172] sm:$0xff] }
  0xe2   : > { %8882 = vmatmul.mubr.msk.f32.gmra.mrb[26].mxu0 %vm225_vm1, %v10775_v0 }
  0xe3   : > { %8884 = vmatprep.mubr.msk.f32.mxu0 %vm225_vm1, %v10777_v63  ;;  %v7708_v63 = vld [vmem:[%s12277_s1 + $0x14] sm:$0xf] }
  0xe6   : > { %8885 = vmatmul.mubr.msk.f32.gmra.mrb[28].mxu0 %vm225_vm1, %v10783_v40 }
  0xe7   : > { %8887 = vmatprep.mubr.msk.f32.mxu0 %vm225_vm1, %v10785_v41 }
  0xea   : > { %8888 = vmatmul.mubr.msk.f32.gmra.mrb[30].mxu0 %vm225_vm1, %v10791_v7 }
  0xeb   : > { %8892 = vmatprep.mubr.msk.f32.mxu0 %vm225_vm1, %v10530_v5  ;;  %v10865_v5 = vld [vmem:[#allocation2 + $0x188] sm:$0xff] }
  0xee   : > { %8893 = vmatmul.mubr.msk.f32.vlgmr.msra.gmra.mrb[0].mxu0 %vm225_vm1, %v10542_v8  ;;  %v7742_v8 = vld [vmem:[%s12277_s1 + $0x18] sm:$0xf] }
  0xef   : > { %8941 = vmatpush3.msk.msra.mxu0 %vm509_vm0, %v10670_v2  ;;  %8895 = vmatprep.mubr.msk.f32.mxu0 %vm225_vm1, %v10544_v9  ;;  %v10859_v2 = vld [vmem:[#allocation2 + $0x180] sm:$0xff] }
  0xf0   : > { %8990 = vmatprep.subr.msk.mxu0 %vm509_vm0, %v7708_v63 }
  0xf2   : > { %8896 = vmatmul.mubr.msk.f32.gmra.mrb[2].mxu0 %vm225_vm1, %v10552_v10 }
  0xf3   : > { %8898 = vmatprep.mubr.msk.f32.mxu0 %vm225_vm1, %v10554_v11 }
  0xf6   : > { %8899 = vmatmul.mubr.msk.f32.gmra.mrb[4].mxu0 %vm225_vm1, %v10560_v6 }
  0xf7   : > { %8901 = vmatprep.mubr.msk.f32.mxu0 %vm225_vm1, %v10562_v12 }
  0xfa   : > { %8902 = vmatmul.mubr.msk.f32.gmra.mrb[6].mxu0 %vm225_vm1, %v10568_v13 }
  0xfb   : > { %8904 = vmatprep.mubr.msk.f32.mxu0 %vm225_vm1, %v10570_v14 }
  0xfe   : > { %8905 = vmatmul.mubr.msk.f32.gmra.mrb[8].mxu0 %vm225_vm1, %v10576_v15 }
  0xff   : > { %8907 = vmatprep.mubr.msk.f32.mxu0 %vm225_vm1, %v10578_v16 }
 0x102   : > { %8908 = vmatmul.mubr.msk.f32.gmra.mrb[10].mxu0 %vm225_vm1, %v10584_v17 }
 0x103   : > { %8910 = vmatprep.mubr.msk.f32.mxu0 %vm225_vm1, %v10586_v18 }
 0x106   : > { %8911 = vmatmul.mubr.msk.f32.gmra.mrb[12].mxu0 %vm225_vm1, %v10592_v19 }
 0x107   : > { %8913 = vmatprep.mubr.msk.f32.mxu0 %vm225_vm1, %v10594_v20 }
 0x10a   : > { %8914 = vmatmul.mubr.msk.f32.gmra.mrb[14].mxu0 %vm225_vm1, %v10600_v21 }
 0x10b   : > { %8916 = vmatprep.mubr.msk.f32.mxu0 %vm225_vm1, %v10602_v22 }
 0x10e   : > { %8917 = vmatmul.mubr.msk.f32.gmra.mrb[16].mxu0 %vm225_vm1, %v10608_v23 }
 0x10f   : > { %8919 = vmatprep.mubr.msk.f32.mxu0 %vm225_vm1, %v10610_v24 }
 0x112   : > { %8920 = vmatmul.mubr.msk.f32.gmra.mrb[18].mxu0 %vm225_vm1, %v10616_v25 }
 0x113   : > { %8922 = vmatprep.mubr.msk.f32.mxu0 %vm225_vm1, %v10618_v26 }
 0x116   : > { %8923 = vmatmul.mubr.msk.f32.gmra.mrb[20].mxu0 %vm225_vm1, %v10624_v27 }
 0x117   : > { %8925 = vmatprep.mubr.msk.f32.mxu0 %vm225_vm1, %v10626_v31 }
 0x11a   : > { %8926 = vmatmul.mubr.msk.f32.gmra.mrb[22].mxu0 %vm225_vm1, %v10632_v32 }
 0x11b   : > { %8928 = vmatprep.mubr.msk.f32.mxu0 %vm225_vm1, %v10634_v37 }
 0x11e   : > { %8929 = vmatmul.mubr.msk.f32.gmra.mrb[24].mxu0 %vm225_vm1, %v10640_v38 }
 0x11f   : > { %8931 = vmatprep.mubr.msk.f32.mxu0 %vm225_vm1, %v10642_v39 }
 0x122   : > { %8932 = vmatmul.mubr.msk.f32.gmra.mrb[26].mxu0 %vm225_vm1, %v10652_v42 }
 0x123   : > { %8934 = vmatprep.mubr.msk.f32.mxu0 %vm225_vm1, %v10654_v3 }
 0x126   : > { %8935 = vmatmul.mubr.msk.f32.gmra.mrb[28].mxu0 %vm225_vm1, %v10660_v4 }
 0x127   : > { %8937 = vmatprep.mubr.msk.f32.mxu0 %vm225_vm1, %v10859_v2 }
 0x12a   : > { %8938 = vmatmul.mubr.msk.f32.gmra.mrb[30].mxu0 %vm225_vm1, %v10865_v5 }
 0x12b   : > { %8942 = vmatprep.mubr.msk.f32.mxu0 %vm225_vm1, %v10390_v28  ;;  %v12427_v28 = vld [vmem:[#allocation5_spill] sm:$0xff] }
 0x12e   : > { %8943 = vmatmul.mubr.msk.f32.vlgmr.msra.gmra.mrb[0].mxu0 %vm225_vm1, %v10392_v29  ;;  %v12428_v29 = vld [vmem:[#allocation6_spill] sm:$0xff] }
 0x12f   : > { %8991 = vmatpush3.msk.msra.mxu0 %vm509_vm0, %v7708_v63  ;;  %8945 = vmatprep.mubr.msk.f32.mxu0 %vm225_vm1, %v10394_v30  ;;  %v10932_v30 = vld [vmem:[#allocation2 + $0x181] sm:$0xff]  ;;  %v7776_v63 = vld [vmem:[%s12277_s1 + $0x1c] sm:$0xf] }
 0x130   : > { %9040 = vmatprep.subr.msk.mxu0 %vm509_vm0, %v7742_v8  ;;  %12429 = vst [vmem:[#allocation34_spill] sm:$0xff] %v10932_v30 }
 0x132   : > { %8946 = vmatmul.mubr.msk.f32.gmra.mrb[2].mxu0 %vm225_vm1, %v10409_v33  ;;  %v12430_v33 = vld [vmem:[#allocation7_spill] sm:$0xff] }
 0x133   : > { %8948 = vmatprep.mubr.msk.f32.mxu0 %vm225_vm1, %v10411_v34  ;;  %v10938_v34 = vld [vmem:[#allocation2 + $0x189] sm:$0xff] }
 0x134   : > { %12431 = vst [vmem:[#allocation35_spill] sm:$0xff] %v10938_v34 }
 0x136   : > { %8949 = vmatmul.mubr.msk.f32.gmra.mrb[4].mxu0 %vm225_vm1, %v10417_v35  ;;  %v12432_v35 = vld [vmem:[#allocation8_spill] sm:$0xff] }
 0x137   : > { %8951 = vmatprep.mubr.msk.f32.mxu0 %vm225_vm1, %v10419_v36 }
 0x13a   : > { %8952 = vmatmul.mubr.msk.f32.gmra.mrb[6].mxu0 %vm225_vm1, %v10435_v43 }
 0x13b   : > { %8954 = vmatprep.mubr.msk.f32.mxu0 %vm225_vm1, %v10439_v44 }
 0x13e   : > { %8955 = vmatmul.mubr.msk.f32.gmra.mrb[8].mxu0 %vm225_vm1, %v10445_v45 }
 0x13f   : > { %8957 = vmatprep.mubr.msk.f32.mxu0 %vm225_vm1, %v10447_v46 }
 0x142   : > { %8958 = vmatmul.mubr.msk.f32.gmra.mrb[10].mxu0 %vm225_vm1, %v10453_v47 }
 0x143   : > { %8960 = vmatprep.mubr.msk.f32.mxu0 %vm225_vm1, %v10455_v48 }
 0x146   : > { %8961 = vmatmul.mubr.msk.f32.gmra.mrb[12].mxu0 %vm225_vm1, %v10461_v49 }
 0x147   : > { %8963 = vmatprep.mubr.msk.f32.mxu0 %vm225_vm1, %v10463_v50 }
 0x14a   : > { %8964 = vmatmul.mubr.msk.f32.gmra.mrb[14].mxu0 %vm225_vm1, %v10469_v51 }
 0x14b   : > { %8966 = vmatprep.mubr.msk.f32.mxu0 %vm225_vm1, %v10471_v52 }
 0x14e   : > { %8967 = vmatmul.mubr.msk.f32.gmra.mrb[16].mxu0 %vm225_vm1, %v10477_v53 }
 0x14f   : > { %8969 = vmatprep.mubr.msk.f32.mxu0 %vm225_vm1, %v10479_v54 }
 0x152   : > { %8970 = vmatmul.mubr.msk.f32.gmra.mrb[18].mxu0 %vm225_vm1, %v10485_v55 }
 0x153   : > { %8972 = vmatprep.mubr.msk.f32.mxu0 %vm225_vm1, %v10487_v56 }
 0x156   : > { %8973 = vmatmul.mubr.msk.f32.gmra.mrb[20].mxu0 %vm225_vm1, %v10493_v57 }
 0x157   : > { %8975 = vmatprep.mubr.msk.f32.mxu0 %vm225_vm1, %v10495_v58 }
 0x15a   : > { %8976 = vmatmul.mubr.msk.f32.gmra.mrb[22].mxu0 %vm225_vm1, %v10501_v59 }
 0x15b   : > { %8978 = vmatprep.mubr.msk.f32.mxu0 %vm225_vm1, %v10503_v60 }
 0x15e   : > { %8979 = vmatmul.mubr.msk.f32.gmra.mrb[24].mxu0 %vm225_vm1, %v10509_v61 }
 0x15f   : > { %8981 = vmatprep.mubr.msk.f32.mxu0 %vm225_vm1, %v10511_v62  ;;  %v12442_v62 = vld [vmem:[#allocation18_spill] sm:$0xff] }
 0x162   : > { %8982 = vmatmul.mubr.msk.f32.gmra.mrb[26].mxu0 %vm225_vm1, %v12427_v28  ;;  %v12438_v28 = vld [vmem:[#allocation14_spill] sm:$0xff] }
 0x163   : > { %8984 = vmatprep.mubr.msk.f32.mxu0 %vm225_vm1, %v12428_v29  ;;  %v12433_v29 = vld [vmem:[#allocation9_spill] sm:$0xff] }
 0x166   : > { %8985 = vmatmul.mubr.msk.f32.gmra.mrb[28].mxu0 %vm225_vm1, %v12430_v33  ;;  %v12434_v33 = vld [vmem:[#allocation10_spill] sm:$0xff] }
 0x167   : > { %8987 = vmatprep.mubr.msk.f32.mxu0 %vm225_vm1, %v10932_v30  ;;  %v12435_v30 = vld [vmem:[#allocation11_spill] sm:$0xff] }
 0x16a   : > { %8988 = vmatmul.mubr.msk.f32.gmra.mrb[30].mxu0 %vm225_vm1, %v10938_v34  ;;  %v12436_v34 = vld [vmem:[#allocation12_spill] sm:$0xff] }
 0x16b   : > { %8992 = vmatprep.mubr.msk.f32.mxu0 %vm225_vm1, %v12432_v35  ;;  %v12437_v35 = vld [vmem:[#allocation13_spill] sm:$0xff] }
 0x16e   : > { %8993 = vmatmul.mubr.msk.f32.vlgmr.msra.gmra.mrb[0].mxu0 %vm225_vm1, %v12433_v29  ;;  %v12439_v29 = vld [vmem:[#allocation15_spill] sm:$0xff] }
 0x16f   : > { %9041 = vmatpush3.msk.msra.mxu0 %vm509_vm0, %v7742_v8  ;;  %8995 = vmatprep.mubr.msk.f32.mxu0 %vm225_vm1, %v12434_v33  ;;  %v12440_v8 = vld [vmem:[#allocation16_spill] sm:$0xff]  ;;  %v12441_v33 = vld [vmem:[#allocation17_spill] sm:$0xff] }
 0x170   : > { %9090 = vmatprep.subr.msk.mxu0 %vm509_vm0, %v7776_v63 }
 0x172   : > { %8996 = vmatmul.mubr.msk.f32.gmra.mrb[2].mxu0 %vm225_vm1, %v12435_v30  ;;  %v12443_v30 = vld [vmem:[#allocation19_spill] sm:$0xff] }
 0x173   : > { %8998 = vmatprep.mubr.msk.f32.mxu0 %vm225_vm1, %v12436_v34  ;;  %v12444_v34 = vld [vmem:[#allocation20_spill] sm:$0xff] }
 0x176   : > { %8999 = vmatmul.mubr.msk.f32.gmra.mrb[4].mxu0 %vm225_vm1, %v12437_v35  ;;  %v12445_v35 = vld [vmem:[#allocation21_spill] sm:$0xff] }
 0x177   : > { %9001 = vmatprep.mubr.msk.f32.mxu0 %vm225_vm1, %v12438_v28  ;;  %v12446_v28 = vld [vmem:[#allocation22_spill] sm:$0xff] }
 0x17a   : > { %9002 = vmatmul.mubr.msk.f32.gmra.mrb[6].mxu0 %vm225_vm1, %v12439_v29  ;;  %v12447_v29 = vld [vmem:[#allocation23_spill] sm:$0xff] }
 0x17b   : > { %9004 = vmatprep.mubr.msk.f32.mxu0 %vm225_vm1, %v12440_v8  ;;  %v12448_v8 = vld [vmem:[#allocation24_spill] sm:$0xff] }
 0x17e   : > { %9005 = vmatmul.mubr.msk.f32.gmra.mrb[8].mxu0 %vm225_vm1, %v12441_v33  ;;  %v12449_v33 = vld [vmem:[#allocation25_spill] sm:$0xff] }
 0x17f   : > { %9007 = vmatprep.mubr.msk.f32.mxu0 %vm225_vm1, %v12442_v62  ;;  %v12450_v62 = vld [vmem:[#allocation26_spill] sm:$0xff] }
 0x182   : > { %9008 = vmatmul.mubr.msk.f32.gmra.mrb[10].mxu0 %vm225_vm1, %v12443_v30  ;;  %v12451_v30 = vld [vmem:[#allocation27_spill] sm:$0xff] }
 0x183   : > { %9010 = vmatprep.mubr.msk.f32.mxu0 %vm225_vm1, %v12444_v34  ;;  %v12452_v34 = vld [vmem:[#allocation28_spill] sm:$0xff] }
 0x186   : > { %9011 = vmatmul.mubr.msk.f32.gmra.mrb[12].mxu0 %vm225_vm1, %v12445_v35  ;;  %v12453_v35 = vld [vmem:[#allocation29_spill] sm:$0xff] }
 0x187   : > { %9013 = vmatprep.mubr.msk.f32.mxu0 %vm225_vm1, %v12446_v28  ;;  %v12454_v28 = vld [vmem:[#allocation30_spill] sm:$0xff] }
 0x18a   : > { %9014 = vmatmul.mubr.msk.f32.gmra.mrb[14].mxu0 %vm225_vm1, %v12447_v29 }
 0x18b   : > { %9016 = vmatprep.mubr.msk.f32.mxu0 %vm225_vm1, %v12448_v8  ;;  %v12455_v8 = vld [vmem:[#allocation31_spill] sm:$0xff] }
 0x18e   : > { %9017 = vmatmul.mubr.msk.f32.gmra.mrb[16].mxu0 %vm225_vm1, %v12449_v33 }
 0x18f   : > { %9019 = vmatprep.mubr.msk.f32.mxu0 %vm225_vm1, %v12450_v62  ;;  %v12456_v62 = vld [vmem:[#allocation32_spill] sm:$0xff] }
 0x192   : > { %9020 = vmatmul.mubr.msk.f32.gmra.mrb[18].mxu0 %vm225_vm1, %v12451_v30 }
 0x193   : > { %9022 = vmatprep.mubr.msk.f32.mxu0 %vm225_vm1, %v12452_v34 }
 0x196   : > { %9023 = vmatmul.mubr.msk.f32.gmra.mrb[20].mxu0 %vm225_vm1, %v12453_v35  ;;  %v11005_v35 = vld [vmem:[#allocation2 + $0x182] sm:$0xff] }
 0x197   : > { %9025 = vmatprep.mubr.msk.f32.mxu0 %vm225_vm1, %v12454_v28 }
 0x19a   : > { %9026 = vmatmul.mubr.msk.f32.gmra.mrb[22].mxu0 %vm225_vm1, %v10767_v1 }
 0x19b   : > { %9028 = vmatprep.mubr.msk.f32.mxu0 %vm225_vm1, %v12455_v8  ;;  %v11011_v8 = vld [vmem:[#allocation2 + $0x18a] sm:$0xff] }
 0x19e   : > { %9029 = vmatmul.mubr.msk.f32.gmra.mrb[24].mxu0 %vm225_vm1, %v10775_v0 }
 0x19f   : > { %9031 = vmatprep.mubr.msk.f32.mxu0 %vm225_vm1, %v12456_v62 }
 0x1a2   : > { %9032 = vmatmul.mubr.msk.f32.gmra.mrb[26].mxu0 %vm225_vm1, %v10783_v40 }
 0x1a3   : > { %9034 = vmatprep.mubr.msk.f32.mxu0 %vm225_vm1, %v10785_v41  ;;  %v7810_v41 = vld [vmem:[%s12277_s1 + $0x20] sm:$0xf] }
 0x1a6   : > { %9035 = vmatmul.mubr.msk.f32.gmra.mrb[28].mxu0 %vm225_vm1, %v10791_v7 }
 0x1a7   : > { %9037 = vmatprep.mubr.msk.f32.mxu0 %vm225_vm1, %v11005_v35 }
 0x1aa   : > { %9038 = vmatmul.mubr.msk.f32.gmra.mrb[30].mxu0 %vm225_vm1, %v11011_v8 }
 0x1ab   : > { %9042 = vmatprep.mubr.msk.f32.mxu0 %vm225_vm1, %v10544_v9  ;;  %v2653_v9 = vld [vmem:[#allocation2 + $0x198] sm:$0xff] }
 0x1ae   : > { %9043 = vmatmul.mubr.msk.f32.vlgmr.msra.gmra.mrb[0].mxu0 %vm225_vm1, %v10552_v10  ;;  %v2654_v10 = vld [vmem:[#allocation2 + $0x1a0] sm:$0xff] }
 0x1af   : > { %9091 = vmatpush3.msk.msra.mxu0 %vm509_vm0, %v7776_v63  ;;  %9045 = vmatprep.mubr.msk.f32.mxu0 %vm225_vm1, %v10554_v11  ;;  %v3013_v11 = vld [vmem:[#allocation2 + $0x31] sm:$0xff] }
 0x1b0   : > { %9140 = vmatprep.subr.msk.mxu0 %vm509_vm0, %v7810_v41 }
 0x1b2   : > { %9046 = vmatmul.mubr.msk.f32.gmra.mrb[2].mxu0 %vm225_vm1, %v10560_v6  ;;  %v3014_v6 = vld [vmem:[#allocation2 + $0x39] sm:$0xff] }
 0x1b3   : > { %9048 = vmatprep.mubr.msk.f32.mxu0 %vm225_vm1, %v10562_v12  ;;  %v3015_v12 = vld [vmem:[#allocation2 + $0x49] sm:$0xff] }
 0x1b6   : > { %9049 = vmatmul.mubr.msk.f32.gmra.mrb[4].mxu0 %vm225_vm1, %v10568_v13  ;;  %v3016_v13 = vld [vmem:[#allocation2 + $0x51] sm:$0xff] }
 0x1b7   : > { %9051 = vmatprep.mubr.msk.f32.mxu0 %vm225_vm1, %v10570_v14  ;;  %v12475_v14 = vld [vmem:[#allocation22_spill] sm:$0xff] }
 0x1ba   : > { %9052 = vmatmul.mubr.msk.f32.gmra.mrb[6].mxu0 %vm225_vm1, %v10576_v15  ;;  %v12476_v15 = vld [vmem:[#allocation24_spill] sm:$0xff] }
 0x1bb   : > { %9054 = vmatprep.mubr.msk.f32.mxu0 %vm225_vm1, %v10578_v16  ;;  %v12477_v16 = vld [vmem:[#allocation26_spill] sm:$0xff] }
 0x1be   : > { %9055 = vmatmul.mubr.msk.f32.gmra.mrb[8].mxu0 %vm225_vm1, %v10584_v17  ;;  %v12478_v17 = vld [vmem:[#allocation29_spill] sm:$0xff] }
 0x1bf   : > { %9057 = vmatprep.mubr.msk.f32.mxu0 %vm225_vm1, %v10586_v18  ;;  %v12479_v18 = vld [vmem:[#allocation31_spill] sm:$0xff] }
 0x1c2   : > { %9058 = vmatmul.mubr.msk.f32.gmra.mrb[10].mxu0 %vm225_vm1, %v10592_v19  ;;  %v12480_v19 = vld [vmem:[#allocation33_spill] sm:$0xff] }
 0x1c3   : > { %9060 = vmatprep.mubr.msk.f32.mxu0 %vm225_vm1, %v10594_v20  ;;  %v7845_v20 = vld [vmem:[%s12279_s3 + $0x8] sm:$0xff] }
 0x1c4   : > { %9190 = vmatprep.subr.mxu1 %v7845_v20 }
 0x1c5   : > { %9191 = vmatpush3.msra.mxu1 %v7845_v20 }
 0x1c6   : > { %9061 = vmatmul.mubr.msk.f32.gmra.mrb[12].mxu0 %vm225_vm1, %v10600_v21 }
 0x1c7   : > { %9063 = vmatprep.mubr.msk.f32.mxu0 %vm225_vm1, %v10602_v22 }
 0x1ca   : > { %9064 = vmatmul.mubr.msk.f32.gmra.mrb[14].mxu0 %vm225_vm1, %v10608_v23  ;;  %v3985_v23 = vld [vmem:[%s12279_s3] sm:$0xff] }
 0x1cb   : > { %9066 = vmatprep.mubr.msk.f32.mxu0 %vm225_vm1, %v10610_v24  ;;  %9240 = vmatprep.subr.mxu1 %v3985_v23  ;;  %v11322_v24 = vld [vmem:[%s12279_s3 + $0x10] sm:$0xff] }
 0x1ce   : > { %9067 = vmatmul.mubr.msk.f32.gmra.mrb[16].mxu0 %vm225_vm1, %v10616_v25  ;;  %v11328_v25 = vld [vmem:[%s12278_s2] ss:$0 sm:$0xff] }
 0x1cf   : > { %9069 = vmatprep.mubr.msk.f32.mxu0 %vm225_vm1, %v10618_v26 }
 0x1d2   : > { %9070 = vmatmul.mubr.msk.f32.gmra.mrb[18].mxu0 %vm225_vm1, %v10624_v27 }
 0x1d3   : > { %9072 = vmatprep.mubr.msk.f32.mxu0 %vm225_vm1, %v10626_v31 }
 0x1d6   : > { %9073 = vmatmul.mubr.msk.f32.gmra.mrb[20].mxu0 %vm225_vm1, %v10632_v32 }
 0x1d7   : > { %9075 = vmatprep.mubr.msk.f32.mxu0 %vm225_vm1, %v10634_v37 }
 0x1da   : > { %9076 = vmatmul.mubr.msk.f32.gmra.mrb[22].mxu0 %vm225_vm1, %v10640_v38 }
 0x1db   : > { %9078 = vmatprep.mubr.msk.f32.mxu0 %vm225_vm1, %v10642_v39 }
 0x1de   : > { %9079 = vmatmul.mubr.msk.f32.gmra.mrb[24].mxu0 %vm225_vm1, %v10652_v42 }
 0x1df   : > { %9081 = vmatprep.mubr.msk.f32.mxu0 %vm225_vm1, %v10654_v3 }
 0x1e2   : > { %9082 = vmatmul.mubr.msk.f32.gmra.mrb[26].mxu0 %vm225_vm1, %v10660_v4 }
 0x1e3   : > { %9084 = vmatprep.mubr.msk.f32.mxu0 %vm225_vm1, %v10859_v2 }
 0x1e6   : > { %9085 = vmatmul.mubr.msk.f32.gmra.mrb[28].mxu0 %vm225_vm1, %v10865_v5 }
 0x1e7   : > { %9087 = vmatprep.mubr.msk.f32.mxu0 %vm225_vm1, %v2653_v9 }
 0x1ea   : > { %9088 = vmatmul.mubr.msk.f32.gmra.mrb[30].mxu0 %vm225_vm1, %v2654_v10 }
 0x1eb   : > { %9092 = vmatprep.mubr.msk.f32.mxu0 %vm225_vm1, %v3013_v11 }
 0x1ee   : > { %9093 = vmatmul.mubr.msk.f32.vlgmr.msra.gmra.mrb[0].mxu0 %vm225_vm1, %v3014_v6 }
 0x1ef   : > { %9141 = vmatpush3.msk.msra.mxu0 %vm509_vm0, %v7810_v41  ;;  %9095 = vmatprep.mubr.msk.f32.mxu0 %vm225_vm1, %v3015_v12 }
 0x1f2   : > { %9096 = vmatmul.mubr.msk.f32.gmra.mrb[2].mxu0 %vm225_vm1, %v3016_v13 }
 0x1f3   : > { %9098 = vmatprep.mubr.msk.f32.mxu0 %vm225_vm1, %v10419_v36  ;;  %v12457_v36 = vld [vmem:[#allocation4_spill] sm:$0xff] }
 0x1f6   : > { %9099 = vmatmul.mubr.msk.f32.gmra.mrb[4].mxu0 %vm225_vm1, %v10435_v43  ;;  %v12458_v43 = vld [vmem:[#allocation5_spill] sm:$0xff] }
 0x1f7   : > { %9101 = vmatprep.mubr.msk.f32.mxu0 %vm225_vm1, %v10439_v44  ;;  %v12459_v44 = vld [vmem:[#allocation6_spill] sm:$0xff] }
 0x1fa   : > { %9102 = vmatmul.mubr.msk.f32.gmra.mrb[6].mxu0 %vm225_vm1, %v10445_v45  ;;  %v12460_v45 = vld [vmem:[#allocation7_spill] sm:$0xff] }
 0x1fb   : > { %9104 = vmatprep.mubr.msk.f32.mxu0 %vm225_vm1, %v10447_v46  ;;  %v12461_v46 = vld [vmem:[#allocation34_spill] sm:$0xff] }
 0x1fe   : > { %9105 = vmatmul.mubr.msk.f32.gmra.mrb[8].mxu0 %vm225_vm1, %v10453_v47  ;;  %v3043_v47 = vld [vmem:[#allocation2 + $0x199] sm:$0xff] }
 0x1ff   : > { %9107 = vmatprep.mubr.msk.f32.mxu0 %vm225_vm1, %v10455_v48  ;;  %v12462_v48 = vld [vmem:[#allocation35_spill] sm:$0xff] }
 0x202   : > { %9108 = vmatmul.mubr.msk.f32.gmra.mrb[10].mxu0 %vm225_vm1, %v10461_v49  ;;  %v3044_v49 = vld [vmem:[#allocation2 + $0x1a1] sm:$0xff] }
 0x203   : > { %9110 = vmatprep.mubr.msk.f32.mxu0 %vm225_vm1, %v10463_v50  ;;  %v12463_v50 = vld [vmem:[#allocation10_spill] sm:$0xff] }
 0x206   : > { %9111 = vmatmul.mubr.msk.f32.gmra.mrb[12].mxu0 %vm225_vm1, %v10469_v51  ;;  %v12464_v51 = vld [vmem:[#allocation11_spill] sm:$0xff] }
 0x207   : > { %9113 = vmatprep.mubr.msk.f32.mxu0 %vm225_vm1, %v10471_v52  ;;  %v12465_v52 = vld [vmem:[#allocation12_spill] sm:$0xff] }
 0x20a   : > { %9114 = vmatmul.mubr.msk.f32.gmra.mrb[14].mxu0 %vm225_vm1, %v10477_v53  ;;  %v12466_v53 = vld [vmem:[#allocation13_spill] sm:$0xff] }
 0x20b   : > { %9116 = vmatprep.mubr.msk.f32.mxu0 %vm225_vm1, %v10479_v54  ;;  %v12467_v54 = vld [vmem:[#allocation14_spill] sm:$0xff] }
 0x20e   : > { %9117 = vmatmul.mubr.msk.f32.gmra.mrb[16].mxu0 %vm225_vm1, %v10485_v55  ;;  %v12468_v55 = vld [vmem:[#allocation15_spill] sm:$0xff] }
 0x20f   : > { %9119 = vmatprep.mubr.msk.f32.mxu0 %vm225_vm1, %v10487_v56  ;;  %v12469_v56 = vld [vmem:[#allocation16_spill] sm:$0xff] }
 0x212   : > { %9120 = vmatmul.mubr.msk.f32.gmra.mrb[18].mxu0 %vm225_vm1, %v10493_v57  ;;  %v12470_v57 = vld [vmem:[#allocation17_spill] sm:$0xff] }
 0x213   : > { %9122 = vmatprep.mubr.msk.f32.mxu0 %vm225_vm1, %v10495_v58  ;;  %v12471_v58 = vld [vmem:[#allocation18_spill] sm:$0xff] }
 0x216   : > { %9123 = vmatmul.mubr.msk.f32.gmra.mrb[20].mxu0 %vm225_vm1, %v10501_v59  ;;  %v12472_v59 = vld [vmem:[#allocation19_spill] sm:$0xff] }
 0x217   : > { %9125 = vmatprep.mubr.msk.f32.mxu0 %vm225_vm1, %v10503_v60  ;;  %v12473_v60 = vld [vmem:[#allocation20_spill] sm:$0xff] }
 0x21a   : > { %9126 = vmatmul.mubr.msk.f32.gmra.mrb[22].mxu0 %vm225_vm1, %v10509_v61  ;;  %v12474_v61 = vld [vmem:[#allocation21_spill] sm:$0xff] }
 0x21b   : > { %9128 = vmatprep.mubr.msk.f32.mxu0 %vm225_vm1, %v12457_v36 }
 0x21e   : > { %9129 = vmatmul.mubr.msk.f32.gmra.mrb[24].mxu0 %vm225_vm1, %v12458_v43 }
 0x21f   : > { %9131 = vmatprep.mubr.msk.f32.mxu0 %vm225_vm1, %v12459_v44 }
 0x222   : > { %9132 = vmatmul.mubr.msk.f32.gmra.mrb[26].mxu0 %vm225_vm1, %v12460_v45 }
 0x223   : > { %9134 = vmatprep.mubr.msk.f32.mxu0 %vm225_vm1, %v12461_v46 }
 0x226   : > { %9135 = vmatmul.mubr.msk.f32.gmra.mrb[28].mxu0 %vm225_vm1, %v12462_v48 }
 0x227   : > { %9137 = vmatprep.mubr.msk.f32.mxu0 %vm225_vm1, %v3043_v47 }
 0x22a   : > { %9138 = vmatmul.mubr.msk.f32.gmra.mrb[30].mxu0 %vm225_vm1, %v3044_v49 }
 0x22b   : > { %9142 = vmatprep.mubr.msk.f32.mxu0 %vm225_vm1, %v12463_v50 }
 0x22e   : > { %9143 = vmatmul.mubr.msk.f32.vlgmr.msra.gmra.mrb[0].mxu0 %vm225_vm1, %v12464_v51 }
 0x22f   : > { %9145 = vmatprep.mubr.msk.f32.mxu0 %vm225_vm1, %v12465_v52 }
 0x232   : > { %9146 = vmatmul.mubr.msk.f32.gmra.mrb[2].mxu0 %vm225_vm1, %v12466_v53 }
 0x233   : > { %9148 = vmatprep.mubr.msk.f32.mxu0 %vm225_vm1, %v12467_v54 }
 0x236   : > { %9149 = vmatmul.mubr.msk.f32.gmra.mrb[4].mxu0 %vm225_vm1, %v12468_v55 }
 0x237   : > { %9151 = vmatprep.mubr.msk.f32.mxu0 %vm225_vm1, %v12469_v56 }
 0x23a   : > { %9152 = vmatmul.mubr.msk.f32.gmra.mrb[6].mxu0 %vm225_vm1, %v12470_v57 }
 0x23b   : > { %9154 = vmatprep.mubr.msk.f32.mxu0 %vm225_vm1, %v12471_v58 }
 0x23e   : > { %9155 = vmatmul.mubr.msk.f32.gmra.mrb[8].mxu0 %vm225_vm1, %v12472_v59 }
 0x23f   : > { %9157 = vmatprep.mubr.msk.f32.mxu0 %vm225_vm1, %v12473_v60 }
 0x242   : > { %9158 = vmatmul.mubr.msk.f32.gmra.mrb[10].mxu0 %vm225_vm1, %v12474_v61 }
 0x243   : > { %9160 = vmatprep.mubr.msk.f32.mxu0 %vm225_vm1, %v12475_v14 }
 0x246   : > { %9161 = vmatmul.mubr.msk.f32.gmra.mrb[12].mxu0 %vm225_vm1, %v12447_v29 }
 0x247   : > { %9163 = vmatprep.mubr.msk.f32.mxu0 %vm225_vm1, %v12476_v15 }
 0x24a   : > { %9164 = vmatmul.mubr.msk.f32.gmra.mrb[14].mxu0 %vm225_vm1, %v12449_v33 }
 0x24b   : > { %9166 = vmatprep.mubr.msk.f32.mxu0 %vm225_vm1, %v12477_v16 }
 0x24e   : > { %9167 = vmatmul.mubr.msk.f32.gmra.mrb[16].mxu0 %vm225_vm1, %v12451_v30 }
 0x24f   : > { %9169 = vmatprep.mubr.msk.f32.mxu0 %vm225_vm1, %v12452_v34 }
 0x252   : > { %9170 = vmatmul.mubr.msk.f32.gmra.mrb[18].mxu0 %vm225_vm1, %v12478_v17 }
 0x253   : > { %9172 = vmatprep.mubr.msk.f32.mxu0 %vm225_vm1, %v12454_v28 }
 0x256   : > { %9173 = vmatmul.mubr.msk.f32.gmra.mrb[20].mxu0 %vm225_vm1, %v10767_v1  ;;  %v3433_v1 = vld [vmem:[#allocation2 + $0x19a] sm:$0xff] }
 0x257   : > { %9175 = vmatprep.mubr.msk.f32.mxu0 %vm225_vm1, %v12479_v18 }
 0x25a   : > { %9176 = vmatmul.mubr.msk.f32.gmra.mrb[22].mxu0 %vm225_vm1, %v10775_v0  ;;  %v3434_v0 = vld [vmem:[#allocation2 + $0x1a2] sm:$0xff] }
 0x25b   : > { %9178 = vmatprep.mubr.msk.f32.mxu0 %vm225_vm1, %v12456_v62  ;;  %v12481_v62 = vmov 0.0  }
 0x25c   : > { %3870 = vst.msk [vmem:[#allocation3 + $0x20] sm:$0xff] %vm3864_vm3, %v12481_v62  ;;  %3865 = vst.msk [vmem:[#allocation3] sm:$0xff] %vm3864_vm3, %v12481_v62 }
 0x25d   : > { %3866 = vst.msk [vmem:[#allocation3 + $0x8] sm:$0xff] %vm3864_vm3, %v12481_v62  ;;  %3869 = vst.msk [vmem:[#allocation3 + $0x18] sm:$0xff] %vm3864_vm3, %v12481_v62 }
 0x25e   : > { %9179 = vmatmul.mubr.msk.f32.gmra.mrb[24].mxu0 %vm225_vm1, %v10783_v40  ;;  %3872 = vst.msk [vmem:[#allocation3 + $0x30] sm:$0xff] %vm3864_vm3, %v12481_v62  ;;  %3873 = vst.msk [vmem:[#allocation3 + $0x38] sm:$0xff] %vm3864_vm3, %v12481_v62 }
 0x25f   : > { %9181 = vmatprep.mubr.msk.f32.mxu0 %vm225_vm1, %v12480_v19  ;;  %3875 = vst.msk [vmem:[#allocation3 + $0x48] sm:$0xff] %vm3864_vm3, %v12481_v62  ;;  %3876 = vst.msk [vmem:[#allocation3 + $0x50] sm:$0xff] %vm3864_vm3, %v12481_v62 }
 0x260   : > { %3878 = vst.msk [vmem:[#allocation3 + $0x60] sm:$0xff] %vm3864_vm3, %v12481_v62  ;;  %3879 = vst.msk [vmem:[#allocation3 + $0x68] sm:$0xff] %vm3864_vm3, %v12481_v62 }
 0x261   : > { %3881 = vst.msk [vmem:[#allocation3 + $0x78] sm:$0xff] %vm3864_vm3, %v12481_v62  ;;  %3882 = vst.msk [vmem:[#allocation3 + $0x80] sm:$0xff] %vm3864_vm3, %v12481_v62 }
 0x262   : > { %9182 = vmatmul.mubr.msk.f32.gmra.mrb[26].mxu0 %vm225_vm1, %v10791_v7  ;;  %3884 = vst.msk [vmem:[#allocation3 + $0x90] sm:$0xff] %vm3864_vm3, %v12481_v62  ;;  %3885 = vst.msk [vmem:[#allocation3 + $0x98] sm:$0xff] %vm3864_vm3, %v12481_v62 }
 0x263   : > { %9184 = vmatprep.mubr.msk.f32.mxu0 %vm225_vm1, %v11005_v35  ;;  %3887 = vst.msk [vmem:[#allocation3 + $0xa8] sm:$0xff] %vm3864_vm3, %v12481_v62  ;;  %3888 = vst.msk [vmem:[#allocation3 + $0xb0] sm:$0xff] %vm3864_vm3, %v12481_v62 }
 0x264   : > { %3890 = vst.msk [vmem:[#allocation3 + $0xc0] sm:$0xff] %vm3864_vm3, %v12481_v62  ;;  %3891 = vst.msk [vmem:[#allocation3 + $0xc8] sm:$0xff] %vm3864_vm3, %v12481_v62  ;;  %v3986_v21 = vld [vmem:[#allocation3 + $0x1] sm:$0xff] }
 0x265   : > { %3893 = vst.msk [vmem:[#allocation3 + $0xd8] sm:$0xff] %vm3864_vm3, %v12481_v62  ;;  %3894 = vst.msk [vmem:[#allocation3 + $0xe0] sm:$0xff] %vm3864_vm3, %v12481_v62  ;;  %9192 = vmatprep.mubr.msk.f32.mxu1 %vm3864_vm3, %v3986_v21 }
 0x266   : > { %9185 = vmatmul.mubr.msk.f32.gmra.mrb[28].mxu0 %vm225_vm1, %v11011_v8  ;;  %3896 = vst.msk [vmem:[#allocation3 + $0xf0] sm:$0xff] %vm3864_vm3, %v12481_v62  ;;  %3897 = vst.msk [vmem:[#allocation3 + $0xf8] sm:$0xff] %vm3864_vm3, %v12481_v62 }
 0x267   : > { %9187 = vmatprep.mubr.msk.f32.mxu0 %vm225_vm1, %v3433_v1  ;;  %3899 = vst.msk [vmem:[#allocation3 + $0x108] sm:$0xff] %vm3864_vm3, %v12481_v62  ;;  %3900 = vst.msk [vmem:[#allocation3 + $0x110] sm:$0xff] %vm3864_vm3, %v12481_v62 }
 0x268   : > { %3902 = vst.msk [vmem:[#allocation3 + $0x120] sm:$0xff] %vm3864_vm3, %v12481_v62  ;;  %3903 = vst.msk [vmem:[#allocation3 + $0x128] sm:$0xff] %vm3864_vm3, %v12481_v62 }
 0x269   : > { %3905 = vst.msk [vmem:[#allocation3 + $0x138] sm:$0xff] %vm3864_vm3, %v12481_v62  ;;  %3906 = vst.msk [vmem:[#allocation3 + $0x140] sm:$0xff] %vm3864_vm3, %v12481_v62 }
 0x26a   : > { %9188 = vmatmul.mubr.msk.f32.gmra.mrb[30].mxu0 %vm225_vm1, %v3434_v0  ;;  %3908 = vst.msk [vmem:[#allocation3 + $0x150] sm:$0xff] %vm3864_vm3, %v12481_v62  ;;  %3909 = vst.msk [vmem:[#allocation3 + $0x158] sm:$0xff] %vm3864_vm3, %v12481_v62 }
 0x26b   : > { %3911 = vst.msk [vmem:[#allocation3 + $0x168] sm:$0xff] %vm3864_vm3, %v12481_v62  ;;  %3912 = vst.msk [vmem:[#allocation3 + $0x170] sm:$0xff] %vm3864_vm3, %v12481_v62 }
 0x26c   : > { %3914 = vst.msk [vmem:[#allocation3 + $0x180] sm:$0xff] %vm3864_vm3, %v12481_v62  ;;  %3915 = vst.msk [vmem:[#allocation3 + $0x188] sm:$0xff] %vm3864_vm3, %v12481_v62 }
 0x26d   : > { %3917 = vst.msk [vmem:[#allocation3 + $0x198] sm:$0xff] %vm3864_vm3, %v12481_v62  ;;  %3918 = vst.msk [vmem:[#allocation3 + $0x1a0] sm:$0xff] %vm3864_vm3, %v12481_v62 }
 0x26e   : > { %3871 = vst.msk [vmem:[#allocation3 + $0x28] sm:$0x3] %vm3867_vm4, %v12481_v62  ;;  %3868 = vst.msk [vmem:[#allocation3 + $0x10] sm:$0x3] %vm3867_vm4, %v12481_v62 }
 0x26f   : > { %3874 = vst.msk [vmem:[#allocation3 + $0x40] sm:$0x3] %vm3867_vm4, %v12481_v62  ;;  %3877 = vst.msk [vmem:[#allocation3 + $0x58] sm:$0x3] %vm3867_vm4, %v12481_v62 }
 0x270   : > { %3880 = vst.msk [vmem:[#allocation3 + $0x70] sm:$0x3] %vm3867_vm4, %v12481_v62  ;;  %3883 = vst.msk [vmem:[#allocation3 + $0x88] sm:$0x3] %vm3867_vm4, %v12481_v62 }
 0x271   : > { %3886 = vst.msk [vmem:[#allocation3 + $0xa0] sm:$0x3] %vm3867_vm4, %v12481_v62  ;;  %3889 = vst.msk [vmem:[#allocation3 + $0xb8] sm:$0x3] %vm3867_vm4, %v12481_v62 }
 0x272   : > { %3892 = vst.msk [vmem:[#allocation3 + $0xd0] sm:$0x3] %vm3867_vm4, %v12481_v62  ;;  %3895 = vst.msk [vmem:[#allocation3 + $0xe8] sm:$0x3] %vm3867_vm4, %v12481_v62 }
 0x273   : > { %3898 = vst.msk [vmem:[#allocation3 + $0x100] sm:$0x3] %vm3867_vm4, %v12481_v62  ;;  %3901 = vst.msk [vmem:[#allocation3 + $0x118] sm:$0x3] %vm3867_vm4, %v12481_v62 }
 0x274   : > { %3904 = vst.msk [vmem:[#allocation3 + $0x130] sm:$0x3] %vm3867_vm4, %v12481_v62  ;;  %3907 = vst.msk [vmem:[#allocation3 + $0x148] sm:$0x3] %vm3867_vm4, %v12481_v62 }
 0x275   : > { %3910 = vst.msk [vmem:[#allocation3 + $0x160] sm:$0x3] %vm3867_vm4, %v12481_v62  ;;  %3913 = vst.msk [vmem:[#allocation3 + $0x178] sm:$0x3] %vm3867_vm4, %v12481_v62  ;;  %v3987_v22 = vld [vmem:[#allocation3 + $0x9] sm:$0xff] }
 0x276   : > { %3916 = vst.msk [vmem:[#allocation3 + $0x190] sm:$0x3] %vm3867_vm4, %v12481_v62  ;;  %3919 = vst.msk [vmem:[#allocation3 + $0x1a8] sm:$0x3] %vm3867_vm4, %v12481_v62  ;;  %9193 = vmatmul.mubr.msk.f32.vlgmr.msra.gmra.mrb[0].mxu1 %vm3864_vm3, %v3987_v22 }
 0x277   : > { %9241 = vmatpush3.msra.mxu1 %v3985_v23 }
 0x278   : > { %9290 = vmatprep.subr.mxu1 %v11322_v24 }
 0x301   : > { %v9144_v26 = vpop.f32.mrb[0].mxu0 }
 0x302   : > { %v3801_v27 = vadd.f32 %v9144_v26, %v11328_v25  ;;  %v3602_v31 = vpop.f32.mrb[1].mxu0 }
 0x303   : > { %v3800_v32 = vadd.f32 %v11328_v25, %v3602_v31 }
 0x304   : > { %v3833_v37 = vmax.f32 %v3801_v27, 0.0 }
 0x305   : > { %v3832_v38 = vmax.f32 %v3800_v32, 0.0  ;;  %v9147_v39 = vpop.f32.mrb[2].mxu0 }
 0x306   : > { %3922 = vst.msk [vmem:[#allocation3 + $0x21] sm:$0xff] %vm3864_vm3, %v3833_v37  ;;  %v3803_v42 = vadd.f32 %v9147_v39, %v11328_v25  ;;  %v3612_v3 = vpop.f32.mrb[3].mxu0 }
 0x307   : > { %3921 = vst.msk [vmem:[#allocation3 + $0x19] sm:$0xff] %vm3864_vm3, %v3832_v38  ;;  %v3802_v4 = vadd.f32 %v11328_v25, %v3612_v3 }
 0x308   : > { %v3835_v40 = vmax.f32 %v3803_v42, 0.0 }
 0x309   : > { %v3834_v41 = vmax.f32 %v3802_v4, 0.0  ;;  %v9150_v7 = vpop.f32.mrb[4].mxu0 }
 0x30a   : > { %3924 = vst.msk [vmem:[#allocation3 + $0x39] sm:$0xff] %vm3864_vm3, %v3835_v40  ;;  %v3805_v2 = vadd.f32 %v9150_v7, %v11328_v25  ;;  %v3622_v5 = vpop.f32.mrb[5].mxu0 }
 0x30b   : > { %3923 = vst.msk [vmem:[#allocation3 + $0x31] sm:$0xff] %vm3864_vm3, %v3834_v41  ;;  %v3804_v28 = vadd.f32 %v11328_v25, %v3622_v5 }
 0x30c   : > { %v3837_v30 = vmax.f32 %v3805_v2, 0.0 }
 0x30d   : > { %v3836_v33 = vmax.f32 %v3804_v28, 0.0  ;;  %v9153_v34 = vpop.f32.mrb[6].mxu0  ;;  %v11348_v9 = vld [vmem:[#allocation3 + $0x21] sm:$0xff] }
 0x30e   : > { %3926 = vst.msk [vmem:[#allocation3 + $0x51] sm:$0xff] %vm3864_vm3, %v3837_v30  ;;  %v3807_v63 = vadd.f32 %v9153_v34, %v11328_v25  ;;  %v3632_v35 = vpop.f32.mrb[7].mxu0  ;;  %v11342_v29 = vld [vmem:[#allocation3 + $0x19] sm:$0xff] }
 0x30f   : > { %3925 = vst.msk [vmem:[#allocation3 + $0x49] sm:$0xff] %vm3864_vm3, %v3836_v33  ;;  %v3806_v8 = vadd.f32 %v11328_v25, %v3632_v35  ;;  %9195 = vmatprep.mubr.msk.f32.mxu1 %vm3864_vm3, %v11342_v29 }
 0x310   : > { %v3839_v10 = vmax.f32 %v3807_v63, 0.0  ;;  %9196 = vmatmul.mubr.msk.f32.gmra.mrb[2].mxu1 %vm3864_vm3, %v11348_v9 }
 0x311   : > { %v3838_v11 = vmax.f32 %v3806_v8, 0.0  ;;  %v9156_v6 = vpop.f32.mrb[8].mxu0  ;;  %v11360_v44 = vld [vmem:[#allocation3 + $0x39] sm:$0xff] }
 0x312   : > { %3928 = vst.msk [vmem:[#allocation3 + $0x69] sm:$0xff] %vm3864_vm3, %v3839_v10  ;;  %v3809_v12 = vadd.f32 %v9156_v6, %v11328_v25  ;;  %v3642_v13 = vpop.f32.mrb[9].mxu0  ;;  %v11354_v36 = vld [vmem:[#allocation3 + $0x31] sm:$0xff] }
 0x313   : > { %3927 = vst.msk [vmem:[#allocation3 + $0x61] sm:$0xff] %vm3864_vm3, %v3838_v11  ;;  %v3808_v43 = vadd.f32 %v11328_v25, %v3642_v13  ;;  %9198 = vmatprep.mubr.msk.f32.mxu1 %vm3864_vm3, %v11354_v36 }
 0x314   : > { %v3841_v45 = vmax.f32 %v3809_v12, 0.0  ;;  %9199 = vmatmul.mubr.msk.f32.gmra.mrb[4].mxu1 %vm3864_vm3, %v11360_v44 }
 0x315   : > { %v3840_v46 = vmax.f32 %v3808_v43, 0.0  ;;  %v9159_v47 = vpop.f32.mrb[10].mxu0  ;;  %v11372_v52 = vld [vmem:[#allocation3 + $0x51] sm:$0xff] }
 0x316   : > { %3930 = vst.msk [vmem:[#allocation3 + $0x81] sm:$0xff] %vm3864_vm3, %v3841_v45  ;;  %v3811_v48 = vadd.f32 %v9159_v47, %v11328_v25  ;;  %v3652_v49 = vpop.f32.mrb[11].mxu0  ;;  %v11366_v50 = vld [vmem:[#allocation3 + $0x49] sm:$0xff] }
 0x317   : > { %3929 = vst.msk [vmem:[#allocation3 + $0x79] sm:$0xff] %vm3864_vm3, %v3840_v46  ;;  %v3810_v51 = vadd.f32 %v11328_v25, %v3652_v49  ;;  %9201 = vmatprep.mubr.msk.f32.mxu1 %vm3864_vm3, %v11366_v50 }
 0x318   : > { %v3843_v53 = vmax.f32 %v3811_v48, 0.0  ;;  %9202 = vmatmul.mubr.msk.f32.gmra.mrb[6].mxu1 %vm3864_vm3, %v11372_v52 }
 0x319   : > { %v3842_v54 = vmax.f32 %v3810_v51, 0.0  ;;  %v9162_v55 = vpop.f32.mrb[12].mxu0  ;;  %v11384_v60 = vld [vmem:[#allocation3 + $0x69] sm:$0xff] }
 0x31a   : > { %3932 = vst.msk [vmem:[#allocation3 + $0x99] sm:$0xff] %vm3864_vm3, %v3843_v53  ;;  %v3813_v56 = vadd.f32 %v9162_v55, %v11328_v25  ;;  %v3662_v57 = vpop.f32.mrb[13].mxu0  ;;  %v11378_v58 = vld [vmem:[#allocation3 + $0x61] sm:$0xff] }
 0x31b   : > { %3931 = vst.msk [vmem:[#allocation3 + $0x91] sm:$0xff] %vm3864_vm3, %v3842_v54  ;;  %v3812_v59 = vadd.f32 %v11328_v25, %v3662_v57  ;;  %9204 = vmatprep.mubr.msk.f32.mxu1 %vm3864_vm3, %v11378_v58 }
 0x31c   : > { %v3845_v61 = vmax.f32 %v3813_v56, 0.0  ;;  %9205 = vmatmul.mubr.msk.f32.gmra.mrb[8].mxu1 %vm3864_vm3, %v11384_v60 }
 0x31d   : > { %v3844_v14 = vmax.f32 %v3812_v59, 0.0  ;;  %v9165_v15 = vpop.f32.mrb[14].mxu0  ;;  %v11396_v1 = vld [vmem:[#allocation3 + $0x81] sm:$0xff] }
 0x31e   : > { %3934 = vst.msk [vmem:[#allocation3 + $0xb1] sm:$0xff] %vm3864_vm3, %v3845_v61  ;;  %v3815_v16 = vadd.f32 %v9165_v15, %v11328_v25  ;;  %v3672_v17 = vpop.f32.mrb[15].mxu0  ;;  %v11390_v18 = vld [vmem:[#allocation3 + $0x79] sm:$0xff] }
 0x31f   : > { %3933 = vst.msk [vmem:[#allocation3 + $0xa9] sm:$0xff] %vm3864_vm3, %v3844_v14  ;;  %v3814_v19 = vadd.f32 %v11328_v25, %v3672_v17  ;;  %9207 = vmatprep.mubr.msk.f32.mxu1 %vm3864_vm3, %v11390_v18 }
 0x320   : > { %v3847_v0 = vmax.f32 %v3815_v16, 0.0  ;;  %9208 = vmatmul.mubr.msk.f32.gmra.mrb[10].mxu1 %vm3864_vm3, %v11396_v1 }
 0x321   : > { %v3846_v62 = vmax.f32 %v3814_v19, 0.0  ;;  %v9168_v20 = vpop.f32.mrb[16].mxu0  ;;  %v11408_v27 = vld [vmem:[#allocation3 + $0x99] sm:$0xff] }
 0x322   : > { %3936 = vst.msk [vmem:[#allocation3 + $0xc9] sm:$0xff] %vm3864_vm3, %v3847_v0  ;;  %v3817_v21 = vadd.f32 %v9168_v20, %v11328_v25  ;;  %v3682_v22 = vpop.f32.mrb[17].mxu0  ;;  %v11402_v23 = vld [vmem:[#allocation3 + $0x91] sm:$0xff] }
 0x323   : > { %3935 = vst.msk [vmem:[#allocation3 + $0xc1] sm:$0xff] %vm3864_vm3, %v3846_v62  ;;  %v3816_v26 = vadd.f32 %v11328_v25, %v3682_v22  ;;  %9210 = vmatprep.mubr.msk.f32.mxu1 %vm3864_vm3, %v11402_v23 }
 0x324   : > { %v3849_v31 = vmax.f32 %v3817_v21, 0.0  ;;  %9211 = vmatmul.mubr.msk.f32.gmra.mrb[12].mxu1 %vm3864_vm3, %v11408_v27 }
 0x325   : > { %v3848_v32 = vmax.f32 %v3816_v26, 0.0  ;;  %v9171_v37 = vpop.f32.mrb[18].mxu0  ;;  %v11420_v4 = vld [vmem:[#allocation3 + $0xb1] sm:$0xff] }
 0x326   : > { %3938 = vst.msk [vmem:[#allocation3 + $0xe1] sm:$0xff] %vm3864_vm3, %v3849_v31  ;;  %v3819_v38 = vadd.f32 %v9171_v37, %v11328_v25  ;;  %v3692_v39 = vpop.f32.mrb[19].mxu0  ;;  %v11414_v42 = vld [vmem:[#allocation3 + $0xa9] sm:$0xff] }
 0x327   : > { %3937 = vst.msk [vmem:[#allocation3 + $0xd9] sm:$0xff] %vm3864_vm3, %v3848_v32  ;;  %v3818_v3 = vadd.f32 %v11328_v25, %v3692_v39  ;;  %9213 = vmatprep.mubr.msk.f32.mxu1 %vm3864_vm3, %v11414_v42 }
 0x328   : > { %v3851_v40 = vmax.f32 %v3819_v38, 0.0  ;;  %9214 = vmatmul.mubr.msk.f32.gmra.mrb[14].mxu1 %vm3864_vm3, %v11420_v4 }
 0x329   : > { %v3850_v41 = vmax.f32 %v3818_v3, 0.0  ;;  %v9174_v7 = vpop.f32.mrb[20].mxu0  ;;  %v11432_v33 = vld [vmem:[#allocation3 + $0xc9] sm:$0xff] }
 0x32a   : > { %3940 = vst.msk [vmem:[#allocation3 + $0xf9] sm:$0xff] %vm3864_vm3, %v3851_v40  ;;  %v3821_v2 = vadd.f32 %v9174_v7, %v11328_v25  ;;  %v3702_v5 = vpop.f32.mrb[21].mxu0  ;;  %v11426_v28 = vld [vmem:[#allocation3 + $0xc1] sm:$0xff] }
 0x32b   : > { %3939 = vst.msk [vmem:[#allocation3 + $0xf1] sm:$0xff] %vm3864_vm3, %v3850_v41  ;;  %v3820_v30 = vadd.f32 %v11328_v25, %v3702_v5  ;;  %9216 = vmatprep.mubr.msk.f32.mxu1 %vm3864_vm3, %v11426_v28  ;;  %v3953_v5 = vld [vmem:[#allocation3] sm:$0xff] }
 0x32c   : > { %v3853_v34 = vmax.f32 %v3821_v2, 0.0  ;;  %9217 = vmatmul.mubr.msk.f32.gmra.mrb[16].mxu1 %vm3864_vm3, %v11432_v33 }
 0x32d   : > { %v3852_v63 = vmax.f32 %v3820_v30, 0.0  ;;  %v9177_v35 = vpop.f32.mrb[22].mxu0  ;;  %v11444_v12 = vld [vmem:[#allocation3 + $0xe1] sm:$0xff] }
 0x32e   : > { %3942 = vst.msk [vmem:[#allocation3 + $0x111] sm:$0xff] %vm3864_vm3, %v3853_v34  ;;  %v3823_v8 = vadd.f32 %v9177_v35, %v11328_v25  ;;  %v3712_v10 = vpop.f32.mrb[23].mxu0  ;;  %v11438_v11 = vld [vmem:[#allocation3 + $0xd9] sm:$0xff]  ;;  %v3954_v34 = vld [vmem:[#allocation3 + $0x8] sm:$0xff] }
 0x32f   : > { %3941 = vst.msk [vmem:[#allocation3 + $0x109] sm:$0xff] %vm3864_vm3, %v3852_v63  ;;  %v3822_v6 = vadd.f32 %v11328_v25, %v3712_v10  ;;  %9219 = vmatprep.mubr.msk.f32.mxu1 %vm3864_vm3, %v11438_v11  ;;  %v11518_v63 = vld [vmem:[%s12279_s3 + $0x18] sm:$0xff]  ;;  %v11521_v35 = vld [vmem:[#allocation3 + $0x18] sm:$0xff]  ;;  %v11531_v10 = vld [vmem:[#allocation3 + $0x30] sm:$0xff] }
 0x330   : > { %v3855_v13 = vmax.f32 %v3823_v8, 0.0  ;;  %9220 = vmatmul.mubr.msk.f32.gmra.mrb[18].mxu1 %vm3864_vm3, %v11444_v12  ;;  %v11527_v8 = vld [vmem:[#allocation3 + $0x20] sm:$0xff] }
 0x331   : > { %v3854_v43 = vmax.f32 %v3822_v6, 0.0  ;;  %v9180_v45 = vpop.f32.mrb[24].mxu0  ;;  %v11456_v51 = vld [vmem:[#allocation3 + $0xf9] sm:$0xff] }
 0x332   : > { %3944 = vst.msk [vmem:[#allocation3 + $0x129] sm:$0xff] %vm3864_vm3, %v3855_v13  ;;  %v3825_v46 = vadd.f32 %v9180_v45, %v11328_v25  ;;  %v3722_v47 = vpop.f32.mrb[25].mxu0  ;;  %v11450_v48 = vld [vmem:[#allocation3 + $0xf1] sm:$0xff]  ;;  %v11551_v45 = vld [vmem:[#allocation3 + $0x68] sm:$0xff] }
 0x333   : > { %3943 = vst.msk [vmem:[#allocation3 + $0x121] sm:$0xff] %vm3864_vm3, %v3854_v43  ;;  %v3824_v49 = vadd.f32 %v11328_v25, %v3722_v47  ;;  %9222 = vmatprep.mubr.msk.f32.mxu1 %vm3864_vm3, %v11450_v48  ;;  %v11535_v6 = vld [vmem:[#allocation3 + $0x38] sm:$0xff]  ;;  %v11543_v13 = vld [vmem:[#allocation3 + $0x50] sm:$0xff]  ;;  %v11547_v43 = vld [vmem:[#allocation3 + $0x60] sm:$0xff] }
 0x334   : > { %v3857_v53 = vmax.f32 %v3825_v46, 0.0  ;;  %9223 = vmatmul.mubr.msk.f32.gmra.mrb[20].mxu1 %vm3864_vm3, %v11456_v51  ;;  %v11555_v46 = vld [vmem:[#allocation3 + $0x78] sm:$0xff]  ;;  %v11559_v47 = vld [vmem:[#allocation3 + $0x80] sm:$0xff] }
 0x335   : > { %v3856_v54 = vmax.f32 %v3824_v49, 0.0  ;;  %v9183_v55 = vpop.f32.mrb[26].mxu0  ;;  %v11468_v14 = vld [vmem:[#allocation3 + $0x111] sm:$0xff] }
 0x336   : > { %3946 = vst.msk [vmem:[#allocation3 + $0x141] sm:$0xff] %vm3864_vm3, %v3857_v53  ;;  %v3827_v56 = vadd.f32 %v9183_v55, %v11328_v25  ;;  %v3732_v57 = vpop.f32.mrb[27].mxu0  ;;  %v11462_v59 = vld [vmem:[#allocation3 + $0x109] sm:$0xff]  ;;  %v11567_v53 = vld [vmem:[#allocation3 + $0x98] sm:$0xff] }
 0x337   : > { %3945 = vst.msk [vmem:[#allocation3 + $0x139] sm:$0xff] %vm3864_vm3, %v3856_v54  ;;  %v3826_v61 = vadd.f32 %v11328_v25, %v3732_v57  ;;  %9225 = vmatprep.mubr.msk.f32.mxu1 %vm3864_vm3, %v11462_v59  ;;  %v11563_v49 = vld [vmem:[#allocation3 + $0x90] sm:$0xff]  ;;  %v11571_v54 = vld [vmem:[#allocation3 + $0xa8] sm:$0xff] }
 0x338   : > { %v3859_v15 = vmax.f32 %v3827_v56, 0.0  ;;  %9226 = vmatmul.mubr.msk.f32.gmra.mrb[22].mxu1 %vm3864_vm3, %v11468_v14  ;;  %v11575_v55 = vld [vmem:[#allocation3 + $0xb0] sm:$0xff]  ;;  %v11579_v56 = vld [vmem:[#allocation3 + $0xc0] sm:$0xff]  ;;  %v11583_v57 = vld [vmem:[#allocation3 + $0xc8] sm:$0xff] }
 0x339   : > { %v3858_v16 = vmax.f32 %v3826_v61, 0.0  ;;  %v9186_v17 = vpop.f32.mrb[28].mxu0  ;;  %v11480_v21 = vld [vmem:[#allocation3 + $0x129] sm:$0xff]  ;;  %v11587_v61 = vld [vmem:[#allocation3 + $0xd8] sm:$0xff] }
 0x33a   : > { %3948 = vst.msk [vmem:[#allocation3 + $0x159] sm:$0xff] %vm3864_vm3, %v3859_v15  ;;  %v3829_v19 = vadd.f32 %v9186_v17, %v11328_v25  ;;  %v3742_v0 = vpop.f32.mrb[29].mxu0  ;;  %v11474_v62 = vld [vmem:[#allocation3 + $0x121] sm:$0xff]  ;;  %v11599_v17 = vld [vmem:[#allocation3 + $0xf8] sm:$0xff] }
 0x33b   : > { %3947 = vst.msk [vmem:[#allocation3 + $0x151] sm:$0xff] %vm3864_vm3, %v3858_v16  ;;  %v3828_v20 = vadd.f32 %v11328_v25, %v3742_v0  ;;  %9228 = vmatprep.mubr.msk.f32.mxu1 %vm3864_vm3, %v11474_v62  ;;  %v11591_v15 = vld [vmem:[#allocation3 + $0xe0] sm:$0xff]  ;;  %v11595_v16 = vld [vmem:[#allocation3 + $0xf0] sm:$0xff] }
 0x33c   : > { %v3861_v22 = vmax.f32 %v3829_v19, 0.0  ;;  %9229 = vmatmul.mubr.msk.f32.gmra.mrb[24].mxu1 %vm3864_vm3, %v11480_v21  ;;  %v11603_v19 = vld [vmem:[#allocation3 + $0x108] sm:$0xff]  ;;  %v11607_v0 = vld [vmem:[#allocation3 + $0x110] sm:$0xff] }
 0x33d   : > { %v3860_v26 = vmax.f32 %v3828_v20, 0.0  ;;  %v9189_v31 = vpop.f32.mrb[30].mxu0  ;;  %v11492_v3 = vld [vmem:[#allocation3 + $0x141] sm:$0xff] }
 0x33e   : > { %3950 = vst.msk [vmem:[#allocation3 + $0x171] sm:$0xff] %vm3864_vm3, %v3861_v22  ;;  %v3831_v32 = vadd.f32 %v9189_v31, %v11328_v25  ;;  %v3752_v37 = vpop.f32.mrb[31].mxu0  ;;  %v11486_v38 = vld [vmem:[#allocation3 + $0x139] sm:$0xff]  ;;  %v11615_v22 = vld [vmem:[#allocation3 + $0x128] sm:$0xff] }
 0x33f   : > { %3949 = vst.msk [vmem:[#allocation3 + $0x169] sm:$0xff] %vm3864_vm3, %v3860_v26  ;;  %v3830_v39 = vadd.f32 %v11328_v25, %v3752_v37  ;;  %9231 = vmatprep.mubr.msk.f32.mxu1 %vm3864_vm3, %v11486_v38  ;;  %v11611_v20 = vld [vmem:[#allocation3 + $0x120] sm:$0xff]  ;;  %v11619_v26 = vld [vmem:[#allocation3 + $0x138] sm:$0xff] }
 0x340   : > { %v3863_v40 = vmax.f32 %v3831_v32, 0.0  ;;  %9232 = vmatmul.mubr.msk.f32.gmra.mrb[26].mxu1 %vm3864_vm3, %v11492_v3  ;;  %v11623_v31 = vld [vmem:[#allocation3 + $0x140] sm:$0xff] }
 0x341   : > { %v3862_v41 = vmax.f32 %v3830_v39, 0.0  ;;  %v11502_v25 = vld [vmem:[#allocation3 + $0x159] sm:$0xff] }
 0x342   : > { %3952 = vst.msk [vmem:[#allocation3 + $0x189] sm:$0xff] %vm3864_vm3, %v3863_v40  ;;  %v11497_v7 = vld [vmem:[#allocation3 + $0x151] sm:$0xff]  ;;  %v4662_v40 = vld [vmem:[#allocation3 + $0x2] sm:$0xff] }
 0x343   : > { %3951 = vst.msk [vmem:[#allocation3 + $0x181] sm:$0xff] %vm3864_vm3, %v3862_v41  ;;  %9234 = vmatprep.mubr.msk.f32.mxu1 %vm3864_vm3, %v11497_v7  ;;  %v11627_v32 = vld [vmem:[#allocation3 + $0x150] sm:$0xff]  ;;  %v11631_v37 = vld [vmem:[#allocation3 + $0x158] sm:$0xff] }
 0x344   : > { %9235 = vmatmul.mubr.msk.f32.gmra.mrb[28].mxu1 %vm3864_vm3, %v11502_v25 }
 0x345   : > { %v11510_v30 = vld [vmem:[#allocation3 + $0x171] sm:$0xff] }
 0x346   : > { %v11506_v2 = vld [vmem:[#allocation3 + $0x169] sm:$0xff]  ;;  %12483 = vst [vmem:[#allocation9_spill] sm:$0xff] %v11510_v30 }
 0x347   : > { %12482 = vst [vmem:[#allocation8_spill] sm:$0xff] %v11506_v2  ;;  %9237 = vmatprep.mubr.msk.f32.mxu1 %vm3864_vm3, %v11506_v2  ;;  %v11635_v39 = vld [vmem:[#allocation3 + $0x168] sm:$0xff]  ;;  %v11639_v41 = vld [vmem:[#allocation3 + $0x170] sm:$0xff] }
 0x348   : > { %9238 = vmatmul.mubr.msk.f32.gmra.mrb[30].mxu1 %vm3864_vm3, %v11510_v30  ;;  %v11650_v30 = vld [vmem:[#allocation3 + $0x1a] sm:$0xff]  ;;  %v11656_v2 = vld [vmem:[#allocation3 + $0x22] sm:$0xff] }
 0x349   : > { %9242 = vmatprep.mubr.msk.f32.mxu1 %vm3864_vm3, %v3953_v5  ;;  %v4663_v5 = vld [vmem:[#allocation3 + $0xa] sm:$0xff]  ;;  %12484 = vst [vmem:[#allocation23_spill] sm:$0xff] %v11650_v30  ;;  %12485 = vst [vmem:[#allocation25_spill] sm:$0xff] %v11656_v2 }
 0x34c   : > { %9243 = vmatmul.mubr.msk.f32.vlgmr.msra.gmra.mrb[0].mxu1 %vm3864_vm3, %v3954_v34  ;;  %v11647_v34 = vld [vmem:[%s12279_s3 + $0x20] sm:$0xff] }
 0x34d   : > { %9291 = vmatpush3.msra.mxu1 %v11322_v24  ;;  %9245 = vmatprep.mubr.msk.f32.mxu1 %vm3864_vm3, %v11521_v35  ;;  %v11539_v24 = vld [vmem:[#allocation3 + $0x48] sm:$0xff] }
 0x34e   : > { %9340 = vmatprep.subr.mxu1 %v11518_v63 }
 0x350   : > { %9246 = vmatmul.mubr.msk.f32.gmra.mrb[2].mxu1 %vm3864_vm3, %v11527_v8 }
 0x351   : > { %9248 = vmatprep.mubr.msk.f32.mxu1 %vm3864_vm3, %v11531_v10 }
 0x354   : > { %9249 = vmatmul.mubr.msk.f32.gmra.mrb[4].mxu1 %vm3864_vm3, %v11535_v6 }
 0x355   : > { %9251 = vmatprep.mubr.msk.f32.mxu1 %vm3864_vm3, %v11539_v24 }
 0x358   : > { %9252 = vmatmul.mubr.msk.f32.gmra.mrb[6].mxu1 %vm3864_vm3, %v11543_v13 }
 0x359   : > { %9254 = vmatprep.mubr.msk.f32.mxu1 %vm3864_vm3, %v11547_v43 }
 0x35c   : > { %9255 = vmatmul.mubr.msk.f32.gmra.mrb[8].mxu1 %vm3864_vm3, %v11551_v45 }
 0x35d   : > { %9257 = vmatprep.mubr.msk.f32.mxu1 %vm3864_vm3, %v11555_v46 }
 0x360   : > { %9258 = vmatmul.mubr.msk.f32.gmra.mrb[10].mxu1 %vm3864_vm3, %v11559_v47 }
 0x361   : > { %9260 = vmatprep.mubr.msk.f32.mxu1 %vm3864_vm3, %v11563_v49 }
 0x364   : > { %9261 = vmatmul.mubr.msk.f32.gmra.mrb[12].mxu1 %vm3864_vm3, %v11567_v53 }
 0x365   : > { %9263 = vmatprep.mubr.msk.f32.mxu1 %vm3864_vm3, %v11571_v54 }
 0x368   : > { %9264 = vmatmul.mubr.msk.f32.gmra.mrb[14].mxu1 %vm3864_vm3, %v11575_v55 }
 0x369   : > { %9266 = vmatprep.mubr.msk.f32.mxu1 %vm3864_vm3, %v11579_v56 }
 0x36c   : > { %9267 = vmatmul.mubr.msk.f32.gmra.mrb[16].mxu1 %vm3864_vm3, %v11583_v57 }
 0x36d   : > { %9269 = vmatprep.mubr.msk.f32.mxu1 %vm3864_vm3, %v11587_v61 }
 0x370   : > { %9270 = vmatmul.mubr.msk.f32.gmra.mrb[18].mxu1 %vm3864_vm3, %v11591_v15 }
 0x371   : > { %9272 = vmatprep.mubr.msk.f32.mxu1 %vm3864_vm3, %v11595_v16 }
 0x374   : > { %9273 = vmatmul.mubr.msk.f32.gmra.mrb[20].mxu1 %vm3864_vm3, %v11599_v17 }
 0x375   : > { %9275 = vmatprep.mubr.msk.f32.mxu1 %vm3864_vm3, %v11603_v19 }
 0x378   : > { %9276 = vmatmul.mubr.msk.f32.gmra.mrb[22].mxu1 %vm3864_vm3, %v11607_v0 }
 0x379   : > { %9278 = vmatprep.mubr.msk.f32.mxu1 %vm3864_vm3, %v11611_v20 }
 0x37c   : > { %9279 = vmatmul.mubr.msk.f32.gmra.mrb[24].mxu1 %vm3864_vm3, %v11615_v22 }
 0x37d   : > { %9281 = vmatprep.mubr.msk.f32.mxu1 %vm3864_vm3, %v11619_v26 }
 0x380   : > { %9282 = vmatmul.mubr.msk.f32.gmra.mrb[26].mxu1 %vm3864_vm3, %v11623_v31 }
 0x381   : > { %9284 = vmatprep.mubr.msk.f32.mxu1 %vm3864_vm3, %v11627_v32 }
 0x384   : > { %9285 = vmatmul.mubr.msk.f32.gmra.mrb[28].mxu1 %vm3864_vm3, %v11631_v37 }
 0x385   : > { %9287 = vmatprep.mubr.msk.f32.mxu1 %vm3864_vm3, %v11635_v39 }
 0x388   : > { %9288 = vmatmul.mubr.msk.f32.gmra.mrb[30].mxu1 %vm3864_vm3, %v11639_v41 }
 0x389   : > { %9292 = vmatprep.mubr.msk.f32.mxu1 %vm3864_vm3, %v4662_v40  ;;  %v11660_v40 = vld [vmem:[#allocation3 + $0x32] sm:$0xff] }
 0x38a   : > { %12486 = vst [vmem:[#allocation27_spill] sm:$0xff] %v11660_v40 }
 0x38c   : > { %9293 = vmatmul.mubr.msk.f32.vlgmr.msra.gmra.mrb[0].mxu1 %vm3864_vm3, %v4663_v5  ;;  %v11664_v5 = vld [vmem:[#allocation3 + $0x3a] sm:$0xff] }
 0x38d   : > { %9341 = vmatpush3.msra.mxu1 %v11518_v63  ;;  %9295 = vmatprep.mubr.msk.f32.mxu1 %vm3864_vm3, %v11650_v30  ;;  %12487 = vst [vmem:[#allocation28_spill] sm:$0xff] %v11664_v5  ;;  %v11668_v63 = vld [vmem:[#allocation3 + $0x4a] sm:$0xff]  ;;  %v11672_v30 = vld [vmem:[#allocation3 + $0x52] sm:$0xff] }
 0x38e   : > { %9390 = vmatprep.subr.mxu1 %v11647_v34  ;;  %12488 = vst [vmem:[#allocation30_spill] sm:$0xff] %v11668_v63  ;;  %12489 = vst [vmem:[#allocation32_spill] sm:$0xff] %v11672_v30 }
 0x390   : > { %9296 = vmatmul.mubr.msk.f32.gmra.mrb[2].mxu1 %vm3864_vm3, %v11656_v2  ;;  %v11676_v2 = vld [vmem:[#allocation3 + $0x62] sm:$0xff] }
 0x391   : > { %9298 = vmatprep.mubr.msk.f32.mxu1 %vm3864_vm3, %v11660_v40  ;;  %12490 = vst [vmem:[#allocation4_spill] sm:$0xff] %v11676_v2  ;;  %v11680_v40 = vld [vmem:[#allocation3 + $0x6a] sm:$0xff] }
 0x392   : > { %12491 = vst [vmem:[#allocation5_spill] sm:$0xff] %v11680_v40 }
 0x394   : > { %9299 = vmatmul.mubr.msk.f32.gmra.mrb[4].mxu1 %vm3864_vm3, %v11664_v5  ;;  %v11684_v5 = vld [vmem:[#allocation3 + $0x7a] sm:$0xff] }
 0x395   : > { %9301 = vmatprep.mubr.msk.f32.mxu1 %vm3864_vm3, %v11668_v63  ;;  %12492 = vst [vmem:[#allocation6_spill] sm:$0xff] %v11684_v5  ;;  %v11688_v63 = vld [vmem:[#allocation3 + $0x82] sm:$0xff] }
 0x396   : > { %12493 = vst [vmem:[#allocation7_spill] sm:$0xff] %v11688_v63 }
 0x398   : > { %9302 = vmatmul.mubr.msk.f32.gmra.mrb[6].mxu1 %vm3864_vm3, %v11672_v30  ;;  %v11692_v30 = vld [vmem:[#allocation3 + $0x92] sm:$0xff] }
 0x399   : > { %9304 = vmatprep.mubr.msk.f32.mxu1 %vm3864_vm3, %v11676_v2  ;;  %12494 = vst [vmem:[#allocation34_spill] sm:$0xff] %v11692_v30  ;;  %v11696_v2 = vld [vmem:[#allocation3 + $0x9a] sm:$0xff] }
 0x39a   : > { %12495 = vst [vmem:[#allocation35_spill] sm:$0xff] %v11696_v2 }
 0x39c   : > { %9305 = vmatmul.mubr.msk.f32.gmra.mrb[8].mxu1 %vm3864_vm3, %v11680_v40  ;;  %v11700_v40 = vld [vmem:[#allocation3 + $0xaa] sm:$0xff] }
 0x39d   : > { %9307 = vmatprep.mubr.msk.f32.mxu1 %vm3864_vm3, %v11684_v5  ;;  %12496 = vst [vmem:[#allocation10_spill] sm:$0xff] %v11700_v40  ;;  %v11704_v5 = vld [vmem:[#allocation3 + $0xb2] sm:$0xff] }
 0x39e   : > { %12497 = vst [vmem:[#allocation11_spill] sm:$0xff] %v11704_v5 }
 0x3a0   : > { %9308 = vmatmul.mubr.msk.f32.gmra.mrb[10].mxu1 %vm3864_vm3, %v11688_v63  ;;  %v11708_v63 = vld [vmem:[#allocation3 + $0xc2] sm:$0xff] }
 0x3a1   : > { %9310 = vmatprep.mubr.msk.f32.mxu1 %vm3864_vm3, %v11692_v30  ;;  %12498 = vst [vmem:[#allocation12_spill] sm:$0xff] %v11708_v63  ;;  %v11712_v30 = vld [vmem:[#allocation3 + $0xca] sm:$0xff] }
 0x3a2   : > { %12499 = vst [vmem:[#allocation13_spill] sm:$0xff] %v11712_v30 }
 0x3a4   : > { %9311 = vmatmul.mubr.msk.f32.gmra.mrb[12].mxu1 %vm3864_vm3, %v11696_v2  ;;  %v11716_v2 = vld [vmem:[#allocation3 + $0xda] sm:$0xff] }
 0x3a5   : > { %9313 = vmatprep.mubr.msk.f32.mxu1 %vm3864_vm3, %v11700_v40  ;;  %12500 = vst [vmem:[#allocation14_spill] sm:$0xff] %v11716_v2  ;;  %v11720_v40 = vld [vmem:[#allocation3 + $0xe2] sm:$0xff] }
 0x3a6   : > { %12501 = vst [vmem:[#allocation15_spill] sm:$0xff] %v11720_v40 }
 0x3a8   : > { %9314 = vmatmul.mubr.msk.f32.gmra.mrb[14].mxu1 %vm3864_vm3, %v11704_v5  ;;  %v11724_v5 = vld [vmem:[#allocation3 + $0xf2] sm:$0xff] }
 0x3a9   : > { %9316 = vmatprep.mubr.msk.f32.mxu1 %vm3864_vm3, %v11708_v63  ;;  %12502 = vst [vmem:[#allocation16_spill] sm:$0xff] %v11724_v5  ;;  %v11728_v63 = vld [vmem:[#allocation3 + $0xfa] sm:$0xff] }
 0x3aa   : > { %12503 = vst [vmem:[#allocation17_spill] sm:$0xff] %v11728_v63 }
 0x3ac   : > { %9317 = vmatmul.mubr.msk.f32.gmra.mrb[16].mxu1 %vm3864_vm3, %v11712_v30  ;;  %v11732_v30 = vld [vmem:[#allocation3 + $0x10a] sm:$0xff] }
 0x3ad   : > { %9319 = vmatprep.mubr.msk.f32.mxu1 %vm3864_vm3, %v11716_v2  ;;  %12504 = vst [vmem:[#allocation18_spill] sm:$0xff] %v11732_v30  ;;  %v11736_v2 = vld [vmem:[#allocation3 + $0x112] sm:$0xff] }
 0x3ae   : > { %12505 = vst [vmem:[#allocation19_spill] sm:$0xff] %v11736_v2 }
 0x3b0   : > { %9320 = vmatmul.mubr.msk.f32.gmra.mrb[18].mxu1 %vm3864_vm3, %v11720_v40  ;;  %v11740_v40 = vld [vmem:[#allocation3 + $0x122] sm:$0xff] }
 0x3b1   : > { %9322 = vmatprep.mubr.msk.f32.mxu1 %vm3864_vm3, %v11724_v5  ;;  %12506 = vst [vmem:[#allocation20_spill] sm:$0xff] %v11740_v40  ;;  %v11744_v5 = vld [vmem:[#allocation3 + $0x12a] sm:$0xff] }
 0x3b2   : > { %12507 = vst [vmem:[#allocation21_spill] sm:$0xff] %v11744_v5 }
 0x3b4   : > { %9323 = vmatmul.mubr.msk.f32.gmra.mrb[20].mxu1 %vm3864_vm3, %v11728_v63  ;;  %v11748_v63 = vld [vmem:[#allocation3 + $0x13a] sm:$0xff] }
 0x3b5   : > { %9325 = vmatprep.mubr.msk.f32.mxu1 %vm3864_vm3, %v11732_v30  ;;  %12508 = vst [vmem:[#allocation22_spill] sm:$0xff] %v11748_v63  ;;  %v11752_v30 = vld [vmem:[#allocation3 + $0x142] sm:$0xff] }
 0x3b8   : > { %9326 = vmatmul.mubr.msk.f32.gmra.mrb[22].mxu1 %vm3864_vm3, %v11736_v2  ;;  %v11756_v2 = vld [vmem:[#allocation3 + $0x152] sm:$0xff] }
 0x3b9   : > { %9328 = vmatprep.mubr.msk.f32.mxu1 %vm3864_vm3, %v11740_v40  ;;  %12509 = vst [vmem:[#allocation24_spill] sm:$0xff] %v11756_v2  ;;  %v11760_v40 = vld [vmem:[#allocation3 + $0x15a] sm:$0xff] }
 0x3bc   : > { %9329 = vmatmul.mubr.msk.f32.gmra.mrb[24].mxu1 %vm3864_vm3, %v11744_v5  ;;  %v11764_v5 = vld [vmem:[#allocation3 + $0x16a] sm:$0xff] }
 0x3bd   : > { %9331 = vmatprep.mubr.msk.f32.mxu1 %vm3864_vm3, %v11748_v63  ;;  %12510 = vst [vmem:[#allocation26_spill] sm:$0xff] %v11764_v5  ;;  %v11768_v63 = vld [vmem:[#allocation3 + $0x172] sm:$0xff] }
 0x3c0   : > { %9332 = vmatmul.mubr.msk.f32.gmra.mrb[26].mxu1 %vm3864_vm3, %v11752_v30 }
 0x3c1   : > { %9334 = vmatprep.mubr.msk.f32.mxu1 %vm3864_vm3, %v11756_v2  ;;  %v8009_v2 = vld [vmem:[%s12279_s3 + $0x28] sm:$0xff] }
 0x3c4   : > { %9335 = vmatmul.mubr.msk.f32.gmra.mrb[28].mxu1 %vm3864_vm3, %v11760_v40 }
 0x3c5   : > { %9337 = vmatprep.mubr.msk.f32.mxu1 %vm3864_vm3, %v11764_v5 }
 0x3c8   : > { %9338 = vmatmul.mubr.msk.f32.gmra.mrb[30].mxu1 %vm3864_vm3, %v11768_v63 }
 0x3c9   : > { %9342 = vmatprep.mubr.msk.f32.mxu1 %vm3864_vm3, %v11521_v35  ;;  %v11836_v35 = vld [vmem:[#allocation3 + $0x180] sm:$0xff] }
 0x3cc   : > { %9343 = vmatmul.mubr.msk.f32.vlgmr.msra.gmra.mrb[0].mxu1 %vm3864_vm3, %v11527_v8  ;;  %v11840_v8 = vld [vmem:[#allocation3 + $0x188] sm:$0xff] }
 0x3cd   : > { %9391 = vmatpush3.msra.mxu1 %v11647_v34  ;;  %9345 = vmatprep.mubr.msk.f32.mxu1 %vm3864_vm3, %v11531_v10  ;;  %v8042_v34 = vld [vmem:[%s12279_s3 + $0x30] sm:$0xff] }
 0x3ce   : > { %9440 = vmatprep.subr.mxu1 %v8009_v2 }
 0x3d0   : > { %9346 = vmatmul.mubr.msk.f32.gmra.mrb[2].mxu1 %vm3864_vm3, %v11535_v6 }
 0x3d1   : > { %9348 = vmatprep.mubr.msk.f32.mxu1 %vm3864_vm3, %v11539_v24 }
 0x3d4   : > { %9349 = vmatmul.mubr.msk.f32.gmra.mrb[4].mxu1 %vm3864_vm3, %v11543_v13 }
 0x3d5   : > { %9351 = vmatprep.mubr.msk.f32.mxu1 %vm3864_vm3, %v11547_v43 }
 0x3d8   : > { %9352 = vmatmul.mubr.msk.f32.gmra.mrb[6].mxu1 %vm3864_vm3, %v11551_v45 }
 0x3d9   : > { %9354 = vmatprep.mubr.msk.f32.mxu1 %vm3864_vm3, %v11555_v46 }
 0x3dc   : > { %9355 = vmatmul.mubr.msk.f32.gmra.mrb[8].mxu1 %vm3864_vm3, %v11559_v47 }
 0x3dd   : > { %9357 = vmatprep.mubr.msk.f32.mxu1 %vm3864_vm3, %v11563_v49 }
 0x3e0   : > { %9358 = vmatmul.mubr.msk.f32.gmra.mrb[10].mxu1 %vm3864_vm3, %v11567_v53 }
 0x3e1   : > { %9360 = vmatprep.mubr.msk.f32.mxu1 %vm3864_vm3, %v11571_v54 }
 0x3e4   : > { %9361 = vmatmul.mubr.msk.f32.gmra.mrb[12].mxu1 %vm3864_vm3, %v11575_v55 }
 0x3e5   : > { %9363 = vmatprep.mubr.msk.f32.mxu1 %vm3864_vm3, %v11579_v56 }
 0x3e8   : > { %9364 = vmatmul.mubr.msk.f32.gmra.mrb[14].mxu1 %vm3864_vm3, %v11583_v57 }
 0x3e9   : > { %9366 = vmatprep.mubr.msk.f32.mxu1 %vm3864_vm3, %v11587_v61 }
 0x3ec   : > { %9367 = vmatmul.mubr.msk.f32.gmra.mrb[16].mxu1 %vm3864_vm3, %v11591_v15 }
 0x3ed   : > { %9369 = vmatprep.mubr.msk.f32.mxu1 %vm3864_vm3, %v11595_v16 }
 0x3f0   : > { %9370 = vmatmul.mubr.msk.f32.gmra.mrb[18].mxu1 %vm3864_vm3, %v11599_v17 }
 0x3f1   : > { %9372 = vmatprep.mubr.msk.f32.mxu1 %vm3864_vm3, %v11603_v19 }
 0x3f4   : > { %9373 = vmatmul.mubr.msk.f32.gmra.mrb[20].mxu1 %vm3864_vm3, %v11607_v0 }
 0x3f5   : > { %9375 = vmatprep.mubr.msk.f32.mxu1 %vm3864_vm3, %v11611_v20 }
 0x3f8   : > { %9376 = vmatmul.mubr.msk.f32.gmra.mrb[22].mxu1 %vm3864_vm3, %v11615_v22 }
 0x3f9   : > { %9378 = vmatprep.mubr.msk.f32.mxu1 %vm3864_vm3, %v11619_v26 }
 0x3fc   : > { %9379 = vmatmul.mubr.msk.f32.gmra.mrb[24].mxu1 %vm3864_vm3, %v11623_v31 }
 0x3fd   : > { %9381 = vmatprep.mubr.msk.f32.mxu1 %vm3864_vm3, %v11627_v32 }
 0x400   : > { %9382 = vmatmul.mubr.msk.f32.gmra.mrb[26].mxu1 %vm3864_vm3, %v11631_v37 }
 0x401   : > { %9384 = vmatprep.mubr.msk.f32.mxu1 %vm3864_vm3, %v11635_v39 }
 0x404   : > { %9385 = vmatmul.mubr.msk.f32.gmra.mrb[28].mxu1 %vm3864_vm3, %v11639_v41 }
 0x405   : > { %9387 = vmatprep.mubr.msk.f32.mxu1 %vm3864_vm3, %v11836_v35 }
 0x408   : > { %9388 = vmatmul.mubr.msk.f32.gmra.mrb[30].mxu1 %vm3864_vm3, %v11840_v8 }
 0x409   : > { %9392 = vmatprep.mubr.msk.f32.mxu1 %vm3864_vm3, %v11342_v29  ;;  %v12511_v29 = vld [vmem:[#allocation8_spill] sm:$0xff] }
 0x40c   : > { %9393 = vmatmul.mubr.msk.f32.vlgmr.msra.gmra.mrb[0].mxu1 %vm3864_vm3, %v11348_v9  ;;  %v12512_v9 = vld [vmem:[#allocation9_spill] sm:$0xff] }
 0x40d   : > { %9441 = vmatpush3.msra.mxu1 %v8009_v2  ;;  %9395 = vmatprep.mubr.msk.f32.mxu1 %vm3864_vm3, %v11354_v36  ;;  %v11907_v36 = vld [vmem:[#allocation3 + $0x181] sm:$0xff]  ;;  %v12520_v2 = vld [vmem:[#allocation5_spill] sm:$0xff] }
 0x40e   : > { %9490 = vmatprep.subr.mxu1 %v8042_v34 }
 0x410   : > { %9396 = vmatmul.mubr.msk.f32.gmra.mrb[2].mxu1 %vm3864_vm3, %v11360_v44  ;;  %v11911_v44 = vld [vmem:[#allocation3 + $0x189] sm:$0xff] }
 0x411   : > { %9398 = vmatprep.mubr.msk.f32.mxu1 %vm3864_vm3, %v11366_v50  ;;  %v12513_v50 = vld [vmem:[#allocation23_spill] sm:$0xff] }
 0x414   : > { %9399 = vmatmul.mubr.msk.f32.gmra.mrb[4].mxu1 %vm3864_vm3, %v11372_v52  ;;  %v8075_v52 = vld [vmem:[%s12279_s3 + $0x38] sm:$0xff] }
 0x415   : > { %9401 = vmatprep.mubr.msk.f32.mxu1 %vm3864_vm3, %v11378_v58  ;;  %v12514_v58 = vld [vmem:[#allocation25_spill] sm:$0xff] }
 0x418   : > { %9402 = vmatmul.mubr.msk.f32.gmra.mrb[6].mxu1 %vm3864_vm3, %v11384_v60  ;;  %v12515_v60 = vld [vmem:[#allocation27_spill] sm:$0xff] }
 0x419   : > { %9404 = vmatprep.mubr.msk.f32.mxu1 %vm3864_vm3, %v11390_v18  ;;  %v12516_v18 = vld [vmem:[#allocation28_spill] sm:$0xff] }
 0x41c   : > { %9405 = vmatmul.mubr.msk.f32.gmra.mrb[8].mxu1 %vm3864_vm3, %v11396_v1  ;;  %v12517_v1 = vld [vmem:[#allocation30_spill] sm:$0xff] }
 0x41d   : > { %9407 = vmatprep.mubr.msk.f32.mxu1 %vm3864_vm3, %v11402_v23  ;;  %v12518_v23 = vld [vmem:[#allocation32_spill] sm:$0xff] }
 0x420   : > { %9408 = vmatmul.mubr.msk.f32.gmra.mrb[10].mxu1 %vm3864_vm3, %v11408_v27  ;;  %v12519_v27 = vld [vmem:[#allocation4_spill] sm:$0xff] }
 0x421   : > { %9410 = vmatprep.mubr.msk.f32.mxu1 %vm3864_vm3, %v11414_v42 }
 0x424   : > { %9411 = vmatmul.mubr.msk.f32.gmra.mrb[12].mxu1 %vm3864_vm3, %v11420_v4 }
 0x425   : > { %9413 = vmatprep.mubr.msk.f32.mxu1 %vm3864_vm3, %v11426_v28 }
 0x428   : > { %9414 = vmatmul.mubr.msk.f32.gmra.mrb[14].mxu1 %vm3864_vm3, %v11432_v33 }
 0x429   : > { %9416 = vmatprep.mubr.msk.f32.mxu1 %vm3864_vm3, %v11438_v11 }
 0x42c   : > { %9417 = vmatmul.mubr.msk.f32.gmra.mrb[16].mxu1 %vm3864_vm3, %v11444_v12 }
 0x42d   : > { %9419 = vmatprep.mubr.msk.f32.mxu1 %vm3864_vm3, %v11450_v48 }
 0x430   : > { %9420 = vmatmul.mubr.msk.f32.gmra.mrb[18].mxu1 %vm3864_vm3, %v11456_v51 }
 0x431   : > { %9422 = vmatprep.mubr.msk.f32.mxu1 %vm3864_vm3, %v11462_v59 }
 0x434   : > { %9423 = vmatmul.mubr.msk.f32.gmra.mrb[20].mxu1 %vm3864_vm3, %v11468_v14 }
 0x435   : > { %9425 = vmatprep.mubr.msk.f32.mxu1 %vm3864_vm3, %v11474_v62 }
 0x438   : > { %9426 = vmatmul.mubr.msk.f32.gmra.mrb[22].mxu1 %vm3864_vm3, %v11480_v21 }
 0x439   : > { %9428 = vmatprep.mubr.msk.f32.mxu1 %vm3864_vm3, %v11486_v38 }
 0x43c   : > { %9429 = vmatmul.mubr.msk.f32.gmra.mrb[24].mxu1 %vm3864_vm3, %v11492_v3 }
 0x43d   : > { %9431 = vmatprep.mubr.msk.f32.mxu1 %vm3864_vm3, %v11497_v7 }
 0x440   : > { %9432 = vmatmul.mubr.msk.f32.gmra.mrb[26].mxu1 %vm3864_vm3, %v11502_v25 }
 0x441   : > { %9434 = vmatprep.mubr.msk.f32.mxu1 %vm3864_vm3, %v12511_v29 }
 0x444   : > { %9435 = vmatmul.mubr.msk.f32.gmra.mrb[28].mxu1 %vm3864_vm3, %v12512_v9 }
 0x445   : > { %9437 = vmatprep.mubr.msk.f32.mxu1 %vm3864_vm3, %v11907_v36 }
 0x448   : > { %9438 = vmatmul.mubr.msk.f32.gmra.mrb[30].mxu1 %vm3864_vm3, %v11911_v44 }
 0x449   : > { %9442 = vmatprep.mubr.msk.f32.mxu1 %vm3864_vm3, %v12513_v50  ;;  %v12522_v50 = vld [vmem:[#allocation7_spill] sm:$0xff] }
 0x44c   : > { %9443 = vmatmul.mubr.msk.f32.vlgmr.msra.gmra.mrb[0].mxu1 %vm3864_vm3, %v12514_v58  ;;  %v12523_v58 = vld [vmem:[#allocation34_spill] sm:$0xff] }
 0x44d   : > { %9491 = vmatpush3.msra.mxu1 %v8042_v34  ;;  %9445 = vmatprep.mubr.msk.f32.mxu1 %vm3864_vm3, %v12515_v60  ;;  %v12521_v34 = vld [vmem:[#allocation6_spill] sm:$0xff] }
 0x44e   : > { %9540 = vmatprep.subr.mxu1 %v8075_v52 }
 0x450   : > { %9446 = vmatmul.mubr.msk.f32.gmra.mrb[2].mxu1 %vm3864_vm3, %v12516_v18  ;;  %v12524_v18 = vld [vmem:[#allocation35_spill] sm:$0xff] }
 0x451   : > { %9448 = vmatprep.mubr.msk.f32.mxu1 %vm3864_vm3, %v12517_v1  ;;  %v12525_v1 = vld [vmem:[#allocation10_spill] sm:$0xff] }
 0x454   : > { %9449 = vmatmul.mubr.msk.f32.gmra.mrb[4].mxu1 %vm3864_vm3, %v12518_v23  ;;  %v12526_v23 = vld [vmem:[#allocation11_spill] sm:$0xff] }
 0x455   : > { %9451 = vmatprep.mubr.msk.f32.mxu1 %vm3864_vm3, %v12519_v27  ;;  %v12527_v27 = vld [vmem:[#allocation12_spill] sm:$0xff] }
 0x458   : > { %9452 = vmatmul.mubr.msk.f32.gmra.mrb[6].mxu1 %vm3864_vm3, %v12520_v2  ;;  %v12528_v2 = vld [vmem:[#allocation13_spill] sm:$0xff] }
 0x459   : > { %9454 = vmatprep.mubr.msk.f32.mxu1 %vm3864_vm3, %v12521_v34  ;;  %v12529_v34 = vld [vmem:[#allocation14_spill] sm:$0xff] }
 0x45c   : > { %9455 = vmatmul.mubr.msk.f32.gmra.mrb[8].mxu1 %vm3864_vm3, %v12522_v50  ;;  %v12530_v50 = vld [vmem:[#allocation15_spill] sm:$0xff] }
 0x45d   : > { %9457 = vmatprep.mubr.msk.f32.mxu1 %vm3864_vm3, %v12523_v58  ;;  %v12531_v58 = vld [vmem:[#allocation16_spill] sm:$0xff] }
 0x460   : > { %9458 = vmatmul.mubr.msk.f32.gmra.mrb[10].mxu1 %vm3864_vm3, %v12524_v18  ;;  %v12532_v18 = vld [vmem:[#allocation17_spill] sm:$0xff] }
 0x461   : > { %9460 = vmatprep.mubr.msk.f32.mxu1 %vm3864_vm3, %v12525_v1  ;;  %v12533_v1 = vld [vmem:[#allocation18_spill] sm:$0xff] }
 0x464   : > { %9461 = vmatmul.mubr.msk.f32.gmra.mrb[12].mxu1 %vm3864_vm3, %v12526_v23  ;;  %v12534_v23 = vld [vmem:[#allocation19_spill] sm:$0xff] }
 0x465   : > { %9463 = vmatprep.mubr.msk.f32.mxu1 %vm3864_vm3, %v12527_v27  ;;  %v12535_v27 = vld [vmem:[#allocation20_spill] sm:$0xff] }
 0x468   : > { %9464 = vmatmul.mubr.msk.f32.gmra.mrb[14].mxu1 %vm3864_vm3, %v12528_v2  ;;  %v12536_v2 = vld [vmem:[#allocation21_spill] sm:$0xff] }
 0x469   : > { %9466 = vmatprep.mubr.msk.f32.mxu1 %vm3864_vm3, %v12529_v34  ;;  %v12537_v34 = vld [vmem:[#allocation22_spill] sm:$0xff] }
 0x46c   : > { %9467 = vmatmul.mubr.msk.f32.gmra.mrb[16].mxu1 %vm3864_vm3, %v12530_v50 }
 0x46d   : > { %9469 = vmatprep.mubr.msk.f32.mxu1 %vm3864_vm3, %v12531_v58  ;;  %v12538_v58 = vld [vmem:[#allocation24_spill] sm:$0xff] }
 0x470   : > { %9470 = vmatmul.mubr.msk.f32.gmra.mrb[18].mxu1 %vm3864_vm3, %v12532_v18 }
 0x471   : > { %9472 = vmatprep.mubr.msk.f32.mxu1 %vm3864_vm3, %v12533_v1 }
 0x474   : > { %9473 = vmatmul.mubr.msk.f32.gmra.mrb[20].mxu1 %vm3864_vm3, %v12534_v23 }
 0x475   : > { %9475 = vmatprep.mubr.msk.f32.mxu1 %vm3864_vm3, %v12535_v27  ;;  %v11978_v27 = vld [vmem:[#allocation3 + $0x182] sm:$0xff] }
 0x478   : > { %9476 = vmatmul.mubr.msk.f32.gmra.mrb[22].mxu1 %vm3864_vm3, %v12536_v2 }
 0x479   : > { %9478 = vmatprep.mubr.msk.f32.mxu1 %vm3864_vm3, %v12537_v34  ;;  %v11982_v34 = vld [vmem:[#allocation3 + $0x18a] sm:$0xff] }
 0x47c   : > { %9479 = vmatmul.mubr.msk.f32.gmra.mrb[24].mxu1 %vm3864_vm3, %v11752_v30 }
 0x47d   : > { %9481 = vmatprep.mubr.msk.f32.mxu1 %vm3864_vm3, %v12538_v58 }
 0x480   : > { %9482 = vmatmul.mubr.msk.f32.gmra.mrb[26].mxu1 %vm3864_vm3, %v11760_v40 }
 0x481   : > { %9484 = vmatprep.mubr.msk.f32.mxu1 %vm3864_vm3, %v11764_v5  ;;  %v8108_v5 = vld [vmem:[%s12279_s3 + $0x40] sm:$0xff] }
 0x484   : > { %9485 = vmatmul.mubr.msk.f32.gmra.mrb[28].mxu1 %vm3864_vm3, %v11768_v63 }
 0x485   : > { %9487 = vmatprep.mubr.msk.f32.mxu1 %vm3864_vm3, %v11978_v27 }
 0x488   : > { %9488 = vmatmul.mubr.msk.f32.gmra.mrb[30].mxu1 %vm3864_vm3, %v11982_v34 }
 0x489   : > { %9492 = vmatprep.mubr.msk.f32.mxu1 %vm3864_vm3, %v11531_v10  ;;  %v6241_v10 = vld [vmem:[#allocation3 + $0x198] sm:$0xff] }
 0x48c   : > { %9493 = vmatmul.mubr.msk.f32.vlgmr.msra.gmra.mrb[0].mxu1 %vm3864_vm3, %v11535_v6  ;;  %v6242_v6 = vld [vmem:[#allocation3 + $0x1a0] sm:$0xff] }
 0x48d   : > { %9541 = vmatpush3.msra.mxu1 %v8075_v52  ;;  %9495 = vmatprep.mubr.msk.f32.mxu1 %vm3864_vm3, %v11539_v24  ;;  %v6598_v24 = vld [vmem:[#allocation3 + $0x31] sm:$0xff] }
 0x48e   : > { %9590 = vmatprep.subr.mxu1 %v8108_v5 }
 0x490   : > { %9496 = vmatmul.mubr.msk.f32.gmra.mrb[2].mxu1 %vm3864_vm3, %v11543_v13  ;;  %v6599_v13 = vld [vmem:[#allocation3 + $0x39] sm:$0xff] }
 0x491   : > { %9498 = vmatprep.mubr.msk.f32.mxu1 %vm3864_vm3, %v11547_v43  ;;  %v6600_v43 = vld [vmem:[#allocation3 + $0x49] sm:$0xff] }
 0x494   : > { %9499 = vmatmul.mubr.msk.f32.gmra.mrb[4].mxu1 %vm3864_vm3, %v11551_v45  ;;  %v6601_v45 = vld [vmem:[#allocation3 + $0x51] sm:$0xff] }
 0x495   : > { %9501 = vmatprep.mubr.msk.f32.mxu1 %vm3864_vm3, %v11555_v46  ;;  %v6602_v46 = vld [vmem:[#allocation3 + $0x61] sm:$0xff] }
 0x498   : > { %9502 = vmatmul.mubr.msk.f32.gmra.mrb[6].mxu1 %vm3864_vm3, %v11559_v47  ;;  %v6603_v47 = vld [vmem:[#allocation3 + $0x69] sm:$0xff] }
 0x499   : > { %9504 = vmatprep.mubr.msk.f32.mxu1 %vm3864_vm3, %v11563_v49  ;;  %v6604_v49 = vld [vmem:[#allocation3 + $0x79] sm:$0xff] }
 0x49c   : > { %9505 = vmatmul.mubr.msk.f32.gmra.mrb[8].mxu1 %vm3864_vm3, %v11567_v53  ;;  %v6605_v53 = vld [vmem:[#allocation3 + $0x81] sm:$0xff] }
 0x49d   : > { %9507 = vmatprep.mubr.msk.f32.mxu1 %vm3864_vm3, %v11571_v54  ;;  %v6606_v54 = vld [vmem:[#allocation3 + $0x91] sm:$0xff] }
 0x4a0   : > { %9508 = vmatmul.mubr.msk.f32.gmra.mrb[10].mxu1 %vm3864_vm3, %v11575_v55  ;;  %v6607_v55 = vld [vmem:[#allocation3 + $0x99] sm:$0xff] }
 0x4a1   : > { %9510 = vmatprep.mubr.msk.f32.mxu1 %vm3864_vm3, %v11579_v56  ;;  %v12553_v56 = vld [vmem:[#allocation16_spill] sm:$0xff] }
 0x4a4   : > { %9511 = vmatmul.mubr.msk.f32.gmra.mrb[12].mxu1 %vm3864_vm3, %v11583_v57  ;;  %v12554_v57 = vld [vmem:[#allocation20_spill] sm:$0xff] }
 0x4a5   : > { %9513 = vmatprep.mubr.msk.f32.mxu1 %vm3864_vm3, %v11587_v61  ;;  %v12555_v61 = vld [vmem:[#allocation22_spill] sm:$0xff] }
 0x4a8   : > { %9514 = vmatmul.mubr.msk.f32.gmra.mrb[14].mxu1 %vm3864_vm3, %v11591_v15  ;;  %v12556_v15 = vld [vmem:[#allocation26_spill] sm:$0xff] }
 0x4a9   : > { %9516 = vmatprep.mubr.msk.f32.mxu1 %vm3864_vm3, %v11595_v16  ;;  %v7015_v16 = vld [vmem:[#allocation3 + $0x19a] sm:$0xff] }
 0x4ac   : > { %9517 = vmatmul.mubr.msk.f32.gmra.mrb[16].mxu1 %vm3864_vm3, %v11599_v17  ;;  %v12168_v17 = vld [vmem:[%s12280_s4] ss:$0 sm:$0xff] }
 0x4ad   : > { %9519 = vmatprep.mubr.msk.f32.mxu1 %vm3864_vm3, %v11603_v19 }
 0x4b0   : > { %9520 = vmatmul.mubr.msk.f32.gmra.mrb[18].mxu1 %vm3864_vm3, %v11607_v0 }
 0x4b1   : > { %9522 = vmatprep.mubr.msk.f32.mxu1 %vm3864_vm3, %v11611_v20 }
 0x4b4   : > { %9523 = vmatmul.mubr.msk.f32.gmra.mrb[20].mxu1 %vm3864_vm3, %v11615_v22 }
 0x4b5   : > { %9525 = vmatprep.mubr.msk.f32.mxu1 %vm3864_vm3, %v11619_v26 }
 0x4b8   : > { %9526 = vmatmul.mubr.msk.f32.gmra.mrb[22].mxu1 %vm3864_vm3, %v11623_v31 }
 0x4b9   : > { %9528 = vmatprep.mubr.msk.f32.mxu1 %vm3864_vm3, %v11627_v32 }
 0x4bc   : > { %9529 = vmatmul.mubr.msk.f32.gmra.mrb[24].mxu1 %vm3864_vm3, %v11631_v37 }
 0x4bd   : > { %9531 = vmatprep.mubr.msk.f32.mxu1 %vm3864_vm3, %v11635_v39 }
 0x4c0   : > { %9532 = vmatmul.mubr.msk.f32.gmra.mrb[26].mxu1 %vm3864_vm3, %v11639_v41 }
 0x4c1   : > { %9534 = vmatprep.mubr.msk.f32.mxu1 %vm3864_vm3, %v11836_v35 }
 0x4c4   : > { %9535 = vmatmul.mubr.msk.f32.gmra.mrb[28].mxu1 %vm3864_vm3, %v11840_v8 }
 0x4c5   : > { %9537 = vmatprep.mubr.msk.f32.mxu1 %vm3864_vm3, %v6241_v10 }
 0x4c8   : > { %9538 = vmatmul.mubr.msk.f32.gmra.mrb[30].mxu1 %vm3864_vm3, %v6242_v6 }
 0x4c9   : > { %9542 = vmatprep.mubr.msk.f32.mxu1 %vm3864_vm3, %v6598_v24 }
 0x4cc   : > { %9543 = vmatmul.mubr.msk.f32.vlgmr.msra.gmra.mrb[0].mxu1 %vm3864_vm3, %v6599_v13 }
 0x4cd   : > { %9591 = vmatpush3.msra.mxu1 %v8108_v5  ;;  %9545 = vmatprep.mubr.msk.f32.mxu1 %vm3864_vm3, %v6600_v43 }
 0x4d0   : > { %9546 = vmatmul.mubr.msk.f32.gmra.mrb[2].mxu1 %vm3864_vm3, %v6601_v45 }
 0x4d1   : > { %9548 = vmatprep.mubr.msk.f32.mxu1 %vm3864_vm3, %v6602_v46 }
 0x4d4   : > { %9549 = vmatmul.mubr.msk.f32.gmra.mrb[4].mxu1 %vm3864_vm3, %v6603_v47 }
 0x4d5   : > { %9551 = vmatprep.mubr.msk.f32.mxu1 %vm3864_vm3, %v6604_v49 }
 0x4d8   : > { %9552 = vmatmul.mubr.msk.f32.gmra.mrb[6].mxu1 %vm3864_vm3, %v6605_v53 }
 0x4d9   : > { %9554 = vmatprep.mubr.msk.f32.mxu1 %vm3864_vm3, %v6606_v54 }
 0x4dc   : > { %9555 = vmatmul.mubr.msk.f32.gmra.mrb[8].mxu1 %vm3864_vm3, %v6607_v55 }
 0x4dd   : > { %9557 = vmatprep.mubr.msk.f32.mxu1 %vm3864_vm3, %v11414_v42  ;;  %v6628_v42 = vld [vmem:[#allocation3 + $0x199] sm:$0xff] }
 0x4e0   : > { %9558 = vmatmul.mubr.msk.f32.gmra.mrb[10].mxu1 %vm3864_vm3, %v11420_v4  ;;  %v6629_v4 = vld [vmem:[#allocation3 + $0x1a1] sm:$0xff] }
 0x4e1   : > { %9560 = vmatprep.mubr.msk.f32.mxu1 %vm3864_vm3, %v11426_v28  ;;  %v12539_v28 = vld [vmem:[#allocation28_spill] sm:$0xff] }
 0x4e4   : > { %9561 = vmatmul.mubr.msk.f32.gmra.mrb[12].mxu1 %vm3864_vm3, %v11432_v33  ;;  %v12540_v33 = vld [vmem:[#allocation30_spill] sm:$0xff] }
 0x4e5   : > { %9563 = vmatprep.mubr.msk.f32.mxu1 %vm3864_vm3, %v11438_v11  ;;  %v12541_v11 = vld [vmem:[#allocation32_spill] sm:$0xff] }
 0x4e8   : > { %9564 = vmatmul.mubr.msk.f32.gmra.mrb[14].mxu1 %vm3864_vm3, %v11444_v12  ;;  %v12542_v12 = vld [vmem:[#allocation4_spill] sm:$0xff] }
 0x4e9   : > { %9566 = vmatprep.mubr.msk.f32.mxu1 %vm3864_vm3, %v11450_v48  ;;  %v12543_v48 = vld [vmem:[#allocation5_spill] sm:$0xff] }
 0x4ec   : > { %9567 = vmatmul.mubr.msk.f32.gmra.mrb[16].mxu1 %vm3864_vm3, %v11456_v51  ;;  %v12544_v51 = vld [vmem:[#allocation6_spill] sm:$0xff] }
 0x4ed   : > { %9569 = vmatprep.mubr.msk.f32.mxu1 %vm3864_vm3, %v11462_v59  ;;  %v12545_v59 = vld [vmem:[#allocation7_spill] sm:$0xff] }
 0x4f0   : > { %9570 = vmatmul.mubr.msk.f32.gmra.mrb[18].mxu1 %vm3864_vm3, %v11468_v14  ;;  %v12546_v14 = vld [vmem:[#allocation34_spill] sm:$0xff] }
 0x4f1   : > { %9572 = vmatprep.mubr.msk.f32.mxu1 %vm3864_vm3, %v11474_v62  ;;  %v12547_v62 = vld [vmem:[#allocation35_spill] sm:$0xff] }
 0x4f4   : > { %9573 = vmatmul.mubr.msk.f32.gmra.mrb[20].mxu1 %vm3864_vm3, %v11480_v21  ;;  %v12548_v21 = vld [vmem:[#allocation10_spill] sm:$0xff] }
 0x4f5   : > { %9575 = vmatprep.mubr.msk.f32.mxu1 %vm3864_vm3, %v11486_v38  ;;  %v12549_v38 = vld [vmem:[#allocation11_spill] sm:$0xff] }
 0x4f8   : > { %9576 = vmatmul.mubr.msk.f32.gmra.mrb[22].mxu1 %vm3864_vm3, %v11492_v3  ;;  %v12550_v3 = vld [vmem:[#allocation12_spill] sm:$0xff] }
 0x4f9   : > { %9578 = vmatprep.mubr.msk.f32.mxu1 %vm3864_vm3, %v11497_v7  ;;  %v12551_v7 = vld [vmem:[#allocation13_spill] sm:$0xff] }
 0x4fc   : > { %9579 = vmatmul.mubr.msk.f32.gmra.mrb[24].mxu1 %vm3864_vm3, %v11502_v25  ;;  %v12552_v25 = vld [vmem:[#allocation14_spill] sm:$0xff] }
 0x4fd   : > { %9581 = vmatprep.mubr.msk.f32.mxu1 %vm3864_vm3, %v12511_v29 }
 0x500   : > { %9582 = vmatmul.mubr.msk.f32.gmra.mrb[26].mxu1 %vm3864_vm3, %v12512_v9 }
 0x501   : > { %9584 = vmatprep.mubr.msk.f32.mxu1 %vm3864_vm3, %v11907_v36 }
 0x504   : > { %9585 = vmatmul.mubr.msk.f32.gmra.mrb[28].mxu1 %vm3864_vm3, %v11911_v44 }
 0x505   : > { %9587 = vmatprep.mubr.msk.f32.mxu1 %vm3864_vm3, %v6628_v42 }
 0x508   : > { %9588 = vmatmul.mubr.msk.f32.gmra.mrb[30].mxu1 %vm3864_vm3, %v6629_v4 }
 0x509   : > { %9592 = vmatprep.mubr.msk.f32.mxu1 %vm3864_vm3, %v12515_v60 }
 0x50c   : > { %9593 = vmatmul.mubr.msk.f32.vlgmr.msra.gmra.mrb[0].mxu1 %vm3864_vm3, %v12539_v28 }
 0x50d   : > { %9595 = vmatprep.mubr.msk.f32.mxu1 %vm3864_vm3, %v12540_v33 }
 0x510   : > { %9596 = vmatmul.mubr.msk.f32.gmra.mrb[2].mxu1 %vm3864_vm3, %v12541_v11 }
 0x511   : > { %9598 = vmatprep.mubr.msk.f32.mxu1 %vm3864_vm3, %v12542_v12 }
 0x514   : > { %9599 = vmatmul.mubr.msk.f32.gmra.mrb[4].mxu1 %vm3864_vm3, %v12543_v48 }
 0x515   : > { %9601 = vmatprep.mubr.msk.f32.mxu1 %vm3864_vm3, %v12544_v51 }
 0x518   : > { %9602 = vmatmul.mubr.msk.f32.gmra.mrb[6].mxu1 %vm3864_vm3, %v12545_v59 }
 0x519   : > { %9604 = vmatprep.mubr.msk.f32.mxu1 %vm3864_vm3, %v12546_v14 }
 0x51c   : > { %9605 = vmatmul.mubr.msk.f32.gmra.mrb[8].mxu1 %vm3864_vm3, %v12547_v62 }
 0x51d   : > { %9607 = vmatprep.mubr.msk.f32.mxu1 %vm3864_vm3, %v12548_v21 }
 0x520   : > { %9608 = vmatmul.mubr.msk.f32.gmra.mrb[10].mxu1 %vm3864_vm3, %v12549_v38 }
 0x521   : > { %9610 = vmatprep.mubr.msk.f32.mxu1 %vm3864_vm3, %v12550_v3 }
 0x524   : > { %9611 = vmatmul.mubr.msk.f32.gmra.mrb[12].mxu1 %vm3864_vm3, %v12551_v7 }
 0x525   : > { %9613 = vmatprep.mubr.msk.f32.mxu1 %vm3864_vm3, %v12552_v25 }
 0x528   : > { %9614 = vmatmul.mubr.msk.f32.gmra.mrb[14].mxu1 %vm3864_vm3, %v12530_v50 }
 0x529   : > { %9616 = vmatprep.mubr.msk.f32.mxu1 %vm3864_vm3, %v12553_v56 }
 0x52c   : > { %9617 = vmatmul.mubr.msk.f32.gmra.mrb[16].mxu1 %vm3864_vm3, %v12532_v18 }
 0x52d   : > { %9619 = vmatprep.mubr.msk.f32.mxu1 %vm3864_vm3, %v12533_v1 }
 0x530   : > { %9620 = vmatmul.mubr.msk.f32.gmra.mrb[18].mxu1 %vm3864_vm3, %v12534_v23 }
 0x531   : > { %9622 = vmatprep.mubr.msk.f32.mxu1 %vm3864_vm3, %v12554_v57 }
 0x534   : > { %9623 = vmatmul.mubr.msk.f32.gmra.mrb[20].mxu1 %vm3864_vm3, %v12536_v2 }
 0x535   : > { %9625 = vmatprep.mubr.msk.f32.mxu1 %vm3864_vm3, %v12555_v61 }
 0x538   : > { %9626 = vmatmul.mubr.msk.f32.gmra.mrb[22].mxu1 %vm3864_vm3, %v11752_v30  ;;  %v7016_v30 = vld [vmem:[#allocation3 + $0x1a2] sm:$0xff] }
 0x539   : > { %9628 = vmatprep.mubr.msk.f32.mxu1 %vm3864_vm3, %v12538_v58 }
 0x53c   : > { %9629 = vmatmul.mubr.msk.f32.gmra.mrb[24].mxu1 %vm3864_vm3, %v11760_v40 }
 0x53d   : > { %9631 = vmatprep.mubr.msk.f32.mxu1 %vm3864_vm3, %v12556_v15 }
 0x540   : > { %9632 = vmatmul.mubr.msk.f32.gmra.mrb[26].mxu1 %vm3864_vm3, %v11768_v63 }
 0x541   : > { %9634 = vmatprep.mubr.msk.f32.mxu1 %vm3864_vm3, %v11978_v27 }
 0x544   : > { %9635 = vmatmul.mubr.msk.f32.gmra.mrb[28].mxu1 %vm3864_vm3, %v11982_v34 }
 0x545   : > { %9637 = vmatprep.mubr.msk.f32.mxu1 %vm3864_vm3, %v7015_v16 }
 0x548   : > { %9638 = vmatmul.mubr.msk.f32.gmra.mrb[30].mxu1 %vm3864_vm3, %v7016_v30 }
 0x5df   : > { %v9594_v19 = vpop.f32.mrb[0].mxu1 }
 0x5e0   : > { %v7380_v0 = vadd.f32 %v9594_v19, %v12168_v17  ;;  %v7181_v20 = vpop.f32.mrb[1].mxu1 }
 0x5e1   : > { %v7379_v22 = vadd.f32 %v12168_v17, %v7181_v20 }
 0x5e2   : > { %v7412_v26 = vmax.f32 %v7380_v0, 0.0 }
 0x5e3   : > { %v7411_v31 = vmax.f32 %v7379_v22, 0.0  ;;  %v9597_v32 = vpop.f32.mrb[2].mxu1 }
 0x5e4   : > { %7444 = vst.msk [vmem:[%s12176_s21 + $0x8] sm:$0xff] %vm3864_vm3, %v7412_v26  ;;  %v7382_v37 = vadd.f32 %v9597_v32, %v12168_v17  ;;  %v7191_v39 = vpop.f32.mrb[3].mxu1 }
 0x5e5   : > { %7443 = vst.msk [vmem:[%s12176_s21] sm:$0xff] %vm3864_vm3, %v7411_v31  ;;  %v7381_v41 = vadd.f32 %v12168_v17, %v7191_v39 }
 0x5e6   : > { %v7414_v40 = vmax.f32 %v7382_v37, 0.0 }
 0x5e7   : > { %v7413_v5 = vmax.f32 %v7381_v41, 0.0  ;;  %v9600_v63 = vpop.f32.mrb[4].mxu1 }
 0x5e8   : > { %7446 = vst.msk [vmem:[%s12176_s21 + $0x18] sm:$0xff] %vm3864_vm3, %v7414_v40  ;;  %v7384_v35 = vadd.f32 %v9600_v63, %v12168_v17  ;;  %v7201_v8 = vpop.f32.mrb[5].mxu1 }
 0x5e9   : > { %7445 = vst.msk [vmem:[%s12176_s21 + $0x10] sm:$0xff] %vm3864_vm3, %v7413_v5  ;;  %v7383_v29 = vadd.f32 %v12168_v17, %v7201_v8 }
 0x5ea   : > { %v7416_v9 = vmax.f32 %v7384_v35, 0.0 }
 0x5eb   : > { %v7415_v36 = vmax.f32 %v7383_v29, 0.0  ;;  %v9603_v44 = vpop.f32.mrb[6].mxu1 }
 0x5ec   : > { %7448 = vst.msk [vmem:[%s12176_s21 + $0x28] sm:$0xff] %vm3864_vm3, %v7416_v9  ;;  %v7386_v52 = vadd.f32 %v9603_v44, %v12168_v17  ;;  %v7211_v60 = vpop.f32.mrb[7].mxu1 }
 0x5ed   : > { %7447 = vst.msk [vmem:[%s12176_s21 + $0x20] sm:$0xff] %vm3864_vm3, %v7415_v36  ;;  %v7385_v18 = vadd.f32 %v12168_v17, %v7211_v60 }
 0x5ee   : > { %v7418_v1 = vmax.f32 %v7386_v52, 0.0 }
 0x5ef   : > { %v7417_v23 = vmax.f32 %v7385_v18, 0.0  ;;  %v9606_v27 = vpop.f32.mrb[8].mxu1 }
 0x5f0   : > { %7450 = vst.msk [vmem:[%s12176_s21 + $0x38] sm:$0xff] %vm3864_vm3, %v7418_v1  ;;  %v7388_v2 = vadd.f32 %v9606_v27, %v12168_v17  ;;  %v7221_v34 = vpop.f32.mrb[9].mxu1 }
 0x5f1   : > { %7449 = vst.msk [vmem:[%s12176_s21 + $0x30] sm:$0xff] %vm3864_vm3, %v7417_v23  ;;  %v7387_v50 = vadd.f32 %v12168_v17, %v7221_v34 }
 0x5f2   : > { %v7420_v58 = vmax.f32 %v7388_v2, 0.0 }
 0x5f3   : > { %v7419_v10 = vmax.f32 %v7387_v50, 0.0  ;;  %v9609_v6 = vpop.f32.mrb[10].mxu1 }
 0x5f4   : > { %7452 = vst.msk [vmem:[%s12176_s21 + $0x48] sm:$0xff] %vm3864_vm3, %v7420_v58  ;;  %v7390_v24 = vadd.f32 %v9609_v6, %v12168_v17  ;;  %v7231_v13 = vpop.f32.mrb[11].mxu1 }
 0x5f5   : > { %7451 = vst.msk [vmem:[%s12176_s21 + $0x40] sm:$0xff] %vm3864_vm3, %v7419_v10  ;;  %v7389_v43 = vadd.f32 %v12168_v17, %v7231_v13 }
 0x5f6   : > { %v7422_v45 = vmax.f32 %v7390_v24, 0.0 }
 0x5f7   : > { %v7421_v46 = vmax.f32 %v7389_v43, 0.0  ;;  %v9612_v47 = vpop.f32.mrb[12].mxu1 }
 0x5f8   : > { %7454 = vst.msk [vmem:[%s12176_s21 + $0x58] sm:$0xff] %vm3864_vm3, %v7422_v45  ;;  %v7392_v49 = vadd.f32 %v9612_v47, %v12168_v17  ;;  %v7241_v53 = vpop.f32.mrb[13].mxu1 }
 0x5f9   : > { %7453 = vst.msk [vmem:[%s12176_s21 + $0x50] sm:$0xff] %vm3864_vm3, %v7421_v46  ;;  %v7391_v54 = vadd.f32 %v12168_v17, %v7241_v53 }
 0x5fa   : > { %v7424_v55 = vmax.f32 %v7392_v49, 0.0 }
 0x5fb   : > { %v7423_v42 = vmax.f32 %v7391_v54, 0.0  ;;  %v9615_v4 = vpop.f32.mrb[14].mxu1 }
 0x5fc   : > { %7456 = vst.msk [vmem:[%s12176_s21 + $0x68] sm:$0xff] %vm3864_vm3, %v7424_v55  ;;  %v7394_v28 = vadd.f32 %v9615_v4, %v12168_v17  ;;  %v7251_v33 = vpop.f32.mrb[15].mxu1 }
 0x5fd   : > { %7455 = vst.msk [vmem:[%s12176_s21 + $0x60] sm:$0xff] %vm3864_vm3, %v7423_v42  ;;  %v7393_v11 = vadd.f32 %v12168_v17, %v7251_v33 }
 0x5fe   : > { %v7426_v12 = vmax.f32 %v7394_v28, 0.0 }
 0x5ff   : > { %v7425_v48 = vmax.f32 %v7393_v11, 0.0  ;;  %v9618_v51 = vpop.f32.mrb[16].mxu1 }
 0x600   : > { %7458 = vst.msk [vmem:[%s12176_s21 + $0x78] sm:$0xff] %vm3864_vm3, %v7426_v12  ;;  %v7396_v59 = vadd.f32 %v9618_v51, %v12168_v17  ;;  %v7261_v14 = vpop.f32.mrb[17].mxu1 }
 0x601   : > { %7457 = vst.msk [vmem:[%s12176_s21 + $0x70] sm:$0xff] %vm3864_vm3, %v7425_v48  ;;  %v7395_v62 = vadd.f32 %v12168_v17, %v7261_v14 }
 0x602   : > { %v7428_v21 = vmax.f32 %v7396_v59, 0.0 }
 0x603   : > { %v7427_v38 = vmax.f32 %v7395_v62, 0.0  ;;  %v9621_v3 = vpop.f32.mrb[18].mxu1 }
 0x604   : > { %7460 = vst.msk [vmem:[%s12176_s21 + $0x88] sm:$0xff] %vm3864_vm3, %v7428_v21  ;;  %v7398_v7 = vadd.f32 %v9621_v3, %v12168_v17  ;;  %v7271_v25 = vpop.f32.mrb[19].mxu1 }
 0x605   : > { %7459 = vst.msk [vmem:[%s12176_s21 + $0x80] sm:$0xff] %vm3864_vm3, %v7427_v38  ;;  %v7397_v56 = vadd.f32 %v12168_v17, %v7271_v25 }
 0x606   : > { %v7430_v57 = vmax.f32 %v7398_v7, 0.0 }
 0x607   : > { %v7429_v61 = vmax.f32 %v7397_v56, 0.0  ;;  %v9624_v15 = vpop.f32.mrb[20].mxu1 }
 0x608   : > { %7462 = vst.msk [vmem:[%s12176_s21 + $0x98] sm:$0xff] %vm3864_vm3, %v7430_v57  ;;  %v7400_v16 = vadd.f32 %v9624_v15, %v12168_v17  ;;  %v7281_v30 = vpop.f32.mrb[21].mxu1 }
 0x609   : > { %7461 = vst.msk [vmem:[%s12176_s21 + $0x90] sm:$0xff] %vm3864_vm3, %v7429_v61  ;;  %v7399_v19 = vadd.f32 %v12168_v17, %v7281_v30 }
 0x60a   : > { %v7432_v0 = vmax.f32 %v7400_v16, 0.0 }
 0x60b   : > { %v7431_v20 = vmax.f32 %v7399_v19, 0.0  ;;  %v9627_v22 = vpop.f32.mrb[22].mxu1 }
 0x60c   : > { %7464 = vst.msk [vmem:[%s12176_s21 + $0xa8] sm:$0xff] %vm3864_vm3, %v7432_v0  ;;  %v7402_v26 = vadd.f32 %v9627_v22, %v12168_v17  ;;  %v7291_v31 = vpop.f32.mrb[23].mxu1 }
 0x60d   : > { %7463 = vst.msk [vmem:[%s12176_s21 + $0xa0] sm:$0xff] %vm3864_vm3, %v7431_v20  ;;  %v7401_v32 = vadd.f32 %v12168_v17, %v7291_v31 }
 0x60e   : > { %v7434_v37 = vmax.f32 %v7402_v26, 0.0 }
 0x60f   : > { %v7433_v39 = vmax.f32 %v7401_v32, 0.0  ;;  %v9630_v41 = vpop.f32.mrb[24].mxu1 }
 0x610   : > { %7466 = vst.msk [vmem:[%s12176_s21 + $0xb8] sm:$0xff] %vm3864_vm3, %v7434_v37  ;;  %v7404_v40 = vadd.f32 %v9630_v41, %v12168_v17  ;;  %v7301_v5 = vpop.f32.mrb[25].mxu1 }
 0x611   : > { %7465 = vst.msk [vmem:[%s12176_s21 + $0xb0] sm:$0xff] %vm3864_vm3, %v7433_v39  ;;  %v7403_v63 = vadd.f32 %v12168_v17, %v7301_v5 }
 0x612   : > { %v7436_v35 = vmax.f32 %v7404_v40, 0.0 }
 0x613   : > { %v7435_v8 = vmax.f32 %v7403_v63, 0.0  ;;  %v9633_v29 = vpop.f32.mrb[26].mxu1 }
 0x614   : > { %7468 = vst.msk [vmem:[%s12176_s21 + $0xc8] sm:$0xff] %vm3864_vm3, %v7436_v35  ;;  %v7406_v9 = vadd.f32 %v9633_v29, %v12168_v17  ;;  %v7311_v36 = vpop.f32.mrb[27].mxu1 }
 0x615   : > { %7467 = vst.msk [vmem:[%s12176_s21 + $0xc0] sm:$0xff] %vm3864_vm3, %v7435_v8  ;;  %v7405_v44 = vadd.f32 %v12168_v17, %v7311_v36 }
 0x616   : > { %v7438_v52 = vmax.f32 %v7406_v9, 0.0 }
 0x617   : > { %v7437_v60 = vmax.f32 %v7405_v44, 0.0  ;;  %v9636_v18 = vpop.f32.mrb[28].mxu1 }
 0x618   : > { %7470 = vst.msk [vmem:[%s12176_s21 + $0xd8] sm:$0xff] %vm3864_vm3, %v7438_v52  ;;  %v7408_v1 = vadd.f32 %v9636_v18, %v12168_v17  ;;  %v7321_v23 = vpop.f32.mrb[29].mxu1 }
 0x619   : > { %7469 = vst.msk [vmem:[%s12176_s21 + $0xd0] sm:$0xff] %vm3864_vm3, %v7437_v60  ;;  %v7407_v27 = vadd.f32 %v12168_v17, %v7321_v23 }
 0x61a   : > { %v7440_v2 = vmax.f32 %v7408_v1, 0.0 }
 0x61b   : > { %v7439_v34 = vmax.f32 %v7407_v27, 0.0  ;;  %v9639_v50 = vpop.f32.mrb[30].mxu1 }
 0x61c   : > { %7472 = vst.msk [vmem:[%s12176_s21 + $0xe8] sm:$0xff] %vm3864_vm3, %v7440_v2  ;;  %v7410_v58 = vadd.f32 %v9639_v50, %v12168_v17  ;;  %v7331_v10 = vpop.f32.mrb[31].mxu1 }
 0x61d   : > { %7471 = vst.msk [vmem:[%s12176_s21 + $0xe0] sm:$0xff] %vm3864_vm3, %v7439_v34  ;;  %v7409_v6 = vadd.f32 %v12168_v17, %v7331_v10 }
 0x61e   : > { %v7442_v24 = vmax.f32 %v7410_v58, 0.0 }
 0x61f   : > { %v7441_v13 = vmax.f32 %v7409_v6, 0.0 }
 0x620   : > { %7474 = vst.msk [vmem:[%s12176_s21 + $0xf8] sm:$0xff] %vm3864_vm3, %v7442_v24 }
 0x621   : > { %7473 = vst.msk [vmem:[%s12176_s21 + $0xf0] sm:$0xff] %vm3864_vm3, %v7441_v13 }
 0x622 PF: > { %s15_s18 = sadd.s32 1, %s10167_s18  }
 0x623   : > { %p12_p4 = scmp.ge.s32.totalorder %s15_s18, 4  }
 0x625   :  { %14 = sbr.rel (!%p12_p4) target bundleno = 1 (0x1), region = 90 }

</bundles_post_ra>
